<compile_context>
chip_gen: v5e
topology: v5e:2x2
jax: 0.10.0
libtpu: 0.0.40
codegen_flags: <defaults>
</compile_context>

<pallas_src>
import math
from functools import partial

import jax
import jax.numpy as jnp
from jax import lax
from jax.experimental import pallas as pl
from jax.experimental.pallas import tpu as pltpu

EPS = 5.960464477539063e-08  # matches CustomNorm default


def _round_up(a: int, b: int) -> int:
    return (a + b - 1) // b * b


def _ff_kernel(x_ref, gamma_ref, w1_ref, b1_ref, w2_ref, b2_ref, o_ref,
               xn_ref, acc_ref, *, scale):
    # x_ref:     (tm, dim_p)      f32
    # gamma_ref: (1, dim_p)       f32
    # w1_ref:    (dim_p, tk)      bf16
    # b1_ref:    (1, tk)          f32
    # w2_ref:    (tk, dim_p)      bf16
    # b2_ref:    (1, dim_p)       f32
    # o_ref:     (tm, dim_p)      f32  (resident across the j axis)
    # xn_ref:    (tm, dim_p)      bf16 scratch (normalized activations)
    # acc_ref:   (tm, dim_p)      f32  scratch (accumulator over dim_inner blocks)
    j = pl.program_id(1)

    @pl.when(j == 0)
    def _init():
        x = x_ref[...].astype(jnp.float32)
        # --- CustomNorm: x / max(||x||_2, eps) * sqrt(dim) * gamma ---
        l2 = jnp.sqrt(jnp.sum(x * x, axis=-1, keepdims=True))
        denom = jnp.maximum(l2, jnp.float32(EPS))      # clamp BEFORE reciprocal
        inv = pl.reciprocal(denom, approx=True)        # EUP, off the VALU
        xn = x * inv * jnp.float32(scale) * gamma_ref[...]
        xn_ref[...] = xn.astype(jnp.bfloat16)          # bf16 MXU operand
        acc_ref[...] = jnp.zeros_like(acc_ref)

    # --- Linear(dim -> dim_inner) block j, MXU bf16 with f32 accumulation ---
    h = jnp.dot(xn_ref[...], w1_ref[...],
                preferred_element_type=jnp.float32) + b1_ref[...]

    # --- exact GELU (erf form, PyTorch nn.GELU default), f32 on VPU/EUP ---
    h = 0.5 * h * (1.0 + lax.erf(h * jnp.float32(1.0 / math.sqrt(2.0))))

    # Dropout(p=0.0) is identity -> skipped.

    # --- Linear(dim_inner -> dim), accumulate this dim_inner block ---
    acc_ref[...] += jnp.dot(h.astype(jnp.bfloat16), w2_ref[...],
                            preferred_element_type=jnp.float32)

    @pl.when(j == pl.num_programs(1) - 1)
    def _finalize():
        o_ref[...] = (acc_ref[...] + b2_ref[...]).astype(o_ref.dtype)


def feed_forward(x, gamma, w1, b1, w2, b2, *, tm=256, tk=512):
    """x: (batch, seq, dim) f32. Returns (batch, seq, dim) f32."""
    B, S, dim = x.shape
    dim_inner = w1.shape[1]
    M = B * S

    # Lane-dense / MXU-aligned padded sizes.
    dim_p = _round_up(dim, 128)
    tk = min(tk, _round_up(dim_inner, 128))
    dim_inner_p = _round_up(dim_inner, tk)
    tm = min(tm, _round_up(M, 128))
    assert tm % 8 == 0 and tk % 128 == 0
    M_pad = _round_up(M, tm)

    grid_m = M_pad // tm
    grid_k = dim_inner_p // tk

    # Wrapper-side padding (zeros are exactly neutral for norm/matmul/GELU here).
    x2 = jnp.pad(x.reshape(M, dim).astype(jnp.float32),
                 ((0, M_pad - M), (0, dim_p - dim)))
    gamma_p = jnp.pad(gamma.astype(jnp.float32), (0, dim_p - dim)).reshape(1, dim_p)
    w1_p = jnp.pad(w1.astype(jnp.float32),
                   ((0, dim_p - dim), (0, dim_inner_p - dim_inner))).astype(jnp.bfloat16)
    b1_p = jnp.pad(b1.astype(jnp.float32),
                   (0, dim_inner_p - dim_inner)).reshape(1, dim_inner_p)
    w2_p = jnp.pad(w2.astype(jnp.float32),
                   ((0, dim_inner_p - dim_inner), (0, dim_p - dim))).astype(jnp.bfloat16)
    b2_p = jnp.pad(b2.astype(jnp.float32), (0, dim_p - dim)).reshape(1, dim_p)

    cost = pl.CostEstimate(
        flops=int(4 * M_pad * dim_p * dim_inner_p),
        transcendentals=int(M_pad * dim_inner_p + 2 * M_pad),
        bytes_accessed=int(2 * M_pad * dim_p * 4                 # x in + out
                           + 2 * dim_p * dim_inner_p * 2         # W1 + W2 (bf16)
                           + (dim_p * 2 + dim_inner_p) * 4),     # gamma, b1, b2
    )

    out = pl.pallas_call(
        partial(_ff_kernel, scale=dim ** 0.5),
        out_shape=jax.ShapeDtypeStruct((M_pad, dim_p), jnp.float32),
        grid_spec=pltpu.PrefetchScalarGridSpec(
            num_scalar_prefetch=0,
            grid=(grid_m, grid_k),
            in_specs=[
                pl.BlockSpec((tm, dim_p), lambda i, j: (i, 0)),         # x rows
                pl.BlockSpec((1, dim_p), lambda i, j: (0, 0)),          # gamma
                pl.BlockSpec((dim_p, tk), lambda i, j: (0, j)),         # W1 col block
                pl.BlockSpec((1, tk), lambda i, j: (0, j)),             # b1 block
                pl.BlockSpec((tk, dim_p), lambda i, j: (j, 0)),         # W2 row block
                pl.BlockSpec((1, dim_p), lambda i, j: (0, 0)),          # b2
            ],
            out_specs=pl.BlockSpec((tm, dim_p), lambda i, j: (i, 0)),
            scratch_shapes=[
                pltpu.VMEM((tm, dim_p), jnp.bfloat16),   # normalized x (bf16 operand)
                pltpu.VMEM((tm, dim_p), jnp.float32),    # f32 accumulator
            ],
        ),
        compiler_params=pltpu.CompilerParams(
            dimension_semantics=("parallel", "arbitrary"),
            vmem_limit_bytes=48 * 1024 * 1024,
        ),
        cost_estimate=cost,
    )(x2, gamma_p, w1_p, b1_p, w2_p, b2_p)

    return out[:M, :dim].reshape(B, S, dim).astype(x.dtype)


def _reference(x, gamma, w1, b1, w2, b2):
    # Pure f32 reference of the PyTorch module.
    dim = x.shape[-1]
    l2 = jnp.linalg.norm(x, axis=-1, keepdims=True)
    denom = jnp.maximum(l2, EPS)
    xn = x / denom * (dim ** 0.5) * gamma
    h = xn @ w1 + b1
    h = 0.5 * h * (1.0 + lax.erf(h / jnp.sqrt(2.0)))
    return h @ w2 + b2


if __name__ == "__main__":
    # Small shapes consistent with FeedForward(dim=64, mult=4)
    batch, seq, dim, mult = 2, 16, 64, 4
    dim_inner = dim * mult

    key = jax.random.PRNGKey(0)
    kx, kw1, kb1, kw2, kb2 = jax.random.split(key, 5)

    x = jax.random.normal(kx, (batch, seq, dim), dtype=jnp.float32)

    # Deterministic parameter init (PyTorch-style uniform bounds), gamma = ones.
    gamma = jnp.ones((dim,), dtype=jnp.float32)
    bound1 = 1.0 / math.sqrt(dim)
    w1 = jax.random.uniform(kw1, (dim, dim_inner), jnp.float32, -bound1, bound1)
    b1 = jax.random.uniform(kb1, (dim_inner,), jnp.float32, -bound1, bound1)
    bound2 = 1.0 / math.sqrt(dim_inner)
    w2 = jax.random.uniform(kw2, (dim_inner, dim), jnp.float32, -bound2, bound2)
    b2 = jax.random.uniform(kb2, (dim,), jnp.float32, -bound2, bound2)

    y = feed_forward(x, gamma, w1, b1, w2, b2)
    y = jax.block_until_ready(y)

    y_ref = _reference(x, gamma, w1, b1, w2, b2)
    assert y.shape == (batch, seq, dim)
    # bf16 MXU operands + approx reciprocal -> relaxed tolerance vs the f32 reference.
    max_err = float(jnp.max(jnp.abs(y - y_ref)))
    assert jnp.allclose(y, y_ref, atol=3e-2, rtol=3e-2), f"mismatch vs reference (max abs err {max_err})"

    print("KERNEL_OK")
</pallas_src>

<mosaic_0001>
module attributes {stable_mosaic.version = 11 : i64} {
  func.func @_ff_kernel(%arg0: i32, %arg1: i32, %arg2: memref<128x128xf32, #tpu.memory_space<vmem>>, %arg3: memref<1x128xf32, #tpu.memory_space<vmem>>, %arg4: memref<128x256xbf16, #tpu.memory_space<vmem>>, %arg5: memref<1x256xf32, #tpu.memory_space<vmem>>, %arg6: memref<256x128xbf16, #tpu.memory_space<vmem>>, %arg7: memref<1x128xf32, #tpu.memory_space<vmem>>, %arg8: memref<128x128xf32, #tpu.memory_space<vmem>>, %arg9: memref<128x128xbf16, #tpu.memory_space<vmem>>, %arg10: memref<128x128xf32, #tpu.memory_space<vmem>>) attributes {dimension_semantics = [#tpu.dimension_semantics<parallel>, #tpu.dimension_semantics<arbitrary>], iteration_bounds = array<i64: 1, 1>, scalar_prefetch = 0 : i64, scratch_operands = 2 : i64, tpu.core_type = #tpu.core_type<tc>, window_params = [{transform_indices = @transform_0, window_bounds = array<i64: 128, 128>}, {pipeline_mode = #tpu.pipeline_mode<synchronous>, transform_indices = @transform_1, window_bounds = array<i64: 1, 128>}, {transform_indices = @transform_2, window_bounds = array<i64: 128, 256>}, {transform_indices = @transform_3, window_bounds = array<i64: 1, 256>}, {transform_indices = @transform_4, window_bounds = array<i64: 256, 128>}, {pipeline_mode = #tpu.pipeline_mode<synchronous>, transform_indices = @transform_5, window_bounds = array<i64: 1, 128>}, {transform_indices = @transform_6, window_bounds = array<i64: 128, 128>}]} {
    %c0_i32 = arith.constant 0 : i32
    %0 = arith.cmpi eq, %arg1, %c0_i32 : i32
    %1 = arith.extui %0 : i1 to i32
    %c0_i32_0 = arith.constant 0 : i32
    %2 = arith.cmpi ne, %1, %c0_i32_0 : i32
    scf.if %2 {
      %c0_18 = arith.constant 0 : index
      %c0_19 = arith.constant 0 : index
      %26 = vector.load %arg2[%c0_18, %c0_19] : memref<128x128xf32, #tpu.memory_space<vmem>>, vector<128x128xf32>
      %27 = arith.mulf %26, %26 : vector<128x128xf32>
      %cst_20 = arith.constant dense<0.000000e+00> : vector<128xf32>
      %28 = vector.multi_reduction <add>, %27, %cst_20 [1] : vector<128x128xf32> to vector<128xf32>
      %29 = vector.shape_cast %28 : vector<128xf32> to vector<128x1xf32>
      %30 = math.sqrt %29 : vector<128x1xf32>
      %cst_21 = arith.constant 5.96046448E-8 : f32
      %31 = vector.broadcast %cst_21 : f32 to vector<128x1xf32>
      %32 = arith.maximumf %30, %31 : vector<128x1xf32>
      %33 = tpu.reciprocal %32 {approx = true} : vector<128x1xf32> -> vector<128x1xf32>
      %34 = vector.broadcast %33 : vector<128x1xf32> to vector<128x128xf32>
      %35 = arith.mulf %26, %34 : vector<128x128xf32>
      %cst_22 = arith.constant 8.000000e+00 : f32
      %36 = vector.broadcast %cst_22 : f32 to vector<128x128xf32>
      %37 = arith.mulf %35, %36 : vector<128x128xf32>
      %c0_23 = arith.constant 0 : index
      %c0_24 = arith.constant 0 : index
      %38 = vector.load %arg3[%c0_23, %c0_24] : memref<1x128xf32, #tpu.memory_space<vmem>>, vector<1x128xf32>
      %39 = vector.broadcast %38 : vector<1x128xf32> to vector<128x128xf32>
      %40 = arith.mulf %37, %39 : vector<128x128xf32>
      %41 = arith.truncf %40 : vector<128x128xf32> to vector<128x128xbf16>
      %c0_25 = arith.constant 0 : index
      %c0_26 = arith.constant 0 : index
      %42 = vector.load %arg9[%c0_25, %c0_26] : memref<128x128xbf16, #tpu.memory_space<vmem>>, vector<128x128xbf16>
      tpu.vector_store %arg9[%c0_25, %c0_26], %41 {strides = array<i32>} : memref<128x128xbf16, #tpu.memory_space<vmem>>, vector<128x128xbf16>,
      %cst_27 = arith.constant 0.000000e+00 : f32
      %43 = vector.broadcast %cst_27 : f32 to vector<128x128xf32>
      %c0_28 = arith.constant 0 : index
      %c0_29 = arith.constant 0 : index
      %44 = vector.load %arg10[%c0_28, %c0_29] : memref<128x128xf32, #tpu.memory_space<vmem>>, vector<128x128xf32>
      tpu.vector_store %arg10[%c0_28, %c0_29], %43 {strides = array<i32>} : memref<128x128xf32, #tpu.memory_space<vmem>>, vector<128x128xf32>,
    } else {
    }
    %c0 = arith.constant 0 : index
    %c0_1 = arith.constant 0 : index
    %3 = vector.load %arg9[%c0, %c0_1] : memref<128x128xbf16, #tpu.memory_space<vmem>>, vector<128x128xbf16>
    %c0_2 = arith.constant 0 : index
    %c0_3 = arith.constant 0 : index
    %4 = vector.load %arg4[%c0_2, %c0_3] : memref<128x256xbf16, #tpu.memory_space<vmem>>, vector<128x256xbf16>
    %cst = arith.constant dense<0.000000e+00> : vector<128x256xf32>
    %5 = tpu.matmul %3, %4, %cst {dimension_numbers = #tpu.dot_dimension_numbers<[1], [0], [0], [1], [0, 0, 1, 1], [], []>} : vector<128x128xbf16>, vector<128x256xbf16>, vector<128x256xf32> -> vector<128x256xf32>
    %c0_4 = arith.constant 0 : index
    %c0_5 = arith.constant 0 : index
    %6 = vector.load %arg5[%c0_4, %c0_5] : memref<1x256xf32, #tpu.memory_space<vmem>>, vector<1x256xf32>
    %7 = vector.broadcast %6 : vector<1x256xf32> to vector<128x256xf32>
    %8 = arith.addf %5, %7 : vector<128x256xf32>
    %cst_6 = arith.constant 5.000000e-01 : f32
    %9 = vector.broadcast %cst_6 : f32 to vector<128x256xf32>
    %10 = arith.mulf %9, %8 : vector<128x256xf32>
    %cst_7 = arith.constant 0.707106769 : f32
    %11 = vector.broadcast %cst_7 : f32 to vector<128x256xf32>
    %12 = arith.mulf %8, %11 : vector<128x256xf32>
    %13 = math.erf %12 : vector<128x256xf32>
    %cst_8 = arith.constant 1.000000e+00 : f32
    %14 = vector.broadcast %cst_8 : f32 to vector<128x256xf32>
    %15 = arith.addf %14, %13 : vector<128x256xf32>
    %16 = arith.mulf %10, %15 : vector<128x256xf32>
    %c0_9 = arith.constant 0 : index
    %c0_10 = arith.constant 0 : index
    %17 = vector.load %arg10[%c0_9, %c0_10] : memref<128x128xf32, #tpu.memory_space<vmem>>, vector<128x128xf32>
    %18 = arith.truncf %16 : vector<128x256xf32> to vector<128x256xbf16>
    %c0_11 = arith.constant 0 : index
    %c0_12 = arith.constant 0 : index
    %19 = vector.load %arg6[%c0_11, %c0_12] : memref<256x128xbf16, #tpu.memory_space<vmem>>, vector<256x128xbf16>
    %cst_13 = arith.constant dense<0.000000e+00> : vector<128x128xf32>
    %20 = tpu.matmul %18, %19, %cst_13 {dimension_numbers = #tpu.dot_dimension_numbers<[1], [0], [0], [1], [0, 0, 1, 1], [], []>} : vector<128x256xbf16>, vector<256x128xbf16>, vector<128x128xf32> -> vector<128x128xf32>
    %21 = arith.addf %17, %20 : vector<128x128xf32>
    %c0_14 = arith.constant 0 : index
    %c0_15 = arith.constant 0 : index
    %22 = vector.load %arg10[%c0_14, %c0_15] : memref<128x128xf32, #tpu.memory_space<vmem>>, vector<128x128xf32>
    tpu.vector_store %arg10[%c0_14, %c0_15], %21 {strides = array<i32>} : memref<128x128xf32, #tpu.memory_space<vmem>>, vector<128x128xf32>,
    %c0_i32_16 = arith.constant 0 : i32
    %23 = arith.cmpi eq, %arg1, %c0_i32_16 : i32
    %24 = arith.extui %23 : i1 to i32
    %c0_i32_17 = arith.constant 0 : i32
    %25 = arith.cmpi ne, %24, %c0_i32_17 : i32
    scf.if %25 {
      %c0_18 = arith.constant 0 : index
      %c0_19 = arith.constant 0 : index
      %26 = vector.load %arg10[%c0_18, %c0_19] : memref<128x128xf32, #tpu.memory_space<vmem>>, vector<128x128xf32>
      %c0_20 = arith.constant 0 : index
      %c0_21 = arith.constant 0 : index
      %27 = vector.load %arg7[%c0_20, %c0_21] : memref<1x128xf32, #tpu.memory_space<vmem>>, vector<1x128xf32>
      %28 = vector.broadcast %27 : vector<1x128xf32> to vector<128x128xf32>
      %29 = arith.addf %26, %28 : vector<128x128xf32>
      %c0_22 = arith.constant 0 : index
      %c0_23 = arith.constant 0 : index
      %30 = vector.load %arg8[%c0_22, %c0_23] : memref<128x128xf32, #tpu.memory_space<vmem>>, vector<128x128xf32>
      tpu.vector_store %arg8[%c0_22, %c0_23], %29 {strides = array<i32>} : memref<128x128xf32, #tpu.memory_space<vmem>>, vector<128x128xf32>,
    } else {
    }
    return
  }
  func.func @transform_0(%arg0: i32, %arg1: i32) -> (i32, i32) {
    %c0_i32 = arith.constant 0 : i32
    %c0_i32_0 = arith.constant 0 : i32
    return %arg0, %c0_i32 : i32, i32
  }
  func.func @transform_1(%arg0: i32, %arg1: i32) -> (i32, i32) {
    %c0_i32 = arith.constant 0 : i32
    %c0_i32_0 = arith.constant 0 : i32
    %c0_i32_1 = arith.constant 0 : i32
    return %c0_i32, %c0_i32_0 : i32, i32
  }
  func.func @transform_2(%arg0: i32, %arg1: i32) -> (i32, i32) {
    %c0_i32 = arith.constant 0 : i32
    %c0_i32_0 = arith.constant 0 : i32
    return %c0_i32, %arg1 : i32, i32
  }
  func.func @transform_3(%arg0: i32, %arg1: i32) -> (i32, i32) {
    %c0_i32 = arith.constant 0 : i32
    %c0_i32_0 = arith.constant 0 : i32
    return %c0_i32, %arg1 : i32, i32
  }
  func.func @transform_4(%arg0: i32, %arg1: i32) -> (i32, i32) {
    %c0_i32 = arith.constant 0 : i32
    %c0_i32_0 = arith.constant 0 : i32
    return %arg1, %c0_i32 : i32, i32
  }
  func.func @transform_5(%arg0: i32, %arg1: i32) -> (i32, i32) {
    %c0_i32 = arith.constant 0 : i32
    %c0_i32_0 = arith.constant 0 : i32
    %c0_i32_1 = arith.constant 0 : i32
    return %c0_i32, %c0_i32_0 : i32, i32
  }
  func.func @transform_6(%arg0: i32, %arg1: i32) -> (i32, i32) {
    %c0_i32 = arith.constant 0 : i32
    %c0_i32_0 = arith.constant 0 : i32
    return %arg0, %c0_i32 : i32, i32
  }
}

</mosaic_0001>

<bundles_post_ra>
// kernel: tpu_custom_call.1
= control target key start
LH: loop header
LB: loop body
LE: loop exit
PB: predicated region body
PF: predicated region fallthrough
CT: control target
= control target key end

     0   :  { %11 = vsyncpa [#allocation5], 0  ;;  %s4732_s0 = inlined_call_operand.hbm [shape: f32[128,128], index: 0, kind: input, shape index: {}]   ;;  %s4733_s1 = inlined_call_operand.hbm [shape: f32[1,128], index: 1, kind: input, shape index: {}]   ;;  %s4734_s2 = inlined_call_operand.hbm [shape: bf16[128,256], index: 2, kind: input, shape index: {}]   ;;  %s4735_s3 = inlined_call_operand.vmem [shape: f32[1,256], index: 3, kind: input, shape index: {}]   ;;  %s4736_s4 = inlined_call_operand.hbm [shape: bf16[256,128], index: 4, kind: input, shape index: {}]   ;;  %s4737_s5 = inlined_call_operand.vmem [shape: f32[1,128], index: 5, kind: input, shape index: {}]   ;;  %s4738_s6 = inlined_call_operand.hbm [shape: f32[128,128], index: 6, kind: output, shape index: {}]  }
   0x1   :  { %12 = vsyncpa [#allocation8], 0 }
   0x2   :  { %13 = vsyncpa [#allocation11], 0  ;;  %s33_s23 = sshll.u32 %s4733_s1, 4  ;;  %s34_s23 = int_to_ptr.hbm [resolvable:$true] %s33_s23 }
   0x3   :  { %14 = vsyncpa [#allocation6], 0  ;;  %s3061_s24 = smov [#allocation7]   ;;  %s19_s28 = sshll.u32 %s4732_s0, 4  ;;  %s20_s28 = int_to_ptr.hbm [resolvable:$true] %s19_s28 }
   0x4   :  { %s35_s25 = sshll.u32 %s3061_s24, 4  ;;  %s3062_s29 = smov [#allocation4]   ;;  %s36_s25 = int_to_ptr.vmem [resolvable:$true] %s35_s25 }
   0x5   :  { %38 = dma.hbm_to_vmem [thread:$0]  %s34_s23, 16, %s36_s25, [#allocation8]  }
   0x6   :  { %s21_s30 = sshll.u32 %s3062_s29, 4  ;;  %s3063_s7 = smov 128   ;;  %s22_s30 = int_to_ptr.vmem [resolvable:$true] %s21_s30 }
   0x7   :  { %s3064_s8 = smov 8   ;;  %s43_s10 = sshll.u32 %s4734_s2, 4  ;;  %s44_s10 = int_to_ptr.hbm [resolvable:$true] %s43_s10 }
   0x8   :  { %27 = dma.hbm_to_vmem [thread:$0]  %s20_s28, 2048, %s22_s30, [#allocation5], %s3063_s7, %s3063_s7, %s3064_s8  }
   0x9   :  { %s3065_s11 = smov [#allocation9]   ;;  %s58_s14 = sshll.u32 %s4736_s4, 4  ;;  %s59_s14 = int_to_ptr.hbm [resolvable:$true] %s58_s14 }
   0xa   :  { %s45_s12 = sshll.u32 %s3065_s11, 4  ;;  %s3066_s15 = smov [#allocation10]   ;;  %s46_s12 = int_to_ptr.vmem [resolvable:$true] %s45_s12 }
   0xb   :  { %51 = dma.hbm_to_vmem [thread:$0]  %s44_s10, 2048, %s46_s12, [#allocation8], %s3063_s7, %s3063_s7, %s3064_s8  }
   0xc   :  { %s60_s16 = sshll.u32 %s3066_s15, 4  ;;  %s3067_s17 = smov 64   ;;  %s61_s16 = int_to_ptr.vmem [resolvable:$true] %s60_s16 }
   0xd   :  { %s3068_s18 = smov 4  }
   0xe   :  { %66 = dma.hbm_to_vmem [thread:$0]  %s59_s14, 2048, %s61_s16, [#allocation11], %s3067_s17, %s3067_s17, %s3068_s18  }
   0xf   :  { %3053 = dma.done.wait [#allocation5], 2048  }
  0x10   :  { %3054 = vsyncadd [#allocation5], 4294965248 }
  0x11   :  { %3055 = dma.done.wait [#allocation8], 2064  }
  0x12   :  { %3056 = vsyncadd [#allocation8], 4294965232 }
  0x13   :  { %3057 = dma.done.wait [#allocation11], 2048  }
  0x14   :  { %3058 = vsyncadd [#allocation11], 4294965248  ;;  %v3123_v0 = vld [vmem:[#allocation4 + $0x10] sm:$0xff]  ;;  %v3125_v1 = vld [vmem:[#allocation4] sm:$0xff]  ;;  %s2500_s23 = sshll.u32 %s4738_s6, 4  ;;  %s2501_s23 = int_to_ptr.hbm [resolvable:$true] %s2500_s23 }
  0x15   :  { %v3127_v2 = vld [vmem:[#allocation4 + $0x20] sm:$0xff]  ;;  %v107_v3 = vmul.f32 %v3123_v0, %v3123_v0  ;;  %v105_v4 = vmul.f32 %v3125_v1, %v3125_v1  ;;  %v3135_v6 = vld [vmem:[#allocation4 + $0x18] sm:$0xff]  ;;  %v3137_v7 = vld [vmem:[#allocation4 + $0x8] sm:$0xff] }
  0x16   :  { %v109_v5 = vmul.f32 %v3127_v2, %v3127_v2  ;;  %v3139_v8 = vld [vmem:[#allocation4 + $0x28] sm:$0xff]  ;;  %v108_v9 = vmul.f32 %v3135_v6, %v3135_v6  ;;  %v106_v10 = vmul.f32 %v3137_v7, %v3137_v7  ;;  %v3147_v12 = vld [vmem:[#allocation4 + $0x38] sm:$0xff]  ;;  %v3149_v13 = vld [vmem:[#allocation4 + $0x30] sm:$0xff] }
  0x17   :  { %125 = vadd.xlane.f32.xlu1 %v107_v3  ;;  %121 = vadd.xlane.f32.xlu0 %v105_v4  ;;  %v110_v11 = vmul.f32 %v3139_v8, %v3139_v8  ;;  %v3151_v14 = vld [vmem:[#allocation4 + $0x40] sm:$0xff]  ;;  %v112_v15 = vmul.f32 %v3147_v12, %v3147_v12  ;;  %v111_v16 = vmul.f32 %v3149_v13, %v3149_v13  ;;  %v3159_v18 = vld [vmem:[#allocation4 + $0x48] sm:$0xff]  ;;  %v3161_v19 = vld [vmem:[#allocation4 + $0x50] sm:$0xff] }
  0x18   :  { %129 = vadd.xlane.f32.xlu2 %v109_v5  ;;  %v113_v17 = vmul.f32 %v3151_v14, %v3151_v14  ;;  %v3163_v20 = vld [vmem:[#allocation4 + $0x58] sm:$0xff]  ;;  %v114_v21 = vmul.f32 %v3159_v18, %v3159_v18  ;;  %v115_v22 = vmul.f32 %v3161_v19, %v3161_v19  ;;  %v3171_v24 = vld [vmem:[#allocation4 + $0x68] sm:$0xff]  ;;  %v3173_v25 = vld [vmem:[#allocation4 + $0x60] sm:$0xff] }
  0x19   :  { %v116_v23 = vmul.f32 %v3163_v20, %v3163_v20  ;;  %v3175_v26 = vld [vmem:[#allocation4 + $0x70] sm:$0xff]  ;;  %v118_v27 = vmul.f32 %v3171_v24, %v3171_v24  ;;  %v117_v28 = vmul.f32 %v3173_v25, %v3173_v25  ;;  %v3183_v30 = vld [vmem:[#allocation4 + $0x78] sm:$0xff]  ;;  %v2597_v38 = vld [vmem:[#allocation9 + $0x60] sm:$0xf] }
  0x1a   :  { %v119_v29 = vmul.f32 %v3175_v26, %v3175_v26  ;;  %v120_v31 = vmul.f32 %v3183_v30, %v3183_v30  ;;  %v2605_v32 = vld [vmem:[#allocation9 + $0x70] sm:$0xf]  ;;  %v2730_v33 = vld [vmem:[#allocation9 + $0x74] sm:$0xf0]  ;;  %v2729_v34 = vld [vmem:[#allocation9 + $0x74] sm:$0xf] }
  0x1b   :  { %v2606_v35 = vor.u32 %v2730_v33, %v2605_v32  ;;  %v2607_v36 = vld [vmem:[#allocation9 + $0x78] sm:$0xf0]  ;;  %v2728_v39 = vld [vmem:[#allocation9 + $0x64] sm:$0xf0]  ;;  %v2727_v40 = vld [vmem:[#allocation9 + $0x64] sm:$0xf] }
  0x1c   :  { %v2610_v37 = vor.u32 %v2729_v34, %v2607_v36  ;;  %v2598_v41 = vor.u32 %v2728_v39, %v2597_v38  ;;  %v2599_v42 = vld [vmem:[#allocation9 + $0x68] sm:$0xf0]  ;;  %v2589_v46 = vld [vmem:[#allocation9 + $0x50] sm:$0xf]  ;;  %v2726_v48 = vld [vmem:[#allocation9 + $0x54] sm:$0xf0] }
  0x1d   :  { %643 = vmatpush.bf16.msra.mxu0 %v2606_v35  ;;  %v2602_v43 = vor.u32 %v2727_v40, %v2599_v42  ;;  %v2725_v49 = vld [vmem:[#allocation9 + $0x54] sm:$0xf]  ;;  %v2591_v50 = vld [vmem:[#allocation9 + $0x58] sm:$0xf0]  ;;  %v2590_v51 = vor.u32 %v2726_v48, %v2589_v46  ;;  %v2581_v53 = vld [vmem:[#allocation9 + $0x40] sm:$0xf] }
  0x1e   :  { %692 = vmatpush.bf16.msra.mxu1 %v2610_v37  ;;  %v2594_v52 = vor.u32 %v2725_v49, %v2591_v50  ;;  %v2724_v54 = vld [vmem:[#allocation9 + $0x44] sm:$0xf0]  ;;  %v2723_v55 = vld [vmem:[#allocation9 + $0x44] sm:$0xf]  ;;  %v2583_v56 = vld [vmem:[#allocation9 + $0x48] sm:$0xf0] }
  0x1f   :  { %127 = vadd.xlane.f32.xlu1 %v108_v9  ;;  %123 = vadd.xlane.f32.xlu0 %v106_v10  ;;  %v2582_v57 = vor.u32 %v2724_v54, %v2581_v53  ;;  %v2586_v58 = vor.u32 %v2723_v55, %v2583_v56  ;;  %v2719_v33 = vld [vmem:[#allocation9 + $0x24] sm:$0xf]  ;;  %v2567_v38 = vld [vmem:[#allocation9 + $0x28] sm:$0xf0] }
  0x20   :  { %131 = vadd.xlane.f32.xlu2 %v110_v11  ;;  %v2573_v11 = vld [vmem:[#allocation9 + $0x30] sm:$0xf]  ;;  %v2570_v50 = vor.u32 %v2719_v33, %v2567_v38 }
  0x21   :  { %644 = vmatpush.bf16.msra.mxu0 %v2598_v41 }
  0x22   :  { %693 = vmatpush.bf16.msra.mxu1 %v2602_v43 }
  0x25   :  { %645 = vmatpush.bf16.msra.mxu0 %v2590_v51  ;;  %v2557_v51 = vld [vmem:[#allocation9 + $0x10] sm:$0xf] }
  0x26   :  { %694 = vmatpush.bf16.msra.mxu1 %v2594_v52  ;;  %v2718_v52 = vld [vmem:[#allocation9 + $0x14] sm:$0xf0] }
  0x27   :  { %135 = vadd.xlane.f32.xlu1 %v112_v15  ;;  %133 = vadd.xlane.f32.xlu0 %v111_v16  ;;  %v2722_v15 = vld [vmem:[#allocation9 + $0x34] sm:$0xf0] }
  0x28   :  { %137 = vadd.xlane.f32.xlu2 %v113_v17  ;;  %v2721_v17 = vld [vmem:[#allocation9 + $0x34] sm:$0xf]  ;;  %v2574_v32 = vor.u32 %v2722_v15, %v2573_v11  ;;  %v2558_v11 = vor.u32 %v2718_v52, %v2557_v51 }
  0x29   :  { %646 = vmatpush.bf16.msra.mxu0 %v2582_v57 }
  0x2a   :  { %695 = vmatpush.bf16.msra.mxu1 %v2586_v58 }
  0x2d   :  { %647 = vmatpush.bf16.msra.mxu0 %v2574_v32 }
  0x2f   :  { %139 = vadd.xlane.f32.xlu0 %v114_v21  ;;  %141 = vadd.xlane.f32.xlu1 %v115_v22  ;;  %v2575_v21 = vld [vmem:[#allocation9 + $0x38] sm:$0xf0] }
  0x30   :  { %143 = vadd.xlane.f32.xlu2 %v116_v23  ;;  %v2578_v37 = vor.u32 %v2721_v17, %v2575_v21 }
  0x32   :  { %696 = vmatpush.bf16.msra.mxu1 %v2578_v37 }
  0x36   :  { %697 = vmatpush.bf16.msra.mxu1 %v2570_v50 }
  0x37   :  { %147 = vadd.xlane.f32.xlu1 %v118_v27  ;;  %145 = vadd.xlane.f32.xlu0 %v117_v28  ;;  %v2565_v28 = vld [vmem:[#allocation9 + $0x20] sm:$0xf] }
  0x38   :  { %149 = vadd.xlane.f32.xlu2 %v119_v29  ;;  %v2720_v29 = vld [vmem:[#allocation9 + $0x24] sm:$0xf0] }
  0x39   :  { %v2566_v41 = vor.u32 %v2720_v29, %v2565_v28 }
  0x3b   :  { %648 = vmatpush.bf16.msra.mxu0 %v2566_v41 }
  0x3f   :  { %151 = vadd.xlane.f32.xlu0 %v120_v31  ;;  %649 = vmatpush.bf16.msra.mxu0 %v2558_v11 }
  0x8a   :  { %v3187_v44 = vpop.xlane.xlu1 %125  ;;  %v3189_v45 = vpop.xlane.xlu0 %121 }
  0x8b   :  { %2805 = vrsqrt.f32 %v3187_v44  ;;  %v3192_v47 = vpop.xlane.xlu2 %129  ;;  %vm184_vm0 = vcmp.eq.f32.partialorder %v3187_v44, inf  ;;  %vm186_vm1 = vcmp.eq.f32.partialorder %v3187_v44, 0.0  ;;  %v187_v23 = vand.u32 2147483648, %v3187_v44 }
  0x8c   :  { %2807 = vrsqrt.f32 %v3189_v45  ;;  %vm160_vm2 = vcmp.eq.f32.partialorder %v3189_v45, inf  ;;  %vm162_vm3 = vcmp.eq.f32.partialorder %v3189_v45, 0.0  ;;  %v163_v35 = vand.u32 2147483648, %v3189_v45 }
  0x8d   :  { %2809 = vrsqrt.f32 %v3192_v47  ;;  %vm208_vm4 = vcmp.eq.f32.partialorder %v3192_v47, inf  ;;  %vm210_vm5 = vcmp.eq.f32.partialorder %v3192_v47, 0.0  ;;  %v211_v54 = vand.u32 2147483648, %v3192_v47 }
  0x91   :  { %v2806_v59 = vpop.eup %2805 }
  0x92   :  { %v2808_v60 = vpop.eup %2807  ;;  %v178_v61 = vmul.f32 %v2806_v59, %v3187_v44  ;;  %v3197_v62 = vpop.xlane.xlu1 %127 }
  0x93   :  { %v3199_v63 = vpop.xlane.xlu0 %123  ;;  %v2810_v3 = vpop.eup %2809  ;;  %v154_v4 = vmul.f32 %v2808_v60, %v3189_v45  ;;  %2811 = vrsqrt.f32 %v3197_v62  ;;  %vm196_vm6 = vcmp.eq.f32.partialorder %v3197_v62, inf  ;;  %vm198_vm7 = vcmp.eq.f32.partialorder %v3197_v62, 0.0 }
  0x94   :  { %v3203_v5 = vpop.xlane.xlu2 %131  ;;  %v179_v9 = vmul.f32 %v2806_v59, %v178_v61  ;;  %v202_v10 = vmul.f32 %v2810_v3, %v3192_v47  ;;  %2813 = vrsqrt.f32 %v3199_v63  ;;  %v199_v61 = vand.u32 2147483648, %v3197_v62 }
  0x95   :  { %v155_v16 = vmul.f32 %v2808_v60, %v154_v4  ;;  %2815 = vrsqrt.f32 %v3203_v5  ;;  %vm172_vm8 = vcmp.eq.f32.partialorder %v3199_v63, inf  ;;  %v175_v17 = vand.u32 2147483648, %v3199_v63 }
  0x96   :  { %v180_v22 = vmul.f32 0.5, %v179_v9  ;;  %v203_v27 = vmul.f32 %v2810_v3, %v202_v10  ;;  %vm174_vm9 = vcmp.eq.f32.partialorder %v3199_v63, 0.0  ;;  %vm220_vm10 = vcmp.eq.f32.partialorder %v3203_v5, inf }
  0x97   :  { %v156_v31 = vmul.f32 0.5, %v155_v16  ;;  %vm222_vm11 = vcmp.eq.f32.partialorder %v3203_v5, 0.0 }
  0x98   :  { %v181_v34 = vsub.f32 1.5, %v180_v22  ;;  %v204_v36 = vmul.f32 0.5, %v203_v27 }
  0x99   :  { %v2812_v39 = vpop.eup %2811  ;;  %v157_v40 = vsub.f32 1.5, %v156_v31 }
  0x9a   :  { %v2814_v42 = vpop.eup %2813  ;;  %v182_v43 = vmul.f32 %v2806_v59, %v181_v34  ;;  %v205_v46 = vsub.f32 1.5, %v204_v36  ;;  %v190_v48 = vmul.f32 %v2812_v39, %v3197_v62  ;;  %v3217_v49 = vpop.xlane.xlu1 %135 }
  0x9b   :  { %v158_v53 = vmul.f32 %v2808_v60, %v157_v40  ;;  %v166_v55 = vmul.f32 %v2814_v42, %v3199_v63  ;;  %2817 = vrsqrt.f32 %v3217_v49  ;;  %v2816_v56 = vpop.eup %2815  ;;  %v3224_v4 = vpop.xlane.xlu0 %133  ;;  %vm244_vm12 = vcmp.eq.f32.partialorder %v3217_v49, inf }
  0x9c   :  { %v183_v57 = vmul.f32 %v182_v43, %v3187_v44  ;;  %v206_v58 = vmul.f32 %v2810_v3, %v205_v46  ;;  %v191_v59 = vmul.f32 %v2812_v39, %v190_v48  ;;  %v214_v10 = vmul.f32 %v2816_v56, %v3203_v5  ;;  %v2717_v43 = vld [vmem:[#allocation9 + $0x14] sm:$0xf]  ;;  %v2559_v46 = vld [vmem:[#allocation9 + $0x18] sm:$0xf0]  ;;  %v3251_v48 = vpop.xlane.xlu2 %137 }
  0x9d   :  { %v159_v9 = vmul.f32 %v158_v53, %v3189_v45  ;;  %v167_v60 = vmul.f32 %v2814_v42, %v166_v55  ;;  %v2549_v53 = vld [vmem:[#allocation9] sm:$0xf]  ;;  %vm246_vm13 = vcmp.eq.f32.partialorder %v3217_v49, 0.0  ;;  %vm232_vm14 = vcmp.eq.f32.partialorder %v3224_v4, inf }
  0x9e   :  { %v185_v15 = vsel %vm184_vm0, %v3187_v44, %v183_v57  ;;  %v207_v3 = vmul.f32 %v206_v58, %v3192_v47  ;;  %v192_v16 = vmul.f32 0.5, %v191_v59  ;;  %v215_v28 = vmul.f32 %v2816_v56, %v214_v10  ;;  %v2715_v59 = vld [vmem:[#allocation9 + $0x4] sm:$0xf] }
  0x9f   :  { %v188_v21 = vsel %vm186_vm1, %v187_v23, %v185_v15  ;;  %v161_v22 = vsel %vm160_vm2, %v3189_v45, %v159_v9  ;;  %v168_v27 = vmul.f32 0.5, %v167_v60  ;;  %v2562_v58 = vor.u32 %v2717_v43, %v2559_v46  ;;  %v2551_v9 = vld [vmem:[#allocation9 + $0x8] sm:$0xf0] }
  0xa0   :  { %v347_v29 = vmax.f32 %v188_v21, 5.9604645e-08  ;;  %v164_v31 = vsel %vm162_vm3, %v163_v35, %v161_v22  ;;  %v209_v32 = vsel %vm208_vm4, %v3192_v47, %v207_v3  ;;  %v193_v33 = vsub.f32 1.5, %v192_v16 }
  0xa1   :  { %v2818_v34 = vpop.eup %2817  ;;  %v345_v44 = vmax.f32 %v164_v31, 5.9604645e-08  ;;  %v212_v23 = vsel %vm210_vm5, %v211_v54, %v209_v32  ;;  %v169_v36 = vsub.f32 1.5, %v168_v27  ;;  %v216_v37 = vmul.f32 0.5, %v215_v28  ;;  %v2716_v54 = vld [vmem:[#allocation9 + $0x4] sm:$0xf0]  ;;  %698 = vmatpush.bf16.msra.mxu1 %v2562_v58 }
  0xa2   :  { %2819 = vrcp.f32 %v347_v29  ;;  %v349_v38 = vmax.f32 %v212_v23, 5.9604645e-08  ;;  %v194_v40 = vmul.f32 %v2812_v39, %v193_v33  ;;  %v238_v41 = vmul.f32 %v2818_v34, %v3217_v49  ;;  %v3282_v23 = vld [vmem:[#allocation7] ss:$0 sm:$0xff] }
  0xa3   :  { %2821 = vrcp.f32 %v345_v44  ;;  %v170_v45 = vmul.f32 %v2814_v42, %v169_v36  ;;  %v217_v35 = vsub.f32 1.5, %v216_v37  ;;  %v3255_v51 = vpop.xlane.xlu0 %139  ;;  %v223_v42 = vand.u32 2147483648, %v3203_v5 }
  0xa4   :  { %2823 = vrcp.f32 %v349_v38  ;;  %v195_v47 = vmul.f32 %v194_v40, %v3197_v62  ;;  %v239_v50 = vmul.f32 %v2818_v34, %v238_v41  ;;  %v2550_v21 = vor.u32 %v2716_v54, %v2549_v53 }
  0xa5   :  { %v171_v39 = vmul.f32 %v170_v45, %v3199_v63  ;;  %v218_v52 = vmul.f32 %v2816_v56, %v217_v35  ;;  %2825 = vrsqrt.f32 %v3224_v4  ;;  %v2554_v28 = vor.u32 %v2715_v59, %v2551_v9 }
  0xa6   :  { %v197_v55 = vsel %vm196_vm6, %v3197_v62, %v195_v47  ;;  %v240_v57 = vmul.f32 0.5, %v239_v50  ;;  %2827 = vrsqrt.f32 %v3251_v48  ;;  %650 = vmatpush.bf16.msra.mxu0 %v2550_v21  ;;  %vm234_vm15 = vcmp.eq.f32.partialorder %v3224_v4, 0.0  ;;  %v3304_v21 = vpop.xlane.xlu1 %141 }
  0xa7   :  { %v200_v60 = vsel %vm198_vm7, %v199_v61, %v197_v55  ;;  %v173_v56 = vsel %vm172_vm8, %v3199_v63, %v171_v39  ;;  %v219_v10 = vmul.f32 %v218_v52, %v3203_v5  ;;  %2829 = vrsqrt.f32 %v3255_v51  ;;  %699 = vmatpush.bf16.msra.mxu1 %v2554_v28 }
  0xa8   :  { %v2820_v11 = vpop.eup %2819  ;;  %v348_v15 = vmax.f32 %v200_v60, 5.9604645e-08  ;;  %v176_v3 = vsel %vm174_vm9, %v175_v17, %v173_v56  ;;  %v241_v16 = vsub.f32 1.5, %v240_v57  ;;  %v235_v43 = vand.u32 2147483648, %v3224_v4 }
  0xa9   :  { %v2822_v22 = vpop.eup %2821  ;;  %v379_v62 = vmul.f32 %v2820_v11, %v3123_v0  ;;  %v346_v61 = vmax.f32 %v176_v3, 5.9604645e-08  ;;  %v221_v27 = vsel %vm220_vm10, %v3203_v5, %v219_v10  ;;  %v247_v0 = vand.u32 2147483648, %v3217_v49 }
  0xaa   :  { %v2824_v29 = vpop.eup %2823  ;;  %v377_v31 = vmul.f32 %v2822_v22, %v3125_v1  ;;  %2831 = vrcp.f32 %v348_v15  ;;  %v224_v63 = vsel %vm222_vm11, %v223_v42, %v221_v27  ;;  %v242_v17 = vmul.f32 %v2818_v34, %v241_v16  ;;  %v3296_v42 = vpop.xlane.xlu2 %143 }
  0xab   :  { %v2826_v32 = vpop.eup %2825  ;;  %2833 = vrcp.f32 %v346_v61  ;;  %v350_v33 = vmax.f32 %v224_v63, 5.9604645e-08  ;;  %v395_v36 = vmul.f32 8.0, %v379_v62  ;;  %v381_v38 = vmul.f32 %v2824_v29, %v3127_v2 }
  0xac   :  { %v2828_v44 = vpop.eup %2827  ;;  %v243_v37 = vmul.f32 %v242_v17, %v3217_v49  ;;  %v226_v1 = vmul.f32 %v2826_v32, %v3224_v4  ;;  %v393_v34 = vmul.f32 8.0, %v377_v31  ;;  %vm256_vm0 = vcmp.eq.f32.partialorder %v3251_v48, inf }
  0xad   :  { %v2830_v5 = vpop.eup %2829  ;;  %2835 = vrcp.f32 %v350_v33  ;;  %v250_v40 = vmul.f32 %v2828_v44, %v3251_v48  ;;  %v415_v50 = vmul.f32 %v3282_v23, %v395_v36  ;;  %v397_v54 = vmul.f32 8.0, %v381_v38 }
  0xae   :  { %v245_v41 = vsel %vm244_vm12, %v3217_v49, %v243_v37  ;;  %v227_v45 = vmul.f32 %v2826_v32, %v226_v1  ;;  %v262_v52 = vmul.f32 %v2830_v5, %v3255_v51  ;;  %v413_v53 = vmul.f32 %v3282_v23, %v393_v34 }
  0xaf   :  { %v248_v35 = vsel %vm246_vm13, %v247_v0, %v245_v41  ;;  %v251_v46 = vmul.f32 %v2828_v44, %v250_v40  ;;  %vm258_vm1 = vcmp.eq.f32.partialorder %v3251_v48, 0.0  ;;  %v259_v62 = vand.u32 2147483648, %v3251_v48 }
  0xb0   :  { %v2832_v47 = vpop.eup %2831  ;;  %v352_v2 = vmax.f32 %v248_v35, 5.9604645e-08  ;;  %v228_v39 = vmul.f32 0.5, %v227_v45  ;;  %v263_v9 = vmul.f32 %v2830_v5, %v262_v52  ;;  %vm268_vm2 = vcmp.eq.f32.partialorder %v3255_v51, inf }
  0xb1   :  { %v2834_v49 = vpop.eup %2833  ;;  %v380_v55 = vmul.f32 %v2832_v47, %v3135_v6  ;;  %v252_v57 = vmul.f32 0.5, %v251_v46  ;;  %v417_v6 = vmul.f32 %v3282_v23, %v397_v54  ;;  %vm270_vm3 = vcmp.eq.f32.partialorder %v3255_v51, 0.0 }
  0xb2   :  { %v378_v58 = vmul.f32 %v2834_v49, %v3137_v7  ;;  %2837 = vrcp.f32 %v352_v2  ;;  %v229_v59 = vsub.f32 1.5, %v228_v39  ;;  %v264_v16 = vmul.f32 0.5, %v263_v9  ;;  %v3337_v49 = vpop.xlane.xlu0 %145 }
  0xb3   :  { %v2836_v60 = vpop.eup %2835  ;;  %v396_v56 = vmul.f32 8.0, %v380_v55  ;;  %v253_v10 = vsub.f32 1.5, %v252_v57  ;;  %2839 = vrsqrt.f32 %v3296_v42  ;;  %v271_v1 = vand.u32 2147483648, %v3255_v51 }
  0xb4   :  { %v394_v11 = vmul.f32 8.0, %v378_v58  ;;  %v382_v15 = vmul.f32 %v2836_v60, %v3139_v8  ;;  %v230_v3 = vmul.f32 %v2826_v32, %v229_v59  ;;  %v265_v29 = vsub.f32 1.5, %v264_v16 }
  0xb5   :  { %v416_v7 = vmul.f32 %v3282_v23, %v396_v56  ;;  %v254_v22 = vmul.f32 %v2828_v44, %v253_v10  ;;  %2841 = vrsqrt.f32 %v3304_v21  ;;  %vm292_vm4 = vcmp.eq.f32.partialorder %v3296_v42, inf }
  0xb6   :  { %v414_v61 = vmul.f32 %v3282_v23, %v394_v11  ;;  %v398_v27 = vmul.f32 8.0, %v382_v15  ;;  %v231_v28 = vmul.f32 %v230_v3, %v3224_v4  ;;  %v266_v0 = vmul.f32 %v2830_v5, %v265_v29  ;;  %v3356_v29 = vpop.xlane.xlu2 %149 }
  0xb7   :  { %v2755_v31 = vpack.c.bf16 %v416_v7, %v415_v50  ;;  %v255_v8 = vmul.f32 %v254_v22, %v3251_v48  ;;  %v3333_v50 = vpop.xlane.xlu1 %147  ;;  %vm294_vm5 = vcmp.eq.f32.partialorder %v3296_v42, 0.0  ;;  %v295_v56 = vand.u32 2147483648, %v3296_v42 }
  0xb8   :  { %v2838_v63 = vpop.eup %2837  ;;  %v2750_v17 = vpack.c.bf16 %v414_v61, %v413_v53  ;;  %v418_v32 = vmul.f32 %v3282_v23, %v398_v27  ;;  %v233_v33 = vsel %vm232_vm14, %v3224_v4, %v231_v28  ;;  %v267_v5 = vmul.f32 %v266_v0, %v3255_v51 }
  0xb9   :  { %v2840_v44 = vpop.eup %2839  ;;  %2787 = vst [vmem:[#allocation2] sm:$0xff] %v2755_v31   ;;  %v236_v36 = vsel %vm234_vm15, %v235_v43, %v233_v33  ;;  %v257_v37 = vsel %vm256_vm0, %v3251_v48, %v255_v8  ;;  %v384_v43 = vmul.f32 %v2838_v63, %v3147_v12  ;;  %vm280_vm6 = vcmp.eq.f32.partialorder %v3304_v21, inf }
  0xba   :  { %2751 = vst [vmem:[#allocation2 + $0x30] sm:$0xff] %v2750_v17   ;;  %v2760_v34 = vpack.c.bf16 %v418_v32, %v417_v6  ;;  %v351_v38 = vmax.f32 %v236_v36, 5.9604645e-08  ;;  %v260_v40 = vsel %vm258_vm1, %v259_v62, %v257_v37  ;;  %v286_v4 = vmul.f32 %v2840_v44, %v3296_v42 }
  0xbb   :  { %v353_v41 = vmax.f32 %v260_v40, 5.9604645e-08  ;;  %v269_v45 = vsel %vm268_vm2, %v3255_v51, %v267_v5  ;;  %v2842_v35 = vpop.eup %2841  ;;  %v400_v53 = vmul.f32 8.0, %v384_v43  ;;  %vm282_vm7 = vcmp.eq.f32.partialorder %v3304_v21, 0.0  ;;  %v3370_v40 = vpop.xlane.xlu0 %151 }
  0xbc   :  { %2788 = vst [vmem:[#allocation2 + $0x18] sm:$0xff] %v2760_v34   ;;  %2843 = vrcp.f32 %v351_v38  ;;  %v272_v46 = vsel %vm270_vm3, %v271_v1, %v269_v45  ;;  %v287_v47 = vmul.f32 %v2840_v44, %v286_v4  ;;  %v274_v2 = vmul.f32 %v2842_v35, %v3304_v21 }
  0xbd   :  { %2845 = vrcp.f32 %v353_v41  ;;  %v354_v48 = vmax.f32 %v272_v46, 5.9604645e-08  ;;  %v420_v11 = vmul.f32 %v3282_v23, %v400_v53  ;;  %v283_v22 = vand.u32 2147483648, %v3304_v21 }
  0xbe   :  { %2847 = vrsqrt.f32 %v3333_v50  ;;  %v288_v39 = vmul.f32 0.5, %v287_v47  ;;  %v275_v52 = vmul.f32 %v2842_v35, %v274_v2  ;;  %vm316_vm8 = vcmp.eq.f32.partialorder %v3333_v50, inf }
  0xbf   :  { %2849 = vrcp.f32 %v354_v48  ;;  %v319_v4 = vand.u32 2147483648, %v3333_v50  ;;  %vm318_vm9 = vcmp.eq.f32.partialorder %v3333_v50, 0.0  ;;  %vm304_vm10 = vcmp.eq.f32.partialorder %v3337_v49, inf }
  0xc0   :  { %v289_v54 = vsub.f32 1.5, %v288_v39  ;;  %2851 = vrsqrt.f32 %v3337_v49  ;;  %v276_v55 = vmul.f32 0.5, %v275_v52  ;;  %v2708_v47 = vld [vmem:[#allocation2] sm:$0xff]  ;;  %v307_v2 = vand.u32 2147483648, %v3337_v49 }
  0xc1   :  { %v2707_v51 = vld [vmem:[#allocation2 + $0x30] sm:$0xff]  ;;  %2853 = vrsqrt.f32 %v3356_v29  ;;  %vm306_vm11 = vcmp.eq.f32.partialorder %v3337_v49, 0.0  ;;  %vm328_vm12 = vcmp.eq.f32.partialorder %v3356_v29, inf  ;;  %vm330_vm13 = vcmp.eq.f32.partialorder %v3356_v29, 0.0 }
  0xc2   :  { %v2844_v12 = vpop.eup %2843  ;;  %651 = vmatmul.bf16.vlgmr.msra.gmra.mxu0 %v2707_v51  ;;  %700 = vmatmul.bf16.vlgmr.msra.gmra.mxu1 %v2707_v51  ;;  %v290_v59 = vmul.f32 %v2840_v44, %v289_v54  ;;  %v277_v10 = vsub.f32 1.5, %v276_v55  ;;  %vm340_vm14 = vcmp.eq.f32.partialorder %v3370_v40, inf  ;;  %vm342_vm15 = vcmp.eq.f32.partialorder %v3370_v40, 0.0 }
  0xc3   :  { %v2846_v57 = vpop.eup %2845  ;;  %v383_v58 = vmul.f32 %v2844_v12, %v3149_v13 }
  0xc4   :  { %v2848_v9 = vpop.eup %2847  ;;  %v385_v60 = vmul.f32 %v2846_v57, %v3151_v14  ;;  %v291_v13 = vmul.f32 %v290_v59, %v3296_v42  ;;  %v278_v7 = vmul.f32 %v2842_v35, %v277_v10 }
  0xc5   :  { %v399_v15 = vmul.f32 8.0, %v383_v58  ;;  %v310_v3 = vmul.f32 %v2848_v9, %v3333_v50  ;;  %v2850_v16 = vpop.eup %2849 }
  0xc6   :  { %v401_v6 = vmul.f32 8.0, %v385_v60  ;;  %v2852_v14 = vpop.eup %2851  ;;  %v386_v61 = vmul.f32 %v2850_v16, %v3159_v18  ;;  %v293_v27 = vsel %vm292_vm4, %v3296_v42, %v291_v13  ;;  %v279_v63 = vmul.f32 %v278_v7, %v3304_v21 }
  0xc7   :  { %v419_v62 = vmul.f32 %v3282_v23, %v399_v15  ;;  %v311_v28 = vmul.f32 %v2848_v9, %v310_v3  ;;  %v296_v8 = vsel %vm294_vm5, %v295_v56, %v293_v27  ;;  %v298_v17 = vmul.f32 %v2852_v14, %v3337_v49 }
  0xc8   :  { %v421_v31 = vmul.f32 %v3282_v23, %v401_v6  ;;  %v402_v33 = vmul.f32 8.0, %v386_v61  ;;  %v356_v0 = vmax.f32 %v296_v8, 5.9604645e-08  ;;  %v281_v44 = vsel %vm280_vm6, %v3304_v21, %v279_v63  ;;  %v2854_v21 = vpop.eup %2853 }
  0xc9   :  { %v2765_v32 = vpack.c.bf16 %v420_v11, %v419_v62  ;;  %v312_v18 = vmul.f32 0.5, %v311_v28  ;;  %v299_v36 = vmul.f32 %v2852_v14, %v298_v17  ;;  %v284_v42 = vsel %vm282_vm7, %v283_v22, %v281_v44 }
  0xca   :  { %v422_v37 = vmul.f32 %v3282_v23, %v402_v33  ;;  %2855 = vrcp.f32 %v356_v0  ;;  %v355_v34 = vmax.f32 %v284_v42, 5.9604645e-08  ;;  %v322_v39 = vmul.f32 %v2854_v21, %v3356_v29 }
  0xcb   :  { %2789 = vst [vmem:[#allocation2 + $0x10] sm:$0xff] %v2765_v32   ;;  %v313_v1 = vsub.f32 1.5, %v312_v18  ;;  %v300_v38 = vmul.f32 0.5, %v299_v36  ;;  %2857 = vrsqrt.f32 %v3370_v40  ;;  %v343_v28 = vand.u32 2147483648, %v3370_v40 }
  0xcc   :  { %v2770_v5 = vpack.c.bf16 %v422_v37, %v421_v31  ;;  %2859 = vrcp.f32 %v355_v34  ;;  %v323_v55 = vmul.f32 %v2854_v21, %v322_v39 }
  0xcd   :  { %v314_v41 = vmul.f32 %v2848_v9, %v313_v1  ;;  %v301_v45 = vsub.f32 1.5, %v300_v38 }
  0xce   :  { %2790 = vst [vmem:[#allocation2 + $0x8] sm:$0xff] %v2770_v5   ;;  %v324_v60 = vmul.f32 0.5, %v323_v55 }
  0xcf   :  { %v315_v35 = vmul.f32 %v314_v41, %v3333_v50  ;;  %v302_v43 = vmul.f32 %v2852_v14, %v301_v45 }
  0xd0   :  { %v2856_v46 = vpop.eup %2855  ;;  %v325_v13 = vsub.f32 1.5, %v324_v60  ;;  %v2744_v60 = vld [vmem:[#allocation10 + $0x68] sm:$0xff] }
  0xd1   :  { %v317_v48 = vsel %vm316_vm8, %v3333_v50, %v315_v35  ;;  %v388_v52 = vmul.f32 %v2856_v46, %v3163_v20  ;;  %v303_v51 = vmul.f32 %v302_v43, %v3337_v49  ;;  %v2858_v54 = vpop.eup %2857 }
  0xd2   :  { %v320_v53 = vsel %vm318_vm9, %v319_v4, %v317_v48  ;;  %656 = vmatmul.bf16.gmra.mxu0 %v2708_v47  ;;  %705 = vmatmul.bf16.gmra.mxu1 %v2708_v47  ;;  %v2860_v57 = vpop.eup %2859  ;;  %v334_v59 = vmul.f32 %v2858_v54, %v3370_v40  ;;  %v326_v6 = vmul.f32 %v2854_v21, %v325_v13  ;;  %v2710_v35 = vld [vmem:[#allocation2 + $0x10] sm:$0xff] }
  0xd3   :  { %v358_v12 = vmax.f32 %v320_v53, 5.9604645e-08  ;;  %v404_v50 = vmul.f32 8.0, %v388_v52  ;;  %v305_v58 = vsel %vm304_vm10, %v3337_v49, %v303_v51  ;;  %v387_v9 = vmul.f32 %v2860_v57, %v3161_v19  ;;  %v2738_v53 = vld [vmem:[#allocation10 + $0x38] sm:$0xff] }
  0xd4   :  { %v308_v20 = vsel %vm306_vm11, %v307_v2, %v305_v58  ;;  %v335_v10 = vmul.f32 %v2858_v54, %v334_v59  ;;  %v331_v49 = vand.u32 2147483648, %v3356_v29  ;;  %v327_v14 = vmul.f32 %v326_v6, %v3356_v29  ;;  %v2746_v51 = vld [vmem:[#allocation10 + $0x78] sm:$0xff]  ;;  %2309 = vmatpush.bf16.msra.mxu2 %v2738_v53  ;;  %v2745_v58 = vld [vmem:[#allocation10 + $0x70] sm:$0xff]  ;;  %v2743_v6 = vld [vmem:[#allocation10 + $0x60] sm:$0xff] }
  0xd5   :  { %2861 = vrcp.f32 %v358_v12  ;;  %v357_v56 = vmax.f32 %v308_v20, 5.9604645e-08  ;;  %v424_v11 = vmul.f32 %v3282_v23, %v404_v50  ;;  %v403_v15 = vmul.f32 8.0, %v387_v9  ;;  %v2711_v21 = vld [vmem:[#allocation2 + $0x8] sm:$0xff]  ;;  %2358 = vmatpush.bf16.msra.mxu3 %v2746_v51  ;;  %v2737_v50 = vld [vmem:[#allocation10 + $0x30] sm:$0xff] }
  0xd6   :  { %v336_v3 = vmul.f32 0.5, %v335_v10  ;;  %v329_v27 = vsel %vm328_vm12, %v3356_v29, %v327_v14  ;;  %v2709_v29 = vld [vmem:[#allocation2 + $0x18] sm:$0xff]  ;;  %v2736_v20 = vld [vmem:[#allocation10 + $0x28] sm:$0xff] }
  0xd7   :  { %2863 = vrcp.f32 %v357_v56  ;;  %v423_v16 = vmul.f32 %v3282_v23, %v403_v15  ;;  %v332_v63 = vsel %vm330_vm13, %v331_v49, %v329_v27 }
  0xd8   :  { %v337_v7 = vsub.f32 1.5, %v336_v3  ;;  %v359_v33 = vmax.f32 %v332_v63, 5.9604645e-08  ;;  %2310 = vmatpush.bf16.msra.mxu2 %v2737_v50  ;;  %v2742_v63 = vld [vmem:[#allocation10 + $0x58] sm:$0xff] }
  0xd9   :  { %v2775_v22 = vpack.c.bf16 %v424_v11, %v423_v16  ;;  %2359 = vmatpush.bf16.msra.mxu3 %v2745_v58  ;;  %v2735_v16 = vld [vmem:[#allocation10 + $0x20] sm:$0xff] }
  0xda   :  { %v338_v61 = vmul.f32 %v2858_v54, %v337_v7  ;;  %2865 = vrcp.f32 %v359_v33 }
  0xdb   :  { %v2862_v19 = vpop.eup %2861  ;;  %2791 = vst [vmem:[#allocation2 + $0x20] sm:$0xff] %v2775_v22  }
  0xdc   :  { %v390_v62 = vmul.f32 %v2862_v19, %v3171_v24  ;;  %v339_v17 = vmul.f32 %v338_v61, %v3370_v40  ;;  %2311 = vmatpush.bf16.msra.mxu2 %v2736_v20  ;;  %v2731_v20 = vld [vmem:[#allocation10] sm:$0xff] }
  0xdd   :  { %v2864_v31 = vpop.eup %2863  ;;  %2360 = vmatpush.bf16.msra.mxu3 %v2744_v60  ;;  %v2739_v60 = vld [vmem:[#allocation10 + $0x40] sm:$0xff] }
  0xde   :  { %v406_v8 = vmul.f32 8.0, %v390_v62  ;;  %v389_v32 = vmul.f32 %v2864_v31, %v3173_v25  ;;  %v341_v24 = vsel %vm340_vm14, %v3370_v40, %v339_v17 }
  0xdf   :  { %v344_v44 = vsel %vm342_vm15, %v343_v28, %v341_v24 }
  0xe0   :  { %v426_v0 = vmul.f32 %v3282_v23, %v406_v8  ;;  %v405_v18 = vmul.f32 8.0, %v389_v32  ;;  %v360_v36 = vmax.f32 %v344_v44, 5.9604645e-08  ;;  %v2866_v1 = vpop.eup %2865  ;;  %2312 = vmatpush.bf16.msra.mxu2 %v2735_v16  ;;  %v2734_v8 = vld [vmem:[#allocation10 + $0x18] sm:$0xff] }
  0xe1   :  { %v391_v25 = vmul.f32 %v2866_v1, %v3175_v26  ;;  %2361 = vmatpush.bf16.msra.mxu3 %v2743_v6 }
  0xe2   :  { %v425_v37 = vmul.f32 %v3282_v23, %v405_v18  ;;  %661 = vmatmul.bf16.gmra.mxu0 %v2709_v29  ;;  %710 = vmatmul.bf16.gmra.mxu1 %v2709_v29  ;;  %2867 = vrcp.f32 %v360_v36  ;;  %v2712_v43 = vld [vmem:[#allocation2 + $0x20] sm:$0xff] }
  0xe3   :  { %v407_v38 = vmul.f32 8.0, %v391_v25 }
  0xe4   :  { %v2780_v42 = vpack.c.bf16 %v426_v0, %v425_v37  ;;  %2313 = vmatpush.bf16.msra.mxu2 %v2734_v8 }
  0xe5   :  { %v427_v5 = vmul.f32 %v3282_v23, %v407_v38  ;;  %2362 = vmatpush.bf16.msra.mxu3 %v2742_v63  ;;  %v2741_v38 = vld [vmem:[#allocation10 + $0x50] sm:$0xff] }
  0xe6   :  { %2792 = vst [vmem:[#allocation2 + $0x28] sm:$0xff] %v2780_v42  }
  0xe8   :  { %v2868_v34 = vpop.eup %2867 }
  0xe9   :  { %v392_v40 = vmul.f32 %v2868_v34, %v3183_v30  ;;  %v2733_v34 = vld [vmem:[#allocation10 + $0x10] sm:$0xff]  ;;  %2363 = vmatpush.bf16.msra.mxu3 %v2741_v38 }
  0xea   :  { %2314 = vmatpush.bf16.msra.mxu2 %v2733_v34 }
  0xeb   :  { %v408_v41 = vmul.f32 8.0, %v392_v40 }
  0xed   :  { %v428_v4 = vmul.f32 %v3282_v23, %v408_v41  ;;  %v2713_v26 = vld [vmem:[#allocation2 + $0x28] sm:$0xff]  ;;  %v509_v23 = vld [vmem:[%s4735_s3] sm:$0x3] }
  0xee   :  { %v3410_v46 = vperm.slane %v509_v23, 0  ;;  %v3412_v48 = vperm.slane %v509_v23, 1 }
  0xef   :  { %v2785_v45 = vpack.c.bf16 %v428_v4, %v427_v5 }
  0xf1   :  { %2793 = vst [vmem:[#allocation2 + $0x38] sm:$0xff] %v2785_v45  }
  0xf2   :  { %666 = vmatmul.bf16.gmra.mxu0 %v2710_v35  ;;  %715 = vmatmul.bf16.gmra.mxu1 %v2710_v35  ;;  %v2732_v35 = vld [vmem:[#allocation10 + $0x8] sm:$0xff] }
  0xf3   :  { %2315 = vmatpush.bf16.msra.mxu2 %v2732_v35 }
  0xf7   :  { %2316 = vmatpush.bf16.msra.mxu2 %v2731_v20 }
  0xf8   :  { %v2714_v30 = vld [vmem:[#allocation2 + $0x38] sm:$0xff] }
 0x102   :  { %671 = vmatmul.bf16.gmra.mxu0 %v2711_v21  ;;  %720 = vmatmul.bf16.gmra.mxu1 %v2711_v21  ;;  %v2740_v21 = vld [vmem:[#allocation10 + $0x48] sm:$0xff] }
 0x103   :  { %2364 = vmatpush.bf16.msra.mxu3 %v2740_v21 }
 0x107   :  { %2365 = vmatpush.bf16.msra.mxu3 %v2739_v60 }
 0x112   :  { %676 = vmatmul.bf16.gmra.mxu0 %v2712_v43  ;;  %725 = vmatmul.bf16.gmra.mxu1 %v2712_v43 }
 0x122   :  { %681 = vmatmul.bf16.gmra.mxu0 %v2713_v26  ;;  %730 = vmatmul.bf16.gmra.mxu1 %v2713_v26 }
 0x132   :  { %686 = vmatmul.bf16.gmra.mxu0 %v2714_v30  ;;  %735 = vmatmul.bf16.gmra.mxu1 %v2714_v30 }
 0x13f   :  { %v652_v47 = vpop.f32.mrf.mxu0  ;;  %v701_v2 = vpop.f32.mrf.mxu1 }
 0x140   :  { %v3415_v39 = vadd.f32 %v652_v47, %v3410_v46  ;;  %v3418_v52 = vadd.f32 %v701_v2, %v3412_v48 }
 0x142   :  { %v3421_v54 = vmul.f32 0.70710677, %v3415_v39  ;;  %v3424_v12 = vmul.f32 0.70710677, %v3418_v52  ;;  %v3533_v35 = vmul.f32 0.5, %v3415_v39  ;;  %v3546_v39 = vmul.f32 0.5, %v3418_v52 }
 0x144   :  { %v805_v59 = vmul.f32 %v3421_v54, %v3421_v54  ;;  %v845_v9 = vmul.f32 %v3424_v12, %v3424_v12  ;;  %4749 = vst [vmem:[#allocation17_spill] sm:$0xff] %v3546_v39 }
 0x146   :  { %v3430_v56 = vmin.f32 %v805_v59, 16.0  ;;  %v3438_v15 = vmin.f32 %v845_v9, 16.0 }
 0x147   :  { %v654_v55 = vpop.f32.mrf.mxu0  ;;  %v703_v57 = vpop.f32.mrf.mxu1 }
 0x148   :  { %v3433_v10 = vadd.f32 %v654_v55, %v3410_v46  ;;  %v3436_v11 = vadd.f32 %v703_v57, %v3412_v48  ;;  %v807_v49 = vmul.f32 2.1237322e-06, %v3430_v56  ;;  %v847_v14 = vmul.f32 2.1237322e-06, %v3438_v15 }
 0x149   :  { %v818_v47 = vmul.f32 3.8918573e-05, %v3430_v56 }
 0x14a   :  { %v3442_v7 = vmul.f32 0.70710677, %v3433_v10  ;;  %v3445_v19 = vmul.f32 0.70710677, %v3436_v11  ;;  %v808_v62 = vadd.f32 0.00028619796, %v807_v49 }
 0x14b   :  { %v848_v17 = vadd.f32 0.00028619796, %v847_v14  ;;  %v819_v14 = vadd.f32 0.001143296, %v818_v47 }
 0x14c   :  { %v885_v61 = vmul.f32 %v3442_v7, %v3442_v7  ;;  %v925_v27 = vmul.f32 %v3445_v19, %v3445_v19  ;;  %v809_v24 = vmul.f32 %v808_v62, %v3430_v56 }
 0x14d   :  { %v849_v42 = vmul.f32 %v848_v17, %v3438_v15 }
 0x14e   :  { %v3462_v0 = vmin.f32 %v885_v61, 16.0  ;;  %v3464_v18 = vmin.f32 %v925_v27, 16.0  ;;  %v810_v1 = vadd.f32 0.0036580483, %v809_v24 }
 0x14f   :  { %v657_v13 = vpop.f32.mrf.mxu0  ;;  %v706_v3 = vpop.f32.mrf.mxu1  ;;  %v850_v43 = vadd.f32 0.0036580483, %v849_v42 }
 0x150   :  { %v3448_v22 = vadd.f32 %v657_v13, %v3410_v46  ;;  %v3459_v31 = vadd.f32 %v706_v3, %v3412_v48  ;;  %v887_v25 = vmul.f32 2.1237322e-06, %v3462_v0  ;;  %v927_v40 = vmul.f32 2.1237322e-06, %v3464_v18 }
 0x151   :  { %v811_v2 = vmul.f32 %v810_v1, %v3430_v56  ;;  %v851_v13 = vmul.f32 %v850_v43, %v3438_v15 }
 0x152   :  { %v3456_v28 = vmul.f32 0.70710677, %v3448_v22  ;;  %v3469_v44 = vmul.f32 0.70710677, %v3459_v31  ;;  %v888_v53 = vadd.f32 0.00028619796, %v887_v25  ;;  %v820_v25 = vmul.f32 %v819_v14, %v3430_v56 }
 0x153   :  { %v928_v57 = vadd.f32 0.00028619796, %v927_v40  ;;  %v812_v6 = vadd.f32 0.05243302, %v811_v2  ;;  %v852_v17 = vadd.f32 0.05243302, %v851_v13 }
 0x154   :  { %v965_v29 = vmul.f32 %v3456_v28, %v3456_v28  ;;  %v1005_v41 = vmul.f32 %v3469_v44, %v3469_v44  ;;  %v889_v49 = vmul.f32 %v888_v53, %v3462_v0  ;;  %v3552_v13 = vmul.f32 0.5, %v3433_v10 }
 0x155   :  { %v929_v27 = vmul.f32 %v928_v57, %v3464_v18  ;;  %v821_v57 = vadd.f32 0.014752088, %v820_v25  ;;  %v3571_v25 = vmul.f32 0.5, %v3436_v11 }
 0x156   :  { %v3480_v5 = vmin.f32 %v965_v29, 16.0  ;;  %v3500_v58 = vmin.f32 %v1005_v41, 16.0  ;;  %v813_v29 = vmul.f32 %v812_v6, %v3430_v56  ;;  %v890_v42 = vadd.f32 0.0036580483, %v889_v49  ;;  %4750 = vst [vmem:[#allocation18_spill] sm:$0xff] %v3552_v13 }
 0x157   :  { %v659_v32 = vpop.f32.mrf.mxu0  ;;  %v708_v33 = vpop.f32.mrf.mxu1  ;;  %v930_v21 = vadd.f32 0.0036580483, %v929_v27  ;;  %4751 = vst [vmem:[#allocation19_spill] sm:$0xff] %v3571_v25 }
 0x158   :  { %v3472_v36 = vadd.f32 %v659_v32, %v3410_v46  ;;  %v3475_v37 = vadd.f32 %v708_v33, %v3412_v48  ;;  %v967_v50 = vmul.f32 2.1237322e-06, %v3480_v5  ;;  %v1007_v62 = vmul.f32 2.1237322e-06, %v3500_v58 }
 0x159   :  { %v814_v53 = vadd.f32 0.18741608, %v813_v29  ;;  %v931_v6 = vmul.f32 %v930_v21, %v3464_v18 }
 0x15a   :  { %v3485_v4 = vmul.f32 0.70710677, %v3472_v36  ;;  %v3488_v45 = vmul.f32 0.70710677, %v3475_v37  ;;  %v968_v8 = vadd.f32 0.00028619796, %v967_v50  ;;  %v891_v50 = vmul.f32 %v890_v42, %v3462_v0 }
 0x15b   :  { %v1008_v34 = vadd.f32 0.00028619796, %v1007_v62 }
 0x15c   :  { %v1045_v26 = vmul.f32 %v3485_v4, %v3485_v4  ;;  %v1085_v51 = vmul.f32 %v3488_v45, %v3488_v45  ;;  %v969_v43 = vmul.f32 %v968_v8, %v3480_v5 }
 0x15d   :  { %v1009_v20 = vmul.f32 %v1008_v34, %v3500_v58  ;;  %v932_v34 = vadd.f32 0.05243302, %v931_v6 }
 0x15e   :  { %v3502_v59 = vmin.f32 %v1045_v26, 16.0  ;;  %v3508_v3 = vmin.f32 %v1085_v51, 16.0  ;;  %v970_v49 = vadd.f32 0.0036580483, %v969_v43 }
 0x15f   :  { %v662_v30 = vpop.f32.mrf.mxu0  ;;  %v711_v23 = vpop.f32.mrf.mxu1  ;;  %v1010_v29 = vadd.f32 0.0036580483, %v1009_v20 }
 0x160   :  { %v3497_v55 = vadd.f32 %v662_v30, %v3410_v46  ;;  %v3511_v16 = vadd.f32 %v711_v23, %v3412_v48  ;;  %v1047_v63 = vmul.f32 2.1237322e-06, %v3502_v59  ;;  %v1087_v32 = vmul.f32 2.1237322e-06, %v3508_v3 }
 0x161   :  { %v853_v30 = vmul.f32 %v852_v17, %v3438_v15 }
 0x162   :  { %v3505_v9 = vmul.f32 0.70710677, %v3497_v55  ;;  %v3521_v33 = vmul.f32 0.70710677, %v3511_v16  ;;  %v1048_v26 = vadd.f32 0.00028619796, %v1047_v63  ;;  %v815_v63 = vmul.f32 %v814_v53, %v3430_v56 }
 0x163   :  { %v1088_v23 = vadd.f32 0.00028619796, %v1087_v32  ;;  %v854_v62 = vadd.f32 0.18741608, %v853_v30  ;;  %v822_v32 = vmul.f32 %v821_v57, %v3430_v56 }
 0x164   :  { %v1125_v61 = vmul.f32 %v3505_v9, %v3505_v9  ;;  %v1165_v40 = vmul.f32 %v3521_v33, %v3521_v33  ;;  %v1049_v14 = vmul.f32 %v1048_v26, %v3502_v59  ;;  %v3576_v26 = vmul.f32 0.5, %v3448_v22 }
 0x165   :  { %v855_v43 = vmul.f32 %v854_v62, %v3438_v15  ;;  %v823_v20 = vadd.f32 0.112945676, %v822_v32  ;;  %v933_v22 = vmul.f32 %v932_v34, %v3464_v18 }
 0x166   :  { %v3525_v38 = vmin.f32 %v1125_v61, 16.0  ;;  %v3537_v47 = vmin.f32 %v1165_v40, 16.0  ;;  %v1089_v61 = vmul.f32 %v1088_v23, %v3508_v3  ;;  %v971_v40 = vmul.f32 %v970_v49, %v3480_v5  ;;  %4752 = vst [vmem:[#allocation20_spill] sm:$0xff] %v3576_v26 }
 0x167   :  { %v664_v24 = vpop.f32.mrf.mxu0  ;;  %v713_v1 = vpop.f32.mrf.mxu1  ;;  %v1050_v21 = vadd.f32 0.0036580483, %v1049_v14  ;;  %v1011_v49 = vmul.f32 %v1010_v29, %v3500_v58  ;;  %v934_v26 = vadd.f32 0.18741608, %v933_v22 }
 0x168   :  { %v3530_v41 = vadd.f32 %v664_v24, %v3410_v46  ;;  %v3540_v2 = vadd.f32 %v713_v1, %v3412_v48  ;;  %v1127_v60 = vmul.f32 2.1237322e-06, %v3525_v38  ;;  %v1167_v52 = vmul.f32 2.1237322e-06, %v3537_v47 }
 0x169   :  { %v892_v24 = vadd.f32 0.05243302, %v891_v50  ;;  %v1090_v30 = vadd.f32 0.0036580483, %v1089_v61  ;;  %v972_v62 = vadd.f32 0.05243302, %v971_v40  ;;  %v1051_v61 = vmul.f32 %v1050_v21, %v3502_v59 }
 0x16a   :  { %v3543_v51 = vmul.f32 0.70710677, %v3530_v41  ;;  %v3559_v27 = vmul.f32 0.70710677, %v3540_v2  ;;  %v1128_v42 = vadd.f32 0.00028619796, %v1127_v60 }
 0x16b   :  { %v1168_v23 = vadd.f32 0.00028619796, %v1167_v52  ;;  %v816_v60 = vadd.f32 1.1283791, %v815_v63  ;;  %v893_v6 = vmul.f32 %v892_v24, %v3462_v0  ;;  %v3598_v24 = vmul.f32 0.5, %v3459_v31 }
 0x16c   :  { %v1205_v10 = vmul.f32 %v3543_v51, %v3543_v51  ;;  %v1245_v1 = vmul.f32 %v3559_v27, %v3559_v27  ;;  %v1129_v14 = vmul.f32 %v1128_v42, %v3525_v38  ;;  %v1012_v40 = vadd.f32 0.05243302, %v1011_v49 }
 0x16d   :  { %v1169_v32 = vmul.f32 %v1168_v23, %v3537_v47  ;;  %4754 = vst [vmem:[#allocation22_spill] sm:$0xff] %v3598_v24  ;;  %v894_v34 = vadd.f32 0.18741608, %v893_v6  ;;  %v973_v23 = vmul.f32 %v972_v62, %v3480_v5  ;;  %v3608_v31 = vmul.f32 %v816_v60, %v3421_v54 }
 0x16e   :  { %v3578_v53 = vmin.f32 %v1205_v10, 16.0  ;;  %v3580_v57 = vmin.f32 %v1245_v1, 16.0  ;;  %v1091_v10 = vmul.f32 %v1090_v30, %v3508_v3  ;;  %v1130_v21 = vadd.f32 0.0036580483, %v1129_v14 }
 0x16f   :  { %v667_v8 = vpop.f32.mrf.mxu0  ;;  %v716_v11 = vpop.f32.mrf.mxu1  ;;  %v824_v30 = vmul.f32 %v823_v20, %v3430_v56  ;;  %v1170_v39 = vadd.f32 0.0036580483, %v1169_v32  ;;  %v3614_v6 = vmul.f32 0.5, %v3472_v36  ;;  %v895_v22 = vmul.f32 %v894_v34, %v3462_v0 }
 0x170   :  { %v3565_v17 = vadd.f32 %v667_v8, %v3410_v46  ;;  %4753 = vst [vmem:[#allocation21_spill] sm:$0xff] %v3580_v57  ;;  %v856_v8 = vadd.f32 1.1283791, %v855_v43  ;;  %v3595_v63 = vadd.f32 %v716_v11, %v3412_v48  ;;  %v1207_v29 = vmul.f32 2.1237322e-06, %v3578_v53 }
 0x171   :  { %v1247_v42 = vmul.f32 2.1237322e-06, %v3580_v57  ;;  %v1052_v11 = vadd.f32 0.05243302, %v1051_v61  ;;  %v1092_v24 = vadd.f32 0.05243302, %v1091_v10  ;;  %v1013_v62 = vmul.f32 %v1012_v40, %v3500_v58 }
 0x172   :  { %v3583_v50 = vmul.f32 0.70710677, %v3565_v17  ;;  %4757 = vst [vmem:[#allocation25_spill] sm:$0xff] %v3614_v6  ;;  %v1208_v49 = vadd.f32 0.00028619796, %v1207_v29  ;;  %v3622_v54 = vmul.f32 0.5, %v3475_v37  ;;  %v1131_v60 = vmul.f32 %v1130_v21, %v3525_v38 }
 0x173   :  { %v1248_v14 = vadd.f32 0.00028619796, %v1247_v42  ;;  %v935_v61 = vmul.f32 %v934_v26, %v3464_v18  ;;  %v974_v10 = vadd.f32 0.18741608, %v973_v23  ;;  %v1053_v36 = vmul.f32 %v1052_v11, %v3502_v59 }
 0x174   :  { %v1285_v52 = vmul.f32 %v3583_v50, %v3583_v50  ;;  %4758 = vst [vmem:[#allocation26_spill] sm:$0xff] %v3622_v54  ;;  %v1093_v29 = vmul.f32 %v1092_v24, %v3508_v3  ;;  %v1171_v42 = vmul.f32 %v1170_v39, %v3537_v47  ;;  %v825_v40 = vadd.f32 0.4994258, %v824_v30 }
 0x175   :  { %v3632_v37 = vmul.f32 0.5, %v3497_v55  ;;  %v1209_v21 = vmul.f32 %v1208_v49, %v3578_v53  ;;  %v1249_v26 = vmul.f32 %v1248_v14, %v3580_v57  ;;  %v896_v24 = vadd.f32 1.1283791, %v895_v22 }
 0x176   :  { %v3602_v1 = vmin.f32 %v1285_v52, 16.0  ;;  %v3611_v52 = vmul.f32 0.70710677, %v3595_v63  ;;  %v1014_v39 = vadd.f32 0.18741608, %v1013_v62  ;;  %v975_v54 = vmul.f32 %v974_v10, %v3480_v5 }
 0x177   :  { %v669_v43 = vpop.f32.mrf.mxu0  ;;  %4759 = vst [vmem:[#allocation27_spill] sm:$0xff] %v3632_v37  ;;  %v1132_v11 = vadd.f32 0.05243302, %v1131_v60  ;;  %v1054_v6 = vadd.f32 0.18741608, %v1053_v36  ;;  %v3653_v62 = vmul.f32 %v896_v24, %v3442_v7  ;;  %v3658_v36 = vmul.f32 0.5, %v3511_v16 }
 0x178   :  { %4755 = vst [vmem:[#allocation23_spill] sm:$0xff] %v3602_v1  ;;  %v1287_v25 = vmul.f32 2.1237322e-06, %v3602_v1  ;;  %v3617_v20 = vadd.f32 %v669_v43, %v3410_v46  ;;  %v1325_v34 = vmul.f32 %v3611_v52, %v3611_v52  ;;  %v718_v43 = vpop.f32.mrf.mxu1  ;;  %v1094_v49 = vadd.f32 0.18741608, %v1093_v29 }
 0x179   :  { %4756 = vst [vmem:[#allocation24_spill] sm:$0xff] %v3611_v52  ;;  %v3645_v55 = vadd.f32 %v718_v43, %v3412_v48  ;;  %v1172_v37 = vadd.f32 0.05243302, %v1171_v42  ;;  %v826_v52 = vmul.f32 %v825_v40, %v3430_v56  ;;  %v936_v13 = vadd.f32 1.1283791, %v935_v61 }
 0x17a   :  { %v1288_v32 = vadd.f32 0.00028619796, %v1287_v25  ;;  %v3637_v23 = vmul.f32 0.70710677, %v3617_v20  ;;  %v3640_v25 = vmul.f32 %v856_v8, %v3424_v12  ;;  %v3647_v14 = vmin.f32 %v1325_v34, 16.0  ;;  %4760 = vst [vmem:[#allocation28_spill] sm:$0xff] %v3658_v36 }
 0x17b   :  { %v1210_v12 = vadd.f32 0.0036580483, %v1209_v21  ;;  %v1250_v8 = vadd.f32 0.0036580483, %v1249_v26  ;;  %v1015_v60 = vmul.f32 %v1014_v39, %v3500_v58  ;;  %v1133_v10 = vmul.f32 %v1132_v11, %v3525_v38 }
 0x17c   :  { %v1289_v30 = vmul.f32 %v1288_v32, %v3602_v1  ;;  %v1365_v22 = vmul.f32 %v3637_v23, %v3637_v23  ;;  %v976_v32 = vadd.f32 1.1283791, %v975_v54  ;;  %v1055_v29 = vmul.f32 %v1054_v6, %v3502_v59 }
 0x17d   :  { %v3662_v61 = vmul.f32 0.70710677, %v3645_v55  ;;  %v1095_v34 = vmul.f32 %v1094_v49, %v3508_v3  ;;  %v1173_v7 = vmul.f32 %v1172_v37, %v3537_v47  ;;  %v1327_v43 = vmul.f32 2.1237322e-06, %v3647_v14 }
 0x17e   :  { %v1290_v56 = vadd.f32 0.0036580483, %v1289_v30  ;;  %v3667_v40 = vadd.f32 1.0, %v826_v52  ;;  %v3670_v21 = vmul.f32 0.5, %v3530_v41  ;;  %v1211_v16 = vmul.f32 %v1210_v12, %v3578_v53 }
 0x17f   :  { %v672_v42 = vpop.f32.mrf.mxu0  ;;  %v1251_v6 = vmul.f32 %v1250_v8, %v3580_v57  ;;  %v3674_v54 = vmin.f32 %v1365_v22, 16.0  ;;  %v1016_v26 = vadd.f32 1.1283791, %v1015_v60  ;;  %v1134_v24 = vadd.f32 0.18741608, %v1133_v10 }
 0x180   :  { %4761 = vst [vmem:[#allocation29_spill] sm:$0xff] %v3670_v21  ;;  %v3677_v39 = vadd.f32 %v672_v42, %v3410_v46  ;;  %2869 = vrcp.f32 %v3667_v40  ;;  %v1056_v37 = vadd.f32 1.1283791, %v1055_v29  ;;  %v3681_v52 = vmul.f32 0.5, %v3540_v2  ;;  %v721_v2 = vpop.f32.mrf.mxu1 }
 0x181   :  { %v1291_v41 = vmul.f32 %v1290_v56, %v3602_v1  ;;  %v1405_v11 = vmul.f32 %v3662_v61, %v3662_v61  ;;  %v3687_v30 = vmul.f32 %v936_v13, %v3445_v19  ;;  %v1096_v49 = vadd.f32 1.1283791, %v1095_v34 }
 0x182   :  { %4762 = vst [vmem:[#allocation30_spill] sm:$0xff] %v3681_v52  ;;  %v1174_v12 = vadd.f32 0.18741608, %v1173_v7  ;;  %v1328_v8 = vadd.f32 0.00028619796, %v1327_v43  ;;  %v3690_v22 = vmul.f32 %v976_v32, %v3456_v28  ;;  %v3694_v42 = vmul.f32 %v1016_v26, %v3469_v44 }
 0x183   :  { %v1212_v60 = vadd.f32 0.05243302, %v1211_v16  ;;  %v1252_v10 = vadd.f32 0.05243302, %v1251_v6  ;;  %v1367_v29 = vmul.f32 2.1237322e-06, %v3674_v54  ;;  %v1135_v56 = vmul.f32 %v1134_v24, %v3525_v38 }
 0x184   :  { %v3698_v52 = vmul.f32 0.5, %v3565_v17  ;;  %v3701_v19 = vmul.f32 0.70710677, %v3677_v39  ;;  %v3704_v13 = vmul.f32 %v1056_v37, %v3485_v4  ;;  %v1292_v28 = vadd.f32 0.05243302, %v1291_v41 }
 0x185   :  { %v3707_v32 = vmul.f32 0.5, %v3595_v63  ;;  %v3709_v34 = vmin.f32 %v1405_v11, 16.0  ;;  %v3714_v44 = vmul.f32 %v1096_v49, %v3488_v45  ;;  %v1329_v17 = vmul.f32 %v1328_v8, %v3647_v14 }
 0x186   :  { %4763 = vst [vmem:[#allocation31_spill] sm:$0xff] %v3698_v52  ;;  %v3711_v7 = vpop.eup %2869  ;;  %v3718_v43 = vadd.f32 %v721_v2, %v3412_v48  ;;  %v898_v16 = vmul.f32 3.8918573e-05, %v3462_v0  ;;  %v1175_v4 = vmul.f32 %v1174_v12, %v3537_v47  ;;  %v1213_v6 = vmul.f32 %v1212_v60, %v3578_v53 }
 0x187   :  { %4764 = vst [vmem:[#allocation32_spill] sm:$0xff] %v3707_v32  ;;  %v1253_v63 = vmul.f32 %v1252_v10, %v3580_v57  ;;  %v1368_v26 = vadd.f32 0.00028619796, %v1367_v29  ;;  %v1136_v24 = vadd.f32 1.1283791, %v1135_v56  ;;  %v1445_v37 = vmul.f32 %v3701_v19, %v3701_v19 }
 0x188   :  { %4765 = vst [vmem:[#allocation33_spill] sm:$0xff] %v3714_v44  ;;  %v829_v45 = vmul.f32 %v3711_v7, %v3667_v40  ;;  %v899_v41 = vadd.f32 0.001143296, %v898_v16  ;;  %v1293_v11 = vmul.f32 %v1292_v28, %v3602_v1  ;;  %v3730_v49 = vmul.f32 0.5, %v3617_v20 }
 0x189   :  { %v3733_v12 = vmul.f32 0.5, %v3645_v55  ;;  %v1407_v8 = vmul.f32 2.1237322e-06, %v3709_v34  ;;  %v1330_v60 = vadd.f32 0.0036580483, %v1329_v17  ;;  %v1369_v20 = vmul.f32 %v1368_v26, %v3674_v54 }
 0x18a   :  { %4766 = vst [vmem:[#allocation34_spill] sm:$0xff] %v3730_v49  ;;  %v3737_v10 = vmul.f32 0.70710677, %v3718_v43  ;;  %v900_v29 = vmul.f32 %v899_v41, %v3462_v0  ;;  %v858_v2 = vmul.f32 3.8918573e-05, %v3438_v15  ;;  %v3744_v32 = vmin.f32 %v1445_v37, 16.0 }
 0x18b   :  { %4767 = vst [vmem:[#allocation35_spill] sm:$0xff] %v3733_v12  ;;  %v3741_v56 = vadd.f32 1.1283791, %v1175_v4  ;;  %v1214_v16 = vadd.f32 0.18741608, %v1213_v6  ;;  %v830_v55 = vsub.f32 1.0, %v829_v45  ;;  %v3747_v17 = vmul.f32 %v1136_v24, %v3505_v9 }
 0x18c   :  { %v1254_v28 = vadd.f32 0.18741608, %v1253_v63  ;;  %v901_v12 = vadd.f32 0.014752088, %v900_v29  ;;  %v859_v49 = vadd.f32 0.001143296, %v858_v2  ;;  %v1331_v21 = vmul.f32 %v1330_v60, %v3647_v14 }
 0x18d   :  { %4768 = vst [vmem:[#allocation36_spill] sm:$0xff] %v3747_v17  ;;  %v1294_v52 = vadd.f32 0.18741608, %v1293_v11  ;;  %v1408_v36 = vadd.f32 0.00028619796, %v1407_v8  ;;  %v1485_v4 = vmul.f32 %v3737_v10, %v3737_v10  ;;  %v1215_v26 = vmul.f32 %v1214_v16, %v3578_v53 }
 0x18e   :  { %v938_v41 = vmul.f32 3.8918573e-05, %v3464_v18  ;;  %v902_v6 = vmul.f32 %v901_v12, %v3462_v0  ;;  %v860_v63 = vmul.f32 %v859_v49, %v3438_v15  ;;  %v1370_v37 = vadd.f32 0.0036580483, %v1369_v20 }
 0x18f   :  { %v978_v9 = vmul.f32 3.8918573e-05, %v3480_v5  ;;  %v1255_v24 = vmul.f32 %v1254_v28, %v3580_v57  ;;  %v1447_v11 = vmul.f32 2.1237322e-06, %v3744_v32  ;;  %v831_v8 = vmul.f32 %v3711_v7, %v830_v55 }
 0x190   :  { %v939_v45 = vadd.f32 0.001143296, %v938_v41  ;;  %v903_v60 = vadd.f32 0.112945676, %v902_v6  ;;  %v1409_v29 = vmul.f32 %v1408_v36, %v3709_v34  ;;  %v861_v2 = vadd.f32 0.014752088, %v860_v63 }
 0x191   :  { %v979_v17 = vadd.f32 0.001143296, %v978_v9  ;;  %v1295_v49 = vmul.f32 %v1294_v52, %v3602_v1  ;;  %v1332_v16 = vadd.f32 0.05243302, %v1331_v21  ;;  %v3763_v20 = vmin.f32 %v1485_v4, 16.0 }
 0x192   :  { %v940_v12 = vmul.f32 %v939_v45, %v3464_v18  ;;  %v904_v41 = vmul.f32 %v903_v60, %v3462_v0  ;;  %v1371_v28 = vmul.f32 %v1370_v37, %v3674_v54  ;;  %v862_v57 = vmul.f32 %v861_v2, %v3438_v15 }
 0x193   :  { %v980_v55 = vmul.f32 %v979_v17, %v3480_v5  ;;  %v1448_v6 = vadd.f32 0.00028619796, %v1447_v11  ;;  %v832_v36 = vadd.f32 %v3711_v7, %v831_v8  ;;  %vm834_vm0 = vweird.f32 %v3711_v7 }
 0x194   :  { %v941_v44 = vadd.f32 0.014752088, %v940_v12  ;;  %v905_v63 = vadd.f32 0.4994258, %v904_v41  ;;  %v839_v52 = vand.u32 2147483648, %v3667_v40  ;;  %vm833_vm1 = vweird.f32 %v3667_v40 }
 0x195   :  { %v863_v21 = vadd.f32 0.112945676, %v862_v57  ;;  %v981_v45 = vadd.f32 0.014752088, %v980_v55  ;;  %v1487_v9 = vmul.f32 2.1237322e-06, %v3763_v20  ;;  %vm3777_vm2 = vmor %vm833_vm1, %vm834_vm0 }
 0x196   :  { %v942_v4 = vmul.f32 %v941_v44, %v3464_v18  ;;  %v837_v37 = vand.u32 2147483647, %v3667_v40  ;;  %v906_v17 = vmul.f32 %v905_v63, %v3462_v0  ;;  %v1410_v11 = vadd.f32 0.0036580483, %v1409_v29 }
 0x197   :  { %v864_v60 = vmul.f32 %v863_v21, %v3438_v15  ;;  %v982_v57 = vmul.f32 %v981_v45, %v3480_v5  ;;  %v1449_v44 = vmul.f32 %v1448_v6, %v3744_v32  ;;  %v836_v12 = vsel %vm3777_vm2, %v3711_v7, %v832_v36 }
 0x198   :  { %v943_v2 = vadd.f32 0.112945676, %v942_v4  ;;  %v3787_v41 = vadd.f32 1.0, %v906_v17  ;;  %v1058_v0 = vmul.f32 3.8918573e-05, %v3502_v59  ;;  %v840_v40 = vor.u32 1.1754944e-38, %v839_v52 }
 0x199   :  { %v865_v29 = vadd.f32 0.4994258, %v864_v60  ;;  %v983_v63 = vadd.f32 0.112945676, %v982_v57  ;;  %v1372_v1 = vadd.f32 0.05243302, %v1371_v28  ;;  %v3796_v36 = vmul.f32 %v3741_v56, %v3521_v33 }
 0x19a   :  { %v944_v55 = vmul.f32 %v943_v2, %v3464_v18  ;;  %v1488_v21 = vadd.f32 0.00028619796, %v1487_v9  ;;  %vm838_vm3 = vcmp.eq.f32.partialorder %v837_v37, 8.507059e+37  ;;  %2871 = vrcp.f32 %v3787_v41 }
 0x19b   :  { %v841_v4 = vsel %vm838_vm3, %v840_v40, %v836_v12  ;;  %v866_v6 = vmul.f32 %v865_v29, %v3438_v15  ;;  %v984_v7 = vmul.f32 %v983_v63, %v3480_v5  ;;  %v1411_v52 = vmul.f32 %v1410_v11, %v3709_v34 }
 0x19c   :  { %v945_v45 = vadd.f32 0.4994258, %v944_v55  ;;  %v1450_v17 = vadd.f32 0.0036580483, %v1449_v44  ;;  %v1059_v8 = vadd.f32 0.001143296, %v1058_v0  ;;  %v1489_v57 = vmul.f32 %v1488_v21, %v3763_v20  ;;  %v674_v21 = vpop.f32.mrf.mxu0 }
 0x19d   :  { %v1216_v60 = vadd.f32 1.1283791, %v1215_v26  ;;  %v1256_v28 = vadd.f32 1.1283791, %v1255_v24  ;;  %v3799_v9 = vadd.f32 1.0, %v866_v6  ;;  %v3803_v15 = vmul.f32 0.5, %v3677_v39 }
 0x19e   :  { %v946_v37 = vmul.f32 %v945_v45, %v3464_v18  ;;  %v1296_v2 = vadd.f32 1.1283791, %v1295_v49  ;;  %v842_v12 = vmul.f32 %v841_v4, %v3608_v31  ;;  %v1333_v33 = vmul.f32 %v1332_v16, %v3647_v14 }
 0x19f   :  { %4771 = vst [vmem:[#allocation37_spill] sm:$0xff] %v3803_v15  ;;  %v1373_v56 = vmul.f32 %v1372_v1, %v3674_v54  ;;  %2873 = vrcp.f32 %v3799_v9  ;;  %v985_v26 = vadd.f32 0.4994258, %v984_v7  ;;  %v1412_v11 = vadd.f32 0.05243302, %v1411_v52 }
 0x1a0   :  { %v2872_v24 = vpop.eup %2871  ;;  %v1451_v44 = vmul.f32 %v1450_v17, %v3744_v32  ;;  %v3811_v18 = vadd.f32 1.0, %v946_v37  ;;  %v1060_v39 = vmul.f32 %v1059_v8, %v3502_v59  ;;  %v3815_v49 = vmul.f32 %v1216_v60, %v3543_v51 }
 0x1a1   :  { %v3818_v31 = vmul.f32 %v1256_v28, %v3559_v27  ;;  %v3821_v16 = vmul.f32 0.5, %v3718_v43  ;;  %v909_v1 = vmul.f32 %v2872_v24, %v3787_v41  ;;  %v3825_v0 = vmul.f32 %v1296_v2, %v3583_v50 }
 0x1a2   :  { %v1490_v40 = vadd.f32 0.0036580483, %v1489_v57  ;;  %v2611_v29 = vclamps-f32 %v842_v12, 1.0  ;;  %2875 = vrcp.f32 %v3811_v18  ;;  %v3828_v55 = vadd.f32 0.18741608, %v1333_v33 }
 0x1a3   :  { %4772 = vst [vmem:[#allocation38_spill] sm:$0xff] %v3821_v16  ;;  %v3830_v63 = vadd.f32 0.18741608, %v1373_v56  ;;  %v910_v51 = vsub.f32 1.0, %v909_v1  ;;  %v986_v27 = vmul.f32 %v985_v26, %v3480_v5  ;;  %v3834_v43 = vmul.f32 %v1412_v11, %v3709_v34  ;;  %v723_v26 = vpop.f32.mrf.mxu1 }
 0x1a4   :  { %v3836_v4 = vadd.f32 0.05243302, %v1451_v44  ;;  %v919_v50 = vand.u32 2147483648, %v3787_v41  ;;  %v1061_v6 = vadd.f32 0.014752088, %v1060_v39  ;;  %vm914_vm4 = vweird.f32 %v2872_v24 }
 0x1a5   :  { %v2874_v45 = vpop.eup %2873  ;;  %v911_v7 = vmul.f32 %v2872_v24, %v910_v51  ;;  %v917_v52 = vand.u32 2147483647, %v3787_v41  ;;  %v3840_v17 = vadd.f32 1.0, %v986_v27  ;;  %v1491_v8 = vmul.f32 %v1490_v40, %v3763_v20 }
 0x1a6   :  { %v2085_v60 = vadd.f32 1.0, %v2611_v29  ;;  %v869_v5 = vmul.f32 %v2874_v45, %v3799_v9  ;;  %v3845_v28 = vadd.f32 %v674_v21, %v3410_v46  ;;  %vm913_vm5 = vweird.f32 %v3787_v41 }
 0x1a7   :  { %v912_v37 = vadd.f32 %v2872_v24, %v911_v7  ;;  %2877 = vrcp.f32 %v3840_v17  ;;  %v1018_v2 = vmul.f32 3.8918573e-05, %v3500_v58  ;;  %vm915_vm6 = vmor %vm913_vm5, %vm914_vm4  ;;  %v920_v12 = vor.u32 1.1754944e-38, %v919_v50 }
 0x1a8   :  { %v2876_v57 = vpop.eup %2875  ;;  %v870_v33 = vsub.f32 1.0, %v869_v5  ;;  %v879_v56 = vand.u32 2147483648, %v3799_v9  ;;  %v1062_v11 = vmul.f32 %v1061_v6, %v3502_v59  ;;  %vm918_vm7 = vcmp.eq.f32.partialorder %v917_v52, 8.507059e+37 }
 0x1a9   :  { %v916_v44 = vsel %vm915_vm6, %v2872_v24, %v912_v37  ;;  %v877_v39 = vand.u32 2147483647, %v3799_v9  ;;  %v949_v1 = vmul.f32 %v2876_v57, %v3811_v18  ;;  %vm874_vm8 = vweird.f32 %v2874_v45 }
 0x1aa   :  { %v921_v41 = vsel %vm918_vm7, %v920_v12, %v916_v44  ;;  %v871_v40 = vmul.f32 %v2874_v45, %v870_v33  ;;  %v3855_v29 = vmul.f32 0.70710677, %v3845_v28  ;;  %v3859_v27 = vadd.f32 %v723_v26, %v3412_v48 }
 0x1ab   :  { %v922_v51 = vmul.f32 %v921_v41, %v3653_v62  ;;  %v950_v21 = vsub.f32 1.0, %v949_v1  ;;  %v1019_v50 = vadd.f32 0.001143296, %v1018_v2  ;;  %vm873_vm9 = vweird.f32 %v3799_v9 }
 0x1ac   :  { %v872_v6 = vadd.f32 %v2874_v45, %v871_v40  ;;  %v880_v24 = vor.u32 1.1754944e-38, %v879_v56  ;;  %v959_v7 = vand.u32 2147483648, %v3811_v18  ;;  %vm875_vm10 = vmor %vm873_vm9, %vm874_vm8  ;;  %vm954_vm11 = vweird.f32 %v2876_v57 }
 0x1ad   :  { %v3863_v52 = vpop.eup %2877  ;;  %v2613_v5 = vclamps-f32 %v922_v51, 1.0  ;;  %v951_v37 = vmul.f32 %v2876_v57, %v950_v21  ;;  %v957_v12 = vand.u32 2147483647, %v3811_v18  ;;  %vm878_vm12 = vcmp.eq.f32.partialorder %v877_v39, 8.507059e+37  ;;  %v677_v21 = vpop.f32.mrf.mxu0 }
 0x1ae   :  { %v876_v62 = vsel %vm875_vm10, %v2874_v45, %v872_v6  ;;  %vm953_vm13 = vweird.f32 %v3811_v18  ;;  %v1525_v2 = vmul.f32 %v3855_v29, %v3855_v29  ;;  %v3870_v26 = vmul.f32 0.70710677, %v3859_v27  ;;  %v4773_v18 = vld [vmem:[#allocation18_spill] sm:$0xff] }
 0x1af   :  { %v2087_v33 = vadd.f32 1.0, %v2613_v5  ;;  %v881_v9 = vsel %vm878_vm12, %v880_v24, %v876_v62  ;;  %v952_v56 = vadd.f32 %v2876_v57, %v951_v37  ;;  %v1492_v44 = vadd.f32 0.05243302, %v1491_v8  ;;  %vm955_vm14 = vmor %vm953_vm13, %vm954_vm11  ;;  %v726_v5 = vpop.f32.mrf.mxu1 }
 0x1b0   :  { %v882_v1 = vmul.f32 %v881_v9, %v3640_v25  ;;  %v960_v41 = vor.u32 1.1754944e-38, %v959_v7  ;;  %v989_v45 = vmul.f32 %v3863_v52, %v3840_v17  ;;  %v2117_v39 = vmul.f32 %v2085_v60, %v3533_v35 }
 0x1b1   :  { %v2119_v40 = vmul.f32 %v2087_v33, %v4773_v18  ;;  %v956_v51 = vsel %vm955_vm14, %v2876_v57, %v952_v56  ;;  %vm958_vm15 = vcmp.eq.f32.partialorder %v957_v12, 8.507059e+37  ;;  %v1063_v37 = vadd.f32 0.112945676, %v1062_v11 }
 0x1b2   :  { %v2612_v6 = vclamps-f32 %v882_v1, 1.0  ;;  %v961_v24 = vsel %vm958_vm15, %v960_v41, %v956_v51  ;;  %v1020_v8 = vmul.f32 %v1019_v50, %v3500_v58  ;;  %v3879_v7 = vmin.f32 %v1525_v2, 16.0 }
 0x1b3   :  { %v2165_v62 = vpack.c.bf16 %v2119_v40, %v2117_v39  ;;  %v962_v25 = vmul.f32 %v961_v24, %v3687_v30  ;;  %v1565_v9 = vmul.f32 %v3870_v26, %v3870_v26  ;;  %v1335_v35 = vmul.f32 %v3828_v55, %v3647_v14 }
 0x1b4   :  { %v1375_v60 = vmul.f32 %v3830_v63, %v3674_v54  ;;  %v3888_v57 = vadd.f32 %v677_v21, %v3410_v46  ;;  %v990_v11 = vsub.f32 1.0, %v989_v45  ;;  %v2086_v12 = vadd.f32 1.0, %v2612_v6  ;;  %v4774_v21 = vld [vmem:[#allocation17_spill] sm:$0xff] }
 0x1b5   :  { %2317 = vmatmul.bf16.vlgmr.msra.gmra.mxu2 %v2165_v62  ;;  %v2614_v50 = vclamps-f32 %v962_v25, 1.0  ;;  %v3891_v30 = vadd.f32 %v726_v5, %v3412_v48  ;;  %v1098_v2 = vmul.f32 3.8918573e-05, %v3508_v3  ;;  %v1414_v33 = vadd.f32 0.18741608, %v3834_v43 }
 0x1b6   :  { %v1453_v55 = vmul.f32 %v3836_v4, %v3744_v32  ;;  %v1493_v56 = vmul.f32 %v1492_v44, %v3763_v20  ;;  %v1064_v63 = vmul.f32 %v1063_v37, %v3502_v59  ;;  %v1527_v41 = vmul.f32 2.1237322e-06, %v3879_v7  ;;  %v4775_v4 = vld [vmem:[#allocation19_spill] sm:$0xff] }
 0x1b7   :  { %v2088_v1 = vadd.f32 1.0, %v2614_v50  ;;  %v3900_v45 = vmin.f32 %v1565_v9, 16.0  ;;  %v1021_v39 = vadd.f32 0.014752088, %v1020_v8  ;;  %v1336_v18 = vadd.f32 1.1283791, %v1335_v35 }
 0x1b8   :  { %v1376_v40 = vadd.f32 1.1283791, %v1375_v60  ;;  %v3903_v51 = vmul.f32 0.70710677, %v3888_v57  ;;  %v991_v43 = vmul.f32 %v3863_v52, %v990_v11  ;;  %v2118_v6 = vmul.f32 %v2086_v12, %v4774_v21 }
 0x1b9   :  { %v2120_v24 = vmul.f32 %v2088_v1, %v4775_v4  ;;  %v3909_v44 = vmul.f32 0.70710677, %v3891_v30  ;;  %v1099_v5 = vadd.f32 0.001143296, %v1098_v2  ;;  %v1415_v37 = vmul.f32 %v1414_v33, %v3709_v34 }
 0x1ba   :  { %v1454_v62 = vadd.f32 0.18741608, %v1453_v55  ;;  %v1494_v25 = vadd.f32 0.18741608, %v1493_v56  ;;  %v1065_v8 = vadd.f32 0.4994258, %v1064_v63  ;;  %v1022_v50 = vmul.f32 %v1021_v39, %v3500_v58 }
 0x1bb   :  { %v2166_v9 = vpack.c.bf16 %v2120_v24, %v2118_v6  ;;  %v1528_v35 = vadd.f32 0.00028619796, %v1527_v41  ;;  %v1567_v60 = vmul.f32 2.1237322e-06, %v3900_v45  ;;  %v1605_v11 = vmul.f32 %v3903_v51, %v3903_v51 }
 0x1bc   :  { %v992_v12 = vadd.f32 %v3863_v52, %v991_v43  ;;  %vm994_vm0 = vweird.f32 %v3863_v52  ;;  %v1066_v2 = vmul.f32 %v1065_v8, %v3502_v59  ;;  %v1645_v33 = vmul.f32 %v3909_v44, %v3909_v44 }
 0x1bd   :  { %2366 = vmatmul.bf16.vlgmr.msra.gmra.mxu3 %v2166_v9  ;;  %v999_v55 = vand.u32 2147483648, %v3840_v17  ;;  %v1023_v56 = vadd.f32 0.112945676, %v1022_v50  ;;  %v1100_v63 = vmul.f32 %v1099_v5, %v3508_v3  ;;  %vm993_vm1 = vweird.f32 %v3840_v17 }
 0x1be   :  { %v997_v1 = vand.u32 2147483647, %v3840_v17  ;;  %v3925_v41 = vadd.f32 1.0, %v1066_v2  ;;  %v1138_v39 = vmul.f32 3.8918573e-05, %v3525_v38  ;;  %v1455_v43 = vmul.f32 %v1454_v62, %v3744_v32  ;;  %vm3930_vm2 = vmor %vm993_vm1, %vm994_vm0 }
 0x1bf   :  { %v1495_v59 = vmul.f32 %v1494_v25, %v3763_v20  ;;  %v1024_v6 = vmul.f32 %v1023_v56, %v3500_v58  ;;  %v1101_v4 = vadd.f32 0.014752088, %v1100_v63  ;;  %v1529_v24 = vmul.f32 %v1528_v35, %v3879_v7 }
 0x1c0   :  { %v1568_v5 = vadd.f32 0.00028619796, %v1567_v60  ;;  %v996_v17 = vsel %vm3930_vm2, %v3863_v52, %v992_v12  ;;  %2879 = vrcp.f32 %v3925_v41  ;;  %v3940_v8 = vmin.f32 %v1605_v11, 16.0 }
 0x1c1   :  { %v3942_v62 = vmin.f32 %v1645_v33, 16.0  ;;  %v1000_v25 = vor.u32 1.1754944e-38, %v999_v55  ;;  %v1025_v9 = vadd.f32 0.4994258, %v1024_v6  ;;  %v1416_v50 = vadd.f32 1.1283791, %v1415_v37 }
 0x1c2   :  { %vm998_vm3 = vcmp.eq.f32.partialorder %v997_v1, 8.507059e+37  ;;  %v1102_v2 = vmul.f32 %v1101_v4, %v3508_v3  ;;  %v1139_v56 = vadd.f32 0.001143296, %v1138_v39  ;;  %v1456_v63 = vadd.f32 1.1283791, %v1455_v43  ;;  %v4779_v33 = vld [vmem:[#allocation24_spill] sm:$0xff] }
 0x1c3   :  { %4778 = vst [vmem:[#allocation18_spill] sm:$0xff] %v3942_v62  ;;  %v1496_v35 = vadd.f32 1.1283791, %v1495_v59  ;;  %v1001_v60 = vsel %vm998_vm3, %v1000_v25, %v996_v17  ;;  %v1026_v16 = vmul.f32 %v1025_v9, %v3500_v58  ;;  %v1530_v21 = vadd.f32 0.0036580483, %v1529_v24 }
 0x1c4   :  { %v1569_v52 = vmul.f32 %v1568_v5, %v3900_v45  ;;  %v1103_v12 = vadd.f32 0.112945676, %v1102_v2  ;;  %v1140_v11 = vmul.f32 %v1139_v56, %v3525_v38  ;;  %v3949_v15 = vmul.f32 %v1336_v18, %v4779_v33  ;;  %v679_v2 = vpop.f32.mrf.mxu0 }
 0x1c5   :  { %v1607_v37 = vmul.f32 2.1237322e-06, %v3940_v8  ;;  %v1647_v55 = vmul.f32 2.1237322e-06, %v3942_v62  ;;  %v3953_v1 = vadd.f32 1.0, %v1026_v16  ;;  %v3956_v43 = vmul.f32 %v1376_v40, %v3637_v23 }
 0x1c6   :  { %v2880_v39 = vpop.eup %2879  ;;  %v1002_v58 = vmul.f32 %v1001_v60, %v3690_v22  ;;  %v1104_v59 = vmul.f32 %v1103_v12, %v3508_v3  ;;  %v1141_v6 = vadd.f32 0.014752088, %v1140_v11  ;;  %v3961_v4 = vmul.f32 %v1416_v50, %v3662_v61 }
 0x1c7   :  { %v3964_v18 = vmul.f32 %v1456_v63, %v3701_v19  ;;  %v1069_v24 = vmul.f32 %v2880_v39, %v3925_v41  ;;  %2881 = vrcp.f32 %v3953_v1  ;;  %v3969_v16 = vmul.f32 %v1496_v35, %v3737_v10 }
 0x1c8   :  { %v1531_v23 = vmul.f32 %v1530_v21, %v3879_v7  ;;  %v1570_v40 = vadd.f32 0.0036580483, %v1569_v52  ;;  %v1105_v22 = vadd.f32 0.4994258, %v1104_v59  ;;  %v1608_v5 = vadd.f32 0.00028619796, %v1607_v37 }
 0x1c9   :  { %4780 = vst [vmem:[#allocation17_spill] sm:$0xff] %v3964_v18  ;;  %v1648_v17 = vadd.f32 0.00028619796, %v1647_v55  ;;  %v1070_v25 = vsub.f32 1.0, %v1069_v24  ;;  %v1142_v61 = vmul.f32 %v1141_v6, %v3525_v38  ;;  %v2615_v9 = vclamps-f32 %v1002_v58, 1.0 }
 0x1ca   :  { %4781 = vst [vmem:[#allocation19_spill] sm:$0xff] %v3969_v16  ;;  %v1079_v19 = vand.u32 2147483648, %v3925_v41  ;;  %v1106_v50 = vmul.f32 %v1105_v22, %v3508_v3  ;;  %v1218_v56 = vmul.f32 3.8918573e-05, %v3578_v53  ;;  %vm1074_vm4 = vweird.f32 %v2880_v39 }
 0x1cb   :  { %v1071_v63 = vmul.f32 %v2880_v39, %v1070_v25  ;;  %v1077_v10 = vand.u32 2147483647, %v3925_v41  ;;  %v1143_v35 = vadd.f32 0.112945676, %v1142_v61  ;;  %v3978_v60 = vmul.f32 0.5, %v3845_v28 }
 0x1cc   :  { %v1532_v21 = vadd.f32 0.05243302, %v1531_v23  ;;  %v3980_v52 = vadd.f32 1.0, %v1106_v50  ;;  %v1178_v12 = vmul.f32 3.8918573e-05, %v3537_v47  ;;  %v1609_v33 = vmul.f32 %v1608_v5, %v3940_v8  ;;  %v728_v50 = vpop.f32.mrf.mxu1 }
 0x1cd   :  { %4782 = vst [vmem:[#allocation24_spill] sm:$0xff] %v3978_v60  ;;  %v2882_v11 = vpop.eup %2881  ;;  %v1072_v3 = vadd.f32 %v2880_v39, %v1071_v63  ;;  %vm1073_vm5 = vweird.f32 %v3925_v41  ;;  %v1144_v37 = vmul.f32 %v1143_v35, %v3525_v38  ;;  %v1080_v55 = vor.u32 1.1754944e-38, %v1079_v19 }
 0x1ce   :  { %vm1075_vm6 = vmor %vm1073_vm5, %vm1074_vm4  ;;  %v1029_v58 = vmul.f32 %v2882_v11, %v3953_v1  ;;  %2883 = vrcp.f32 %v3980_v52  ;;  %v1219_v28 = vadd.f32 0.001143296, %v1218_v56  ;;  %v1649_v59 = vmul.f32 %v1648_v17, %v3942_v62 }
 0x1cf   :  { %v1076_v6 = vsel %vm1075_vm6, %v2880_v39, %v1072_v3  ;;  %vm1078_vm7 = vcmp.eq.f32.partialorder %v1077_v10, 8.507059e+37  ;;  %v2089_v24 = vadd.f32 1.0, %v2615_v9  ;;  %v1571_v23 = vmul.f32 %v1570_v40, %v3900_v45  ;;  %v4783_v10 = vld [vmem:[#allocation20_spill] sm:$0xff] }
 0x1d0   :  { %v1081_v22 = vsel %vm1078_vm7, %v1080_v55, %v1076_v6  ;;  %v1030_v5 = vsub.f32 1.0, %v1029_v58  ;;  %v1179_v25 = vadd.f32 0.001143296, %v1178_v12  ;;  %v1037_v61 = vand.u32 2147483647, %v3953_v1 }
 0x1d1   :  { %v1082_v41 = vmul.f32 %v1081_v22, %v3704_v13  ;;  %v1039_v19 = vand.u32 2147483648, %v3953_v1  ;;  %v1145_v63 = vadd.f32 0.4994258, %v1144_v37  ;;  %vm1034_vm8 = vweird.f32 %v2882_v11  ;;  %v682_v37 = vpop.f32.mrf.mxu0 }
 0x1d2   :  { %v1031_v35 = vmul.f32 %v2882_v11, %v1030_v5  ;;  %v3994_v17 = vadd.f32 %v679_v2, %v3410_v46  ;;  %v1220_v39 = vmul.f32 %v1219_v28, %v3578_v53  ;;  %v1610_v9 = vadd.f32 0.0036580483, %v1609_v33 }
 0x1d3   :  { %v1650_v40 = vadd.f32 0.0036580483, %v1649_v59  ;;  %v2617_v56 = vclamps-f32 %v1082_v41, 1.0  ;;  %v2121_v12 = vmul.f32 %v2089_v24, %v4783_v10  ;;  %vm1033_vm9 = vweird.f32 %v3953_v1  ;;  %v4784_v1 = vld [vmem:[#allocation25_spill] sm:$0xff] }
 0x1d4   :  { %v2884_v3 = vpop.eup %2883  ;;  %v1032_v13 = vadd.f32 %v2882_v11, %v1031_v35  ;;  %v4000_v55 = vadd.f32 %v728_v50, %v3412_v48  ;;  %v1180_v58 = vmul.f32 %v1179_v25, %v3537_v47  ;;  %vm1035_vm10 = vmor %vm1033_vm9, %vm1034_vm8  ;;  %v1040_v2 = vor.u32 1.1754944e-38, %v1039_v19 }
 0x1d5   :  { %v2091_v6 = vadd.f32 1.0, %v2617_v56  ;;  %v1109_v28 = vmul.f32 %v2884_v3, %v3980_v52  ;;  %v1146_v33 = vmul.f32 %v1145_v63, %v3525_v38  ;;  %vm1038_vm11 = vcmp.eq.f32.partialorder %v1037_v61, 8.507059e+37 }
 0x1d6   :  { %v1036_v59 = vsel %vm1035_vm10, %v2882_v11, %v1032_v13  ;;  %v4006_v24 = vmul.f32 0.70710677, %v3994_v17  ;;  %v1221_v22 = vadd.f32 0.014752088, %v1220_v39  ;;  %v4010_v35 = vadd.f32 %v682_v37, %v3410_v46 }
 0x1d7   :  { %v2123_v5 = vmul.f32 %v2091_v6, %v4784_v1  ;;  %v1041_v41 = vsel %vm1038_vm11, %v1040_v2, %v1036_v59  ;;  %v1110_v50 = vsub.f32 1.0, %v1109_v28  ;;  %vm1114_vm12 = vweird.f32 %v2884_v3 }
 0x1d8   :  { %v1117_v25 = vand.u32 2147483647, %v3980_v52  ;;  %v1119_v19 = vand.u32 2147483648, %v3980_v52  ;;  %v4015_v38 = vmul.f32 0.70710677, %v4000_v55  ;;  %v1042_v61 = vmul.f32 %v1041_v41, %v3694_v42 }
 0x1d9   :  { %v2167_v11 = vpack.c.bf16 %v2123_v5, %v2121_v12  ;;  %v1111_v63 = vmul.f32 %v2884_v3, %v1110_v50  ;;  %v4018_v39 = vadd.f32 1.0, %v1146_v33  ;;  %v1533_v56 = vmul.f32 %v1532_v21, %v3879_v7  ;;  %v731_v33 = vpop.f32.mrf.mxu1  ;;  %v4787_v50 = vld [vmem:[#allocation33_spill] sm:$0xff] }
 0x1da   :  { %v1572_v10 = vadd.f32 0.05243302, %v1571_v23  ;;  %v1611_v13 = vmul.f32 %v1610_v9, %v3940_v8  ;;  %vm1113_vm13 = vweird.f32 %v3980_v52  ;;  %v1685_v6 = vmul.f32 %v4006_v24, %v4006_v24 }
 0x1db   :  { %2322 = vmatmul.bf16.gmra.mxu2 %v2167_v11  ;;  %v1112_v37 = vadd.f32 %v2884_v3, %v1111_v63  ;;  %v4026_v2 = vmul.f32 0.70710677, %v4010_v35  ;;  %2885 = vrcp.f32 %v4018_v39  ;;  %v1651_v42 = vmul.f32 %v1650_v40, %v3942_v62  ;;  %vm1115_vm14 = vmor %vm1113_vm13, %vm1114_vm12 }
 0x1dc   :  { %v1120_v21 = vor.u32 1.1754944e-38, %v1119_v19  ;;  %v1222_v23 = vmul.f32 %v1221_v22, %v3578_v53  ;;  %v1181_v9 = vadd.f32 0.014752088, %v1180_v58  ;;  %v2616_v12 = vclamps-f32 %v1042_v61, 1.0 }
 0x1dd   :  { %v1116_v52 = vsel %vm1115_vm14, %v2884_v3, %v1112_v37  ;;  %vm1118_vm15 = vcmp.eq.f32.partialorder %v1117_v25, 8.507059e+37  ;;  %v1725_v28 = vmul.f32 %v4015_v38, %v4015_v38  ;;  %v4035_v59 = vmul.f32 0.5, %v3859_v27 }
 0x1de   :  { %v1573_v1 = vmul.f32 %v1572_v10, %v3900_v45  ;;  %v1612_v5 = vadd.f32 0.05243302, %v1611_v13  ;;  %v1121_v40 = vsel %vm1118_vm15, %v1120_v21, %v1116_v52  ;;  %v4039_v41 = vmul.f32 0.5, %v3888_v57 }
 0x1df   :  { %4785 = vst [vmem:[#allocation20_spill] sm:$0xff] %v4035_v59  ;;  %v1122_v22 = vmul.f32 %v1121_v40, %v4787_v50  ;;  %v4042_v58 = vmin.f32 %v1685_v6, 16.0  ;;  %v1765_v3 = vmul.f32 %v4026_v2, %v4026_v2  ;;  %v1534_v25 = vadd.f32 0.18741608, %v1533_v56  ;;  %v4788_v56 = vld [vmem:[#allocation21_spill] sm:$0xff] }
 0x1e0   :  { %4786 = vst [vmem:[#allocation25_spill] sm:$0xff] %v4039_v41  ;;  %v1652_v19 = vadd.f32 0.05243302, %v1651_v42  ;;  %v4047_v11 = vadd.f32 %v731_v33, %v3412_v48  ;;  %v1223_v27 = vadd.f32 0.112945676, %v1222_v23  ;;  %v2090_v10 = vadd.f32 1.0, %v2616_v12 }
 0x1e1   :  { %v4049_v61 = vpop.eup %2885  ;;  %v2618_v63 = vclamps-f32 %v1122_v22, 1.0  ;;  %v4051_v13 = vmin.f32 %v1725_v28, 16.0  ;;  %v1182_v57 = vmul.f32 %v1181_v9, %v3537_v47  ;;  %v1574_v37 = vadd.f32 0.18741608, %v1573_v1  ;;  %v4790_v22 = vld [vmem:[#allocation26_spill] sm:$0xff] }
 0x1e2   :  { %v1613_v6 = vmul.f32 %v1612_v5, %v3940_v8  ;;  %v1149_v21 = vmul.f32 %v4049_v61, %v4018_v39  ;;  %v1258_v42 = vmul.f32 3.8918573e-05, %v4788_v56  ;;  %v1687_v33 = vmul.f32 2.1237322e-06, %v4042_v58  ;;  %v4789_v5 = vld [vmem:[#allocation22_spill] sm:$0xff] }
 0x1e3   :  { %v2092_v52 = vadd.f32 1.0, %v2618_v63  ;;  %v4059_v23 = vmin.f32 %v1765_v3, 16.0  ;;  %v1224_v40 = vmul.f32 %v1223_v27, %v3578_v53  ;;  %v1653_v12 = vmul.f32 %v1652_v19, %v3942_v62 }
 0x1e4   :  { %v4064_v28 = vmul.f32 0.70710677, %v4047_v11  ;;  %v1150_v9 = vsub.f32 1.0, %v1149_v21  ;;  %v1183_v1 = vadd.f32 0.112945676, %v1182_v57  ;;  %v2122_v50 = vmul.f32 %v2090_v10, %v4789_v5 }
 0x1e5   :  { %v2124_v41 = vmul.f32 %v2092_v52, %v4790_v22  ;;  %v1727_v59 = vmul.f32 2.1237322e-06, %v4051_v13  ;;  %v1225_v63 = vadd.f32 0.4994258, %v1224_v40  ;;  %v1535_v16 = vmul.f32 %v1534_v25, %v3879_v7 }
 0x1e6   :  { %v4071_v3 = vmul.f32 0.5, %v3891_v30  ;;  %v1151_v27 = vmul.f32 %v4049_v61, %v1150_v9  ;;  %v1184_v19 = vmul.f32 %v1183_v1, %v3537_v47  ;;  %v1688_v18 = vadd.f32 0.00028619796, %v1687_v33 }
 0x1e7   :  { %v2168_v60 = vpack.c.bf16 %v2124_v41, %v2122_v50  ;;  %v1767_v57 = vmul.f32 2.1237322e-06, %v4059_v23  ;;  %v1226_v10 = vmul.f32 %v1225_v63, %v3578_v53  ;;  %v1614_v21 = vadd.f32 0.18741608, %v1613_v6  ;;  %v4792_v53 = vld [vmem:[#allocation23_spill] sm:$0xff] }
 0x1e8   :  { %4791 = vst [vmem:[#allocation33_spill] sm:$0xff] %v4071_v3  ;;  %v1654_v52 = vadd.f32 0.18741608, %v1653_v12  ;;  %v1805_v40 = vmul.f32 %v4064_v28, %v4064_v28  ;;  %v1185_v5 = vadd.f32 0.4994258, %v1184_v19  ;;  %v1575_v25 = vmul.f32 %v1574_v37, %v3900_v45 }
 0x1e9   :  { %2371 = vmatmul.bf16.gmra.mxu3 %v2168_v60  ;;  %v1728_v30 = vadd.f32 0.00028619796, %v1727_v59  ;;  %v4080_v22 = vadd.f32 1.0, %v1226_v10  ;;  %v1259_v9 = vadd.f32 0.001143296, %v1258_v42  ;;  %v1152_v41 = vadd.f32 %v4049_v61, %v1151_v27 }
 0x1ea   :  { %vm1154_vm0 = vweird.f32 %v4049_v61  ;;  %v1186_v33 = vmul.f32 %v1185_v5, %v3537_v47  ;;  %v1298_v6 = vmul.f32 3.8918573e-05, %v4792_v53  ;;  %v1689_v12 = vmul.f32 %v1688_v18, %v4042_v58 }
 0x1eb   :  { %v1768_v1 = vadd.f32 0.00028619796, %v1767_v57  ;;  %v1159_v50 = vand.u32 2147483648, %v4018_v39  ;;  %2887 = vrcp.f32 %v4080_v22  ;;  %v1536_v60 = vadd.f32 1.1283791, %v1535_v16 }
 0x1ec   :  { %v4089_v59 = vmin.f32 %v1805_v40, 16.0  ;;  %vm1153_vm1 = vweird.f32 %v4018_v39  ;;  %v1157_v37 = vand.u32 2147483647, %v4018_v39  ;;  %v1576_v42 = vadd.f32 1.1283791, %v1575_v25 }
 0x1ed   :  { %vm4093_vm2 = vmor %vm1153_vm1, %vm1154_vm0  ;;  %v4097_v47 = vadd.f32 1.0, %v1186_v33  ;;  %v1260_v18 = vmul.f32 %v1259_v9, %v4788_v56  ;;  %v1299_v27 = vadd.f32 0.001143296, %v1298_v6  ;;  %v1615_v19 = vmul.f32 %v1614_v21, %v3940_v8 }
 0x1ee   :  { %v1655_v16 = vmul.f32 %v1654_v52, %v3942_v62  ;;  %v1729_v57 = vmul.f32 %v1728_v30, %v4051_v13  ;;  %v1156_v39 = vsel %vm4093_vm2, %v4049_v61, %v1152_v41  ;;  %v1690_v10 = vadd.f32 0.0036580483, %v1689_v12 }
 0x1ef   :  { %v1769_v40 = vmul.f32 %v1768_v1, %v4059_v23  ;;  %v1160_v5 = vor.u32 1.1754944e-38, %v1159_v50  ;;  %2889 = vrcp.f32 %v4097_v47  ;;  %v1807_v25 = vmul.f32 2.1237322e-06, %v4089_v59 }
 0x1f0   :  { %vm1158_vm3 = vcmp.eq.f32.partialorder %v1157_v37, 8.507059e+37  ;;  %v1261_v9 = vadd.f32 0.014752088, %v1260_v18  ;;  %v1300_v21 = vmul.f32 %v1299_v27, %v4792_v53  ;;  %v4111_v52 = vmul.f32 %v1536_v60, %v3855_v29  ;;  %v4797_v60 = vld [vmem:[#allocation36_spill] sm:$0xff] }
 0x1f1   :  { %v2888_v33 = vpop.eup %2887  ;;  %v4114_v30 = vmul.f32 %v1576_v42, %v3870_v26  ;;  %v1161_v61 = vsel %vm1158_vm3, %v1160_v5, %v1156_v39  ;;  %v1378_v41 = vmul.f32 3.8918573e-05, %v3674_v54  ;;  %v1616_v6 = vadd.f32 1.1283791, %v1615_v19 }
 0x1f2   :  { %4795 = vst [vmem:[#allocation21_spill] sm:$0xff] %v4111_v52  ;;  %v1656_v12 = vadd.f32 1.1283791, %v1655_v16  ;;  %v1730_v1 = vadd.f32 0.0036580483, %v1729_v57  ;;  %v1229_v50 = vmul.f32 %v2888_v33, %v4080_v22  ;;  %v1691_v37 = vmul.f32 %v1690_v10, %v4042_v58 }
 0x1f3   :  { %4796 = vst [vmem:[#allocation22_spill] sm:$0xff] %v4114_v30  ;;  %v1262_v63 = vmul.f32 %v1261_v9, %v4788_v56  ;;  %v1301_v18 = vadd.f32 0.014752088, %v1300_v21  ;;  %v1379_v27 = vadd.f32 0.001143296, %v1378_v41  ;;  %v1162_v62 = vmul.f32 %v1161_v61, %v4797_v60 }
 0x1f4   :  { %v1770_v3 = vadd.f32 0.0036580483, %v1769_v40  ;;  %v1808_v29 = vadd.f32 0.00028619796, %v1807_v25  ;;  %v1230_v26 = vsub.f32 1.0, %v1229_v50  ;;  %v1239_v39 = vand.u32 2147483648, %v4080_v22 }
 0x1f5   :  { %v4121_v42 = vpop.eup %2889  ;;  %v1263_v19 = vadd.f32 0.112945676, %v1262_v63  ;;  %v1302_v16 = vmul.f32 %v1301_v18, %v4792_v53  ;;  %v1380_v57 = vmul.f32 %v1379_v27, %v3674_v54  ;;  %vm1234_vm4 = vweird.f32 %v2888_v33 }
 0x1f6   :  { %v1231_v5 = vmul.f32 %v2888_v33, %v1230_v26  ;;  %v1237_v10 = vand.u32 2147483647, %v4080_v22  ;;  %v1189_v40 = vmul.f32 %v4121_v42, %v4097_v47  ;;  %v1692_v25 = vadd.f32 0.05243302, %v1691_v37 }
 0x1f7   :  { %v1731_v9 = vmul.f32 %v1730_v1, %v4051_v13  ;;  %v1264_v21 = vmul.f32 %v1263_v19, %v4788_v56  ;;  %v1303_v61 = vadd.f32 0.112945676, %v1302_v16  ;;  %vm1233_vm5 = vweird.f32 %v4080_v22 }
 0x1f8   :  { %v1232_v41 = vadd.f32 %v2888_v33, %v1231_v5  ;;  %v1190_v50 = vsub.f32 1.0, %v1189_v40  ;;  %v1381_v63 = vadd.f32 0.014752088, %v1380_v57  ;;  %v1771_v18 = vmul.f32 %v1770_v3, %v4059_v23  ;;  %vm1235_vm6 = vmor %vm1233_vm5, %vm1234_vm4 }
 0x1f9   :  { %v1240_v27 = vor.u32 1.1754944e-38, %v1239_v39  ;;  %v1265_v60 = vadd.f32 0.4994258, %v1264_v21  ;;  %v1304_v26 = vmul.f32 %v1303_v61, %v4792_v53  ;;  %v1809_v30 = vmul.f32 %v1808_v29, %v4089_v59  ;;  %v733_v21 = vpop.f32.mrf.mxu1 }
 0x1fa   :  { %v2619_v37 = vclamps-f32 %v1162_v62, 1.0  ;;  %v1236_v52 = vsel %vm1235_vm6, %v2888_v33, %v1232_v41  ;;  %vm1238_vm7 = vcmp.eq.f32.partialorder %v1237_v10, 8.507059e+37  ;;  %v4136_v1 = vmul.f32 %v1616_v6, %v3903_v51  ;;  %v684_v10 = vpop.f32.mrf.mxu0 }
 0x1fb   :  { %v1241_v19 = vsel %vm1238_vm7, %v1240_v27, %v1236_v52  ;;  %v1191_v22 = vmul.f32 %v4121_v42, %v1190_v50  ;;  %v1266_v16 = vmul.f32 %v1265_v60, %v4788_v56  ;;  %v1732_v57 = vadd.f32 0.05243302, %v1731_v9  ;;  %v4799_v60 = vld [vmem:[#allocation29_spill] sm:$0xff] }
 0x1fc   :  { %v1242_v3 = vmul.f32 %v1241_v19, %v3815_v49  ;;  %v1305_v39 = vadd.f32 0.4994258, %v1304_v26  ;;  %v1382_v5 = vmul.f32 %v1381_v63, %v3674_v54  ;;  %v4143_v40 = vmul.f32 %v1656_v12, %v3909_v44 }
 0x1fd   :  { %v1693_v62 = vmul.f32 %v1692_v25, %v4042_v58  ;;  %v1772_v33 = vadd.f32 0.05243302, %v1771_v18  ;;  %v4146_v29 = vadd.f32 1.0, %v1266_v16  ;;  %v1810_v51 = vadd.f32 0.0036580483, %v1809_v30  ;;  %v4798_v18 = vld [vmem:[#allocation27_spill] sm:$0xff] }
 0x1fe   :  { %v2621_v52 = vclamps-f32 %v1242_v3, 1.0  ;;  %v2093_v6 = vadd.f32 1.0, %v2619_v37  ;;  %v1306_v56 = vmul.f32 %v1305_v39, %v4792_v53  ;;  %v1192_v9 = vadd.f32 %v4121_v42, %v1191_v22 }
 0x1ff   :  { %vm1194_vm8 = vweird.f32 %v4121_v42  ;;  %2891 = vrcp.f32 %v4146_v29  ;;  %v1338_v49 = vmul.f32 3.8918573e-05, %v3647_v14  ;;  %v1733_v44 = vmul.f32 %v1732_v57, %v4051_v13 }
 0x200   :  { %v2095_v12 = vadd.f32 1.0, %v2621_v52  ;;  %v1199_v25 = vand.u32 2147483648, %v4097_v47  ;;  %v1383_v30 = vadd.f32 0.112945676, %v1382_v5  ;;  %vm1193_vm9 = vweird.f32 %v4097_v47 }
 0x201   :  { %v1197_v61 = vand.u32 2147483647, %v4097_v47  ;;  %v4158_v53 = vadd.f32 %v684_v10, %v3410_v46  ;;  %v4160_v41 = vadd.f32 1.0, %v1306_v56  ;;  %v1773_v50 = vmul.f32 %v1772_v33, %v4059_v23  ;;  %vm4168_vm10 = vmor %vm1193_vm9, %vm1194_vm8 }
 0x202   :  { %v1811_v63 = vmul.f32 %v1810_v51, %v4089_v59  ;;  %v2125_v27 = vmul.f32 %v2093_v6, %v4798_v18  ;;  %v2127_v26 = vmul.f32 %v2095_v12, %v4799_v60  ;;  %v1196_v47 = vsel %vm4168_vm10, %v4121_v42, %v1192_v9 }
 0x203   :  { %v4176_v19 = vadd.f32 %v733_v21, %v3412_v48  ;;  %2893 = vrcp.f32 %v4160_v41  ;;  %v1339_v22 = vadd.f32 0.001143296, %v1338_v49  ;;  %v1694_v16 = vadd.f32 0.18741608, %v1693_v62 }
 0x204   :  { %v2169_v57 = vpack.c.bf16 %v2127_v26, %v2125_v27  ;;  %v1200_v3 = vor.u32 1.1754944e-38, %v1199_v25  ;;  %v1384_v39 = vmul.f32 %v1383_v30, %v3674_v54  ;;  %v4181_v33 = vmul.f32 0.5, %v3994_v17  ;;  %v687_v26 = vpop.f32.mrf.mxu0 }
 0x205   :  { %v2892_v5 = vpop.eup %2891  ;;  %v4184_v51 = vmul.f32 0.5, %v4000_v55  ;;  %vm1198_vm11 = vcmp.eq.f32.partialorder %v1197_v61, 8.507059e+37  ;;  %v4187_v42 = vmul.f32 0.70710677, %v4158_v53  ;;  %v1734_v52 = vadd.f32 0.18741608, %v1733_v44 }
 0x206   :  { %v4190_v6 = vmul.f32 0.5, %v4010_v35  ;;  %2327 = vmatmul.bf16.gmra.mxu2 %v2169_v57  ;;  %v1201_v62 = vsel %vm1198_vm11, %v1200_v3, %v1196_v47  ;;  %v1269_v10 = vmul.f32 %v2892_v5, %v4146_v29  ;;  %v1774_v56 = vadd.f32 0.18741608, %v1773_v50 }
 0x207   :  { %v1812_v9 = vadd.f32 0.05243302, %v1811_v63  ;;  %v4194_v17 = vmul.f32 0.70710677, %v4176_v19  ;;  %v1340_v55 = vmul.f32 %v1339_v22, %v3647_v14  ;;  %v1695_v49 = vmul.f32 %v1694_v16, %v4042_v58 }
 0x208   :  { %v4199_v12 = vmul.f32 0.5, %v4047_v11  ;;  %v1270_v44 = vsub.f32 1.0, %v1269_v10  ;;  %v1385_v25 = vadd.f32 0.4994258, %v1384_v39  ;;  %v1202_v21 = vmul.f32 %v1201_v62, %v3796_v36 }
 0x209   :  { %v2894_v35 = vpop.eup %2893  ;;  %v1277_v30 = vand.u32 2147483647, %v4146_v29  ;;  %v1279_v61 = vand.u32 2147483648, %v4146_v29  ;;  %v1845_v50 = vmul.f32 %v4187_v42, %v4187_v42  ;;  %v1735_v63 = vmul.f32 %v1734_v52, %v4051_v13 }
 0x20a   :  { %v1271_v18 = vmul.f32 %v2892_v5, %v1270_v44  ;;  %vm1274_vm12 = vweird.f32 %v2892_v5  ;;  %v1309_v27 = vmul.f32 %v2894_v35, %v4160_v41  ;;  %v1775_v11 = vmul.f32 %v1774_v56, %v4059_v23 }
 0x20b   :  { %v1813_v60 = vmul.f32 %v1812_v9, %v4089_v59  ;;  %v1885_v36 = vmul.f32 %v4194_v17, %v4194_v17  ;;  %v1341_v37 = vadd.f32 0.014752088, %v1340_v55  ;;  %vm1273_vm13 = vweird.f32 %v4146_v29 }
 0x20c   :  { %v1272_v47 = vadd.f32 %v2892_v5, %v1271_v18  ;;  %v1310_v22 = vsub.f32 1.0, %v1309_v27  ;;  %v1386_v16 = vmul.f32 %v1385_v25, %v3674_v54  ;;  %v2620_v57 = vclamps-f32 %v1202_v21, 1.0  ;;  %vm1275_vm14 = vmor %vm1273_vm13, %vm1274_vm12 }
 0x20d   :  { %vm1278_vm15 = vcmp.eq.f32.partialorder %v1277_v30, 8.507059e+37  ;;  %v1280_v3 = vor.u32 1.1754944e-38, %v1279_v61  ;;  %v4214_v39 = vmin.f32 %v1845_v50, 16.0  ;;  %v4217_v62 = vadd.f32 %v687_v26, %v3410_v46  ;;  %v736_v30 = vpop.f32.mrf.mxu1 }
 0x20e   :  { %v1276_v52 = vsel %vm1275_vm14, %v2892_v5, %v1272_v47  ;;  %v1311_v10 = vmul.f32 %v2894_v35, %v1310_v22  ;;  %v4219_v56 = vadd.f32 1.0, %v1386_v16  ;;  %v4221_v55 = vmin.f32 %v1885_v36, 16.0 }
 0x20f   :  { %4802 = vst [vmem:[#allocation26_spill] sm:$0xff] %v4217_v62  ;;  %v1281_v9 = vsel %vm1278_vm15, %v1280_v3, %v1276_v52  ;;  %vm1314_vm0 = vweird.f32 %v2894_v35  ;;  %v1418_v29 = vmul.f32 3.8918573e-05, %v3709_v34  ;;  %v1319_v25 = vand.u32 2147483648, %v4160_v41  ;;  %v4806_v52 = vld [vmem:[#allocation28_spill] sm:$0xff] }
 0x210   :  { %v1282_v54 = vmul.f32 %v1281_v9, %v3818_v31  ;;  %v1312_v44 = vadd.f32 %v2894_v35, %v1311_v10  ;;  %2895 = vrcp.f32 %v4219_v56  ;;  %v2094_v5 = vadd.f32 1.0, %v2620_v57 }
 0x211   :  { %v1847_v21 = vmul.f32 2.1237322e-06, %v4214_v39  ;;  %vm1313_vm1 = vweird.f32 %v4160_v41  ;;  %v1317_v61 = vand.u32 2147483647, %v4160_v41  ;;  %v1696_v50 = vadd.f32 1.1283791, %v1695_v49 }
 0x212   :  { %v2622_v18 = vclamps-f32 %v1282_v54, 1.0  ;;  %v4231_v27 = vmul.f32 0.70710677, %v4217_v62  ;;  %vm4233_vm2 = vmor %vm1313_vm1, %vm1314_vm0  ;;  %v1342_v36 = vmul.f32 %v1341_v37, %v3647_v14  ;;  %v1736_v26 = vadd.f32 1.1283791, %v1735_v63  ;;  %v4807_v37 = vld [vmem:[#allocation30_spill] sm:$0xff] }
 0x213   :  { %v1776_v47 = vadd.f32 1.1283791, %v1775_v11  ;;  %v1814_v22 = vadd.f32 0.18741608, %v1813_v60  ;;  %v1316_v16 = vsel %vm4233_vm2, %v2894_v35, %v1312_v44  ;;  %v1887_v41 = vmul.f32 2.1237322e-06, %v4221_v55 }
 0x214   :  { %v2096_v57 = vadd.f32 1.0, %v2622_v18  ;;  %v4242_v49 = vadd.f32 %v736_v30, %v3412_v48  ;;  %v1320_v3 = vor.u32 1.1754944e-38, %v1319_v25  ;;  %v2126_v10 = vmul.f32 %v2094_v5, %v4806_v52 }
 0x215   :  { %v1848_v9 = vadd.f32 0.00028619796, %v1847_v21  ;;  %vm1318_vm3 = vcmp.eq.f32.partialorder %v1317_v61, 8.507059e+37  ;;  %v1419_v54 = vadd.f32 0.001143296, %v1418_v29  ;;  %v1925_v11 = vmul.f32 %v4231_v27, %v4231_v27 }
 0x216   :  { %4805 = vst [vmem:[#allocation23_spill] sm:$0xff] %v4242_v49  ;;  %v2896_v62 = vpop.eup %2895  ;;  %v2128_v63 = vmul.f32 %v2096_v57, %v4807_v37  ;;  %v1321_v60 = vsel %vm1318_vm3, %v1320_v3, %v1316_v16  ;;  %v1343_v35 = vadd.f32 0.112945676, %v1342_v36  ;;  %v4249_v44 = vmul.f32 %v1696_v50, %v4006_v24 }
 0x217   :  { %v4252_v30 = vmul.f32 %v1736_v26, %v4015_v38  ;;  %v4255_v25 = vmul.f32 %v1776_v47, %v4026_v2  ;;  %v1389_v5 = vmul.f32 %v2896_v62, %v4219_v56  ;;  %v1815_v29 = vmul.f32 %v1814_v22, %v4089_v59 }
 0x218   :  { %v2170_v21 = vpack.c.bf16 %v2128_v63, %v2126_v10  ;;  %v1888_v61 = vadd.f32 0.00028619796, %v1887_v41  ;;  %v4260_v18 = vmul.f32 0.70710677, %v4242_v49  ;;  %v1849_v31 = vmul.f32 %v1848_v9, %v4214_v39 }
 0x219   :  { %v1322_v24 = vmul.f32 %v1321_v60, %v3825_v0  ;;  %v1390_v50 = vsub.f32 1.0, %v1389_v5  ;;  %v1399_v38 = vand.u32 2147483648, %v4219_v56  ;;  %v4265_v36 = vmin.f32 %v1925_v11, 16.0 }
 0x21a   :  { %2376 = vmatmul.bf16.gmra.mxu3 %v2170_v21  ;;  %v1344_v2 = vmul.f32 %v1343_v35, %v3647_v14  ;;  %v1420_v26 = vmul.f32 %v1419_v54, %v3709_v34  ;;  %v1458_v47 = vmul.f32 3.8918573e-05, %v3744_v32  ;;  %vm1394_vm4 = vweird.f32 %v2896_v62 }
 0x21b   :  { %v1391_v22 = vmul.f32 %v2896_v62, %v1390_v50  ;;  %v1397_v16 = vand.u32 2147483647, %v4219_v56  ;;  %v1538_v57 = vmul.f32 3.8918573e-05, %v3879_v7  ;;  %vm1393_vm5 = vweird.f32 %v4219_v56 }
 0x21c   :  { %v1345_v0 = vadd.f32 0.4994258, %v1344_v2  ;;  %v1421_v41 = vadd.f32 0.014752088, %v1420_v26  ;;  %v1459_v3 = vadd.f32 0.001143296, %v1458_v47  ;;  %vm1395_vm6 = vmor %vm1393_vm5, %vm1394_vm4  ;;  %v1889_v35 = vmul.f32 %v1888_v61, %v4221_v55 }
 0x21d   :  { %v2623_v52 = vclamps-f32 %v1322_v24, 1.0  ;;  %v1392_v10 = vadd.f32 %v2896_v62, %v1391_v22  ;;  %v1400_v9 = vor.u32 1.1754944e-38, %v1399_v38  ;;  %v1539_v37 = vadd.f32 0.001143296, %v1538_v57 }
 0x21e   :  { %v1346_v54 = vmul.f32 %v1345_v0, %v3647_v14  ;;  %v1422_v63 = vmul.f32 %v1421_v41, %v3709_v34  ;;  %v1460_v11 = vmul.f32 %v1459_v3, %v3744_v32  ;;  %v1498_v60 = vmul.f32 3.8918573e-05, %v3763_v20 }
 0x21f   :  { %v1396_v5 = vsel %vm1395_vm6, %v2896_v62, %v1392_v10  ;;  %vm1398_vm7 = vcmp.eq.f32.partialorder %v1397_v16, 8.507059e+37  ;;  %v1540_v56 = vmul.f32 %v1539_v37, %v3879_v7  ;;  %v1965_v14 = vmul.f32 %v4260_v18, %v4260_v18 }
 0x220   :  { %v1401_v21 = vsel %vm1398_vm7, %v1400_v9, %v1396_v5  ;;  %v4279_v24 = vadd.f32 1.0, %v1346_v54  ;;  %v1423_v50 = vadd.f32 0.112945676, %v1422_v63  ;;  %v1461_v38 = vadd.f32 0.014752088, %v1460_v11 }
 0x221   :  { %v1402_v2 = vmul.f32 %v1401_v21, %v3956_v43  ;;  %v1541_v26 = vadd.f32 0.014752088, %v1540_v56  ;;  %v1499_v47 = vadd.f32 0.001143296, %v1498_v60  ;;  %v1850_v22 = vadd.f32 0.0036580483, %v1849_v31  ;;  %v689_v60 = vpop.f32.mrf.mxu0 }
 0x222   :  { %v1927_v57 = vmul.f32 2.1237322e-06, %v4265_v36  ;;  %v2097_v61 = vadd.f32 1.0, %v2623_v52  ;;  %2897 = vrcp.f32 %v4279_v24  ;;  %v1424_v16 = vmul.f32 %v1423_v50, %v3709_v34  ;;  %v4808_v21 = vld [vmem:[#allocation31_spill] sm:$0xff] }
 0x223   :  { %v2625_v62 = vclamps-f32 %v1402_v2, 1.0  ;;  %v1462_v0 = vmul.f32 %v1461_v38, %v3744_v32  ;;  %v1542_v41 = vmul.f32 %v1541_v26, %v3879_v7  ;;  %v1816_v3 = vadd.f32 1.1283791, %v1815_v29  ;;  %v4809_v38 = vld [vmem:[#allocation34_spill] sm:$0xff] }
 0x224   :  { %v1890_v10 = vadd.f32 0.0036580483, %v1889_v35  ;;  %v1500_v9 = vmul.f32 %v1499_v47, %v3763_v20  ;;  %v1578_v43 = vmul.f32 3.8918573e-05, %v3900_v45  ;;  %v4291_v37 = vmin.f32 %v1965_v14, 16.0  ;;  %v738_v47 = vpop.f32.mrf.mxu1 }
 0x225   :  { %v2099_v31 = vadd.f32 1.0, %v2625_v62  ;;  %v1425_v54 = vadd.f32 0.4994258, %v1424_v16  ;;  %v1463_v52 = vadd.f32 0.112945676, %v1462_v0  ;;  %v1851_v63 = vmul.f32 %v1850_v22, %v4214_v39 }
 0x226   :  { %v1928_v11 = vadd.f32 0.00028619796, %v1927_v57  ;;  %v1543_v5 = vadd.f32 0.112945676, %v1542_v41  ;;  %v1501_v56 = vadd.f32 0.014752088, %v1500_v9  ;;  %v2129_v50 = vmul.f32 %v2097_v61, %v4808_v21 }
 0x227   :  { %v2131_v29 = vmul.f32 %v2099_v31, %v4809_v38  ;;  %v1426_v35 = vmul.f32 %v1425_v54, %v3709_v34  ;;  %v4298_v2 = vadd.f32 %v689_v60, %v3410_v46  ;;  %v1891_v26 = vmul.f32 %v1890_v10, %v4221_v55 }
 0x228   :  { %v2898_v14 = vpop.eup %2897  ;;  %v1464_v62 = vmul.f32 %v1463_v52, %v3744_v32  ;;  %v1544_v22 = vmul.f32 %v1543_v5, %v3879_v7  ;;  %v1579_v57 = vadd.f32 0.001143296, %v1578_v43  ;;  %v1502_v41 = vmul.f32 %v1501_v56, %v3763_v20 }
 0x229   :  { %v2171_v16 = vpack.c.bf16 %v2131_v29, %v2129_v50  ;;  %v1349_v0 = vmul.f32 %v2898_v14, %v4279_v24  ;;  %v4304_v61 = vadd.f32 1.0, %v1426_v35  ;;  %v1852_v34 = vadd.f32 0.05243302, %v1851_v63 }
 0x22a   :  { %v1929_v46 = vmul.f32 %v1928_v11, %v4265_v36  ;;  %v1967_v9 = vmul.f32 2.1237322e-06, %v4291_v37  ;;  %v4310_v10 = vmul.f32 0.70710677, %v4298_v2  ;;  %v1357_v54 = vand.u32 2147483647, %v4279_v24 }
 0x22b   :  { %2332 = vmatmul.bf16.gmra.mxu2 %v2171_v16  ;;  %v1350_v31 = vsub.f32 1.0, %v1349_v0  ;;  %2899 = vrcp.f32 %v4304_v61  ;;  %v4315_v43 = vadd.f32 %v738_v47, %v3412_v48  ;;  %v1359_v52 = vand.u32 2147483648, %v4279_v24 }
 0x22c   :  { %v2005_v63 = vmul.f32 %v4310_v10, %v4310_v10  ;;  %v1465_v11 = vadd.f32 0.4994258, %v1464_v62  ;;  %v1580_v60 = vmul.f32 %v1579_v57, %v3900_v45  ;;  %vm1354_vm8 = vweird.f32 %v2898_v14 }
 0x22d   :  { %4810 = vst [vmem:[#allocation36_spill] sm:$0xff] %v4315_v43  ;;  %v1351_v5 = vmul.f32 %v2898_v14, %v1350_v31  ;;  %v1545_v56 = vadd.f32 0.4994258, %v1544_v22  ;;  %v1503_v21 = vadd.f32 0.112945676, %v1502_v41  ;;  %v1853_v50 = vmul.f32 %v1852_v34, %v4214_v39 }
 0x22e   :  { %v1968_v38 = vadd.f32 0.00028619796, %v1967_v9  ;;  %vm1353_vm9 = vweird.f32 %v4279_v24  ;;  %v1466_v48 = vmul.f32 %v1465_v11, %v3744_v32  ;;  %v4324_v35 = vmin.f32 %v2005_v63, 16.0 }
 0x22f   :  { %v1352_v29 = vadd.f32 %v2898_v14, %v1351_v5  ;;  %v4327_v47 = vmul.f32 0.70710677, %v4315_v43  ;;  %v1546_v62 = vmul.f32 %v1545_v56, %v3879_v7  ;;  %v1930_v57 = vadd.f32 0.0036580483, %v1929_v46  ;;  %vm1355_vm10 = vmor %vm1353_vm9, %vm1354_vm8 }
 0x230   :  { %v1360_v16 = vor.u32 1.1754944e-38, %v1359_v52  ;;  %v4330_v22 = vadd.f32 1.0, %v1466_v48  ;;  %v1504_v0 = vmul.f32 %v1503_v21, %v3763_v20  ;;  %vm1358_vm11 = vcmp.eq.f32.partialorder %v1357_v54, 8.507059e+37 }
 0x231   :  { %v2900_v41 = vpop.eup %2899  ;;  %v1356_v34 = vsel %vm1355_vm10, %v2898_v14, %v1352_v29  ;;  %v4333_v24 = vadd.f32 1.0, %v1546_v62  ;;  %v1581_v32 = vadd.f32 0.014752088, %v1580_v60  ;;  %v4336_v9 = vmul.f32 %v1816_v3, %v4064_v28 }
 0x232   :  { %v1854_v31 = vadd.f32 0.18741608, %v1853_v50  ;;  %v1361_v63 = vsel %vm1358_vm11, %v1360_v16, %v1356_v34  ;;  %v1429_v7 = vmul.f32 %v2900_v41, %v4304_v61  ;;  %v1892_v46 = vadd.f32 0.05243302, %v1891_v26 }
 0x233   :  { %v2007_v52 = vmul.f32 2.1237322e-06, %v4324_v35  ;;  %v2045_v11 = vmul.f32 %v4327_v47, %v4327_v47  ;;  %2901 = vrcp.f32 %v4330_v22  ;;  %v1931_v14 = vmul.f32 %v1930_v57, %v4265_v36 }
 0x234   :  { %v1969_v54 = vmul.f32 %v1968_v38, %v4291_v37  ;;  %v1430_v60 = vsub.f32 1.0, %v1429_v7  ;;  %v1505_v5 = vadd.f32 0.4994258, %v1504_v0  ;;  %v1362_v28 = vmul.f32 %v1361_v63, %v3949_v15 }
 0x235   :  { %v1439_v3 = vand.u32 2147483648, %v4304_v61  ;;  %2903 = vrcp.f32 %v4333_v24  ;;  %v1582_v26 = vmul.f32 %v1581_v32, %v3900_v45  ;;  %v1855_v56 = vmul.f32 %v1854_v31, %v4214_v39 }
 0x236   :  { %v1431_v21 = vmul.f32 %v2900_v41, %v1430_v60  ;;  %vm1434_vm12 = vweird.f32 %v2900_v41  ;;  %v1437_v50 = vand.u32 2147483647, %v4304_v61  ;;  %v4352_v48 = vmul.f32 0.5, %v4158_v53 }
 0x237   :  { %v4355_v38 = vmul.f32 %v1892_v46, %v4221_v55  ;;  %v2008_v29 = vadd.f32 0.00028619796, %v2007_v52  ;;  %v4357_v15 = vmin.f32 %v2045_v11, 16.0  ;;  %v4359_v62 = vadd.f32 0.0036580483, %v1969_v54 }
 0x238   :  { %v1432_v57 = vadd.f32 %v2900_v41, %v1431_v21  ;;  %vm1433_vm13 = vweird.f32 %v4304_v61  ;;  %v1506_v16 = vmul.f32 %v1505_v5, %v3763_v20  ;;  %v4363_v34 = vadd.f32 0.05243302, %v1931_v14 }
 0x239   :  { %v2902_v0 = vpop.eup %2901  ;;  %v2624_v32 = vclamps-f32 %v1362_v28, 1.0  ;;  %vm1435_vm14 = vmor %vm1433_vm13, %vm1434_vm12  ;;  %v1440_v53 = vor.u32 1.1754944e-38, %v1439_v3  ;;  %v1583_v31 = vadd.f32 0.112945676, %v1582_v26  ;;  %v4365_v63 = vadd.f32 1.1283791, %v1855_v56 }
 0x23a   :  { %v1436_v7 = vsel %vm1435_vm14, %v2900_v41, %v1432_v57  ;;  %vm1438_vm15 = vcmp.eq.f32.partialorder %v1437_v50, 8.507059e+37  ;;  %v1469_v46 = vmul.f32 %v2902_v0, %v4330_v22  ;;  %v2009_v54 = vmul.f32 %v2008_v29, %v4324_v35 }
 0x23b   :  { %v2904_v52 = vpop.eup %2903  ;;  %v1441_v11 = vsel %vm1438_vm15, %v1440_v53, %v1436_v7  ;;  %v4370_v61 = vmul.f32 2.1237322e-06, %v4357_v15  ;;  %v4372_v20 = vadd.f32 1.0, %v1506_v16  ;;  %v1477_v5 = vand.u32 2147483647, %v4330_v22 }
 0x23c   :  { %v1442_v14 = vmul.f32 %v1441_v11, %v3961_v4  ;;  %v1470_v60 = vsub.f32 1.0, %v1469_v46  ;;  %v1549_v28 = vmul.f32 %v2904_v52, %v4333_v24  ;;  %v2098_v41 = vadd.f32 1.0, %v2624_v32  ;;  %v4811_v46 = vld [vmem:[#allocation32_spill] sm:$0xff] }
 0x23d   :  { %v1479_v3 = vand.u32 2147483648, %v4330_v22  ;;  %2905 = vrcp.f32 %v4372_v20  ;;  %v1584_v26 = vmul.f32 %v1583_v31, %v3900_v45  ;;  %vm1474_vm0 = vweird.f32 %v2902_v0 }
 0x23e   :  { %v2626_v56 = vclamps-f32 %v1442_v14, 1.0  ;;  %v1471_v21 = vmul.f32 %v2902_v0, %v1470_v60  ;;  %v1550_v50 = vsub.f32 1.0, %v1549_v28  ;;  %vm1473_vm1 = vweird.f32 %v4330_v22  ;;  %v4812_v14 = vld [vmem:[#allocation35_spill] sm:$0xff] }
 0x23f   :  { %vm1553_vm2 = vweird.f32 %v4333_v24  ;;  %v1557_v4 = vand.u32 2147483647, %v4333_v24  ;;  %v1559_v29 = vand.u32 2147483648, %v4333_v24  ;;  %vm1554_vm3 = vweird.f32 %v2904_v52  ;;  %vm1475_vm4 = vmor %vm1473_vm1, %vm1474_vm0 }
 0x240   :  { %v2100_v57 = vadd.f32 1.0, %v2626_v56  ;;  %v1472_v16 = vadd.f32 %v2902_v0, %v1471_v21  ;;  %v1551_v32 = vmul.f32 %v2904_v52, %v1550_v50  ;;  %v4384_v53 = vadd.f32 0.0036580483, %v2009_v54  ;;  %vm1555_vm6 = vmor %vm1553_vm2, %vm1554_vm3 }
 0x241   :  { %vm1478_vm5 = vcmp.eq.f32.partialorder %v1477_v5, 8.507059e+37  ;;  %v1480_v31 = vor.u32 1.1754944e-38, %v1479_v3  ;;  %v1585_v7 = vadd.f32 0.4994258, %v1584_v26  ;;  %v2130_v11 = vmul.f32 %v2098_v41, %v4811_v46  ;;  %v4813_v5 = vld [vmem:[#allocation17_spill] sm:$0xff] }
 0x242   :  { %v2132_v22 = vmul.f32 %v2100_v57, %v4812_v14  ;;  %v1476_v60 = vsel %vm1475_vm4, %v2902_v0, %v1472_v16  ;;  %v1552_v28 = vadd.f32 %v2904_v52, %v1551_v32  ;;  %v1560_v56 = vor.u32 1.1754944e-38, %v1559_v29  ;;  %v4814_v32 = vld [vmem:[#allocation21_spill] sm:$0xff] }
 0x243   :  { %v2906_v43 = vpop.eup %2905  ;;  %v1481_v49 = vsel %vm1478_vm5, %v1480_v31, %v1476_v60  ;;  %v1586_v21 = vmul.f32 %v1585_v7, %v3900_v45  ;;  %v1618_v54 = vmul.f32 3.8918573e-05, %v3940_v8  ;;  %vm1558_vm7 = vcmp.eq.f32.partialorder %v1557_v4, 8.507059e+37  ;;  %v4815_v4 = vld [vmem:[#allocation18_spill] sm:$0xff]  ;;  %v4822_v60 = vld [vmem:[#allocation19_spill] sm:$0xff] }
 0x244   :  { %v2172_v50 = vpack.c.bf16 %v2132_v22, %v2130_v11  ;;  %v1482_v3 = vmul.f32 %v1481_v49, %v4813_v5  ;;  %v1556_v26 = vsel %vm1555_vm6, %v2904_v52, %v1552_v28  ;;  %v1509_v57 = vmul.f32 %v2906_v43, %v4372_v20 }
 0x245   :  { %v1561_v41 = vsel %vm1558_vm7, %v1560_v56, %v1556_v26  ;;  %v1517_v0 = vand.u32 2147483647, %v4372_v20  ;;  %v1519_v16 = vand.u32 2147483648, %v4372_v20  ;;  %v4397_v31 = vadd.f32 1.0, %v1586_v21 }
 0x246   :  { %2381 = vmatmul.bf16.gmra.mxu3 %v2172_v50  ;;  %v2627_v24 = vclamps-f32 %v1482_v3, 1.0  ;;  %v1562_v29 = vmul.f32 %v1561_v41, %v4814_v32  ;;  %v1619_v45 = vadd.f32 0.001143296, %v1618_v54  ;;  %v4401_v7 = vmul.f32 %v4359_v62, %v4291_v37  ;;  %v4818_v50 = vld [vmem:[#allocation37_spill] sm:$0xff] }
 0x247   :  { %v1510_v49 = vsub.f32 1.0, %v1509_v57  ;;  %v1698_v52 = vmul.f32 3.8918573e-05, %v4042_v58  ;;  %v1658_v46 = vmul.f32 3.8918573e-05, %v4815_v4  ;;  %vm1513_vm8 = vweird.f32 %v4372_v20  ;;  %v4819_v57 = vld [vmem:[#allocation24_spill] sm:$0xff] }
 0x248   :  { %v2629_v11 = vclamps-f32 %v1562_v29, 1.0  ;;  %v2101_v14 = vadd.f32 1.0, %v2627_v24  ;;  %2907 = vrcp.f32 %v4397_v31  ;;  %vm1514_vm9 = vweird.f32 %v2906_v43 }
 0x249   :  { %v1511_v22 = vmul.f32 %v2906_v43, %v1510_v49  ;;  %vm4407_vm10 = vcmp.eq.f32.partialorder %v1517_v0, 8.507059e+37  ;;  %v1620_v62 = vmul.f32 %v1619_v45, %v3940_v8  ;;  %v1520_v56 = vor.u32 1.1754944e-38, %v1519_v16  ;;  %vm1515_vm11 = vmor %vm1513_vm8, %vm1514_vm9 }
 0x24a   :  { %v2103_v28 = vadd.f32 1.0, %v2629_v11  ;;  %v1699_v21 = vadd.f32 0.001143296, %v1698_v52  ;;  %v1659_v54 = vadd.f32 0.001143296, %v1658_v46  ;;  %v2133_v5 = vmul.f32 %v2101_v14, %v4818_v50 }
 0x24b   :  { %v1512_v3 = vadd.f32 %v2906_v43, %v1511_v22  ;;  %v1597_v26 = vand.u32 2147483647, %v4397_v31  ;;  %v1621_v41 = vadd.f32 0.014752088, %v1620_v62  ;;  %v1738_v29 = vmul.f32 3.8918573e-05, %v4051_v13 }
 0x24c   :  { %v2135_v24 = vmul.f32 %v2103_v28, %v4819_v57  ;;  %v1700_v0 = vmul.f32 %v1699_v21, %v4042_v58  ;;  %v1660_v32 = vmul.f32 %v1659_v54, %v4815_v4  ;;  %vm1593_vm12 = vweird.f32 %v4397_v31 }
 0x24d   :  { %v1516_v16 = vsel %vm1515_vm11, %v2906_v43, %v1512_v3  ;;  %v1622_v45 = vmul.f32 %v1621_v41, %v3940_v8  ;;  %v1778_v49 = vmul.f32 3.8918573e-05, %v4059_v23  ;;  %v1858_v52 = vmul.f32 3.8918573e-05, %v4214_v39 }
 0x24e   :  { %v2908_v46 = vpop.eup %2907  ;;  %v2173_v11 = vpack.c.bf16 %v2135_v24, %v2133_v5  ;;  %v1521_v20 = vsel %vm4407_vm10, %v1520_v56, %v1516_v16  ;;  %v1701_v14 = vadd.f32 0.014752088, %v1700_v0  ;;  %v1661_v22 = vadd.f32 0.014752088, %v1660_v32 }
 0x24f   :  { %v1589_v62 = vmul.f32 %v2908_v46, %v4397_v31  ;;  %vm4427_vm13 = vcmp.eq.f32.partialorder %v1597_v26, 8.507059e+37  ;;  %v1599_v43 = vand.u32 2147483648, %v4397_v31  ;;  %v1623_v21 = vadd.f32 0.112945676, %v1622_v45 }
 0x250   :  { %2337 = vmatmul.bf16.gmra.mxu2 %v2173_v11  ;;  %v1702_v54 = vmul.f32 %v1701_v14, %v4042_v58  ;;  %v1662_v50 = vmul.f32 %v1661_v22, %v4815_v4  ;;  %v1739_v5 = vadd.f32 0.001143296, %v1738_v29  ;;  %v1779_v3 = vadd.f32 0.001143296, %v1778_v49 }
 0x251   :  { %v1522_v56 = vmul.f32 %v1521_v20, %v4822_v60  ;;  %v1590_v41 = vsub.f32 1.0, %v1589_v62  ;;  %v1624_v57 = vmul.f32 %v1623_v21, %v3940_v8  ;;  %v1859_v24 = vadd.f32 0.001143296, %v1858_v52 }
 0x252   :  { %v1703_v26 = vadd.f32 0.112945676, %v1702_v54  ;;  %v1663_v0 = vadd.f32 0.112945676, %v1662_v50  ;;  %v1740_v32 = vmul.f32 %v1739_v5, %v4051_v13  ;;  %v1780_v16 = vmul.f32 %v1779_v3, %v4059_v23 }
 0x253   :  { %v1591_v45 = vmul.f32 %v2908_v46, %v1590_v41  ;;  %vm1594_vm14 = vweird.f32 %v2908_v46  ;;  %v1625_v11 = vadd.f32 0.4994258, %v1624_v57  ;;  %v1860_v14 = vmul.f32 %v1859_v24, %v4214_v39 }
 0x254   :  { %v1704_v29 = vmul.f32 %v1703_v26, %v4042_v58  ;;  %v1664_v49 = vmul.f32 %v1663_v0, %v4815_v4  ;;  %v1741_v20 = vadd.f32 0.014752088, %v1740_v32  ;;  %v1781_v22 = vadd.f32 0.014752088, %v1780_v16  ;;  %vm1595_vm15 = vmor %vm1593_vm12, %vm1594_vm14  ;;  %v4823_v32 = vld [vmem:[#allocation22_spill] sm:$0xff] }
 0x255   :  { %v2628_v62 = vclamps-f32 %v1522_v56, 1.0  ;;  %v1592_v21 = vadd.f32 %v2908_v46, %v1591_v45  ;;  %v1626_v52 = vmul.f32 %v1625_v11, %v3940_v8  ;;  %v1861_v54 = vadd.f32 0.014752088, %v1860_v14 }
 0x256   :  { %v1600_v50 = vor.u32 1.1754944e-38, %v1599_v43  ;;  %v1705_v5 = vadd.f32 0.4994258, %v1704_v29  ;;  %v1665_v3 = vadd.f32 0.4994258, %v1664_v49  ;;  %v1742_v60 = vmul.f32 %v1741_v20, %v4051_v13 }
 0x257   :  { %v1596_v41 = vsel %vm1595_vm15, %v2908_v46, %v1592_v21  ;;  %v4445_v57 = vadd.f32 1.0, %v1626_v52  ;;  %v1782_v24 = vmul.f32 %v1781_v22, %v4059_v23  ;;  %v1862_v26 = vmul.f32 %v1861_v54, %v4214_v39  ;;  %v4824_v21 = vld [vmem:[#allocation38_spill] sm:$0xff] }
 0x258   :  { %v1601_v56 = vsel %vm4427_vm13, %v1600_v50, %v1596_v41  ;;  %v1706_v8 = vmul.f32 %v1705_v5, %v4042_v58  ;;  %v1666_v31 = vmul.f32 %v1665_v3, %v4815_v4  ;;  %v1743_v0 = vadd.f32 0.112945676, %v1742_v60  ;;  %v4825_v50 = vld [vmem:[#allocation20_spill] sm:$0xff] }
 0x259   :  { %v2011_v43 = vmul.f32 %v4384_v53, %v4324_v35  ;;  %v1602_v16 = vmul.f32 %v1601_v56, %v4823_v32  ;;  %v2102_v46 = vadd.f32 1.0, %v2628_v62  ;;  %2909 = vrcp.f32 %v4445_v57 }
 0x25a   :  { %v4459_v45 = vmul.f32 %v4363_v34, %v4265_v36  ;;  %v4461_v11 = vadd.f32 1.0, %v1706_v8  ;;  %v4463_v28 = vadd.f32 1.0, %v1666_v31  ;;  %v1744_v58 = vmul.f32 %v1743_v0, %v4051_v13 }
 0x25b   :  { %v4468_v4 = vmul.f32 %v4365_v63, %v4187_v42  ;;  %v2630_v53 = vclamps-f32 %v1602_v16, 1.0  ;;  %v1783_v14 = vadd.f32 0.112945676, %v1782_v24  ;;  %v1863_v29 = vadd.f32 0.112945676, %v1862_v26 }
 0x25c   :  { %v4471_v49 = vadd.f32 0.00028619796, %v4370_v61  ;;  %v1637_v20 = vand.u32 2147483647, %v4445_v57  ;;  %v1639_v34 = vand.u32 2147483648, %v4445_v57  ;;  %2911 = vrcp.f32 %v4461_v11 }
 0x25d   :  { %v4476_v22 = vadd.f32 0.05243302, %v2011_v43  ;;  %v2104_v62 = vadd.f32 1.0, %v2630_v53  ;;  %v2134_v52 = vmul.f32 %v2102_v46, %v4824_v21  ;;  %2913 = vrcp.f32 %v4463_v28 }
 0x25e   :  { %vm1633_vm0 = vweird.f32 %v4445_v57  ;;  %v1717_v42 = vand.u32 2147483647, %v4461_v11  ;;  %v1745_v63 = vadd.f32 0.4994258, %v1744_v58  ;;  %v1818_v61 = vmul.f32 3.8918573e-05, %v4089_v59 }
 0x25f   :  { %v2910_v54 = vpop.eup %2909  ;;  %v2136_v5 = vmul.f32 %v2104_v62, %v4825_v50  ;;  %v1719_v3 = vand.u32 2147483648, %v4461_v11  ;;  %v1784_v60 = vmul.f32 %v1783_v14, %v4059_v23  ;;  %v1864_v41 = vmul.f32 %v1863_v29, %v4214_v39 }
 0x260   :  { %v1629_v24 = vmul.f32 %v2910_v54, %v4445_v57  ;;  %vm4488_vm1 = vcmp.eq.f32.partialorder %v1637_v20, 8.507059e+37  ;;  %v1640_v56 = vor.u32 1.1754944e-38, %v1639_v34  ;;  %v1677_v8 = vand.u32 2147483647, %v4463_v28 }
 0x261   :  { %v2174_v31 = vpack.c.bf16 %v2136_v5, %v2134_v52  ;;  %v1746_v0 = vmul.f32 %v1745_v63, %v4051_v13  ;;  %v1785_v43 = vadd.f32 0.4994258, %v1784_v60  ;;  %v1865_v32 = vadd.f32 0.4994258, %v1864_v41 }
 0x262   :  { %v2912_v16 = vpop.eup %2911  ;;  %v1630_v46 = vsub.f32 1.0, %v1629_v24  ;;  %vm1713_vm2 = vweird.f32 %v4461_v11  ;;  %vm1673_vm3 = vweird.f32 %v4463_v28  ;;  %v1679_v58 = vand.u32 2147483648, %v4463_v28 }
 0x263   :  { %v2914_v53 = vpop.eup %2913  ;;  %2386 = vmatmul.bf16.gmra.mxu3 %v2174_v31  ;;  %v1709_v14 = vmul.f32 %v2912_v16, %v4461_v11  ;;  %vm4498_vm4 = vcmp.eq.f32.partialorder %v1717_v42, 8.507059e+37  ;;  %v1720_v20 = vor.u32 1.1754944e-38, %v1719_v3  ;;  %v4502_v13 = vadd.f32 1.0, %v1746_v0 }
 0x264   :  { %v1786_v34 = vmul.f32 %v1785_v43, %v4059_v23  ;;  %v1631_v62 = vmul.f32 %v2910_v54, %v1630_v46  ;;  %vm1634_vm5 = vweird.f32 %v2910_v54  ;;  %v1669_v21 = vmul.f32 %v2914_v53, %v4463_v28 }
 0x265   :  { %v1866_v52 = vmul.f32 %v1865_v32, %v4214_v39  ;;  %v1710_v63 = vsub.f32 1.0, %v1709_v14  ;;  %vm4507_vm6 = vcmp.eq.f32.partialorder %v1677_v8, 8.507059e+37  ;;  %2915 = vrcp.f32 %v4502_v13  ;;  %vm1635_vm8 = vmor %vm1633_vm0, %vm1634_vm5 }
 0x266   :  { %v1819_v42 = vadd.f32 0.001143296, %v1818_v61  ;;  %v1632_v5 = vadd.f32 %v2910_v54, %v1631_v62  ;;  %vm1714_vm7 = vweird.f32 %v2912_v16  ;;  %v1670_v3 = vsub.f32 1.0, %v1669_v21 }
 0x267   :  { %v4512_v60 = vadd.f32 1.0, %v1786_v34  ;;  %v1711_v23 = vmul.f32 %v2912_v16, %v1710_v63  ;;  %vm1674_vm9 = vweird.f32 %v2914_v53  ;;  %v1759_v39 = vand.u32 2147483648, %v4502_v13  ;;  %vm1715_vm10 = vmor %vm1713_vm2, %vm1714_vm7 }
 0x268   :  { %v4517_v41 = vadd.f32 1.0, %v1866_v52  ;;  %v1636_v24 = vsel %vm1635_vm8, %v2910_v54, %v1632_v5  ;;  %v1671_v8 = vmul.f32 %v2914_v53, %v1670_v3  ;;  %v1757_v31 = vand.u32 2147483647, %v4502_v13  ;;  %vm1675_vm12 = vmor %vm1673_vm3, %vm1674_vm9 }
 0x269   :  { %2917 = vrcp.f32 %v4512_v60  ;;  %v1641_v61 = vsel %vm4488_vm1, %v1640_v56, %v1636_v24  ;;  %v1712_v0 = vadd.f32 %v2912_v16, %v1711_v23  ;;  %v1680_v43 = vor.u32 1.1754944e-38, %v1679_v58  ;;  %v4836_v24 = vld [vmem:[#allocation25_spill] sm:$0xff] }
 0x26a   :  { %v1898_v57 = vmul.f32 3.8918573e-05, %v4221_v55  ;;  %v1642_v32 = vmul.f32 %v1641_v61, %v4136_v1  ;;  %v1672_v46 = vadd.f32 %v2914_v53, %v1671_v8  ;;  %vm1753_vm11 = vweird.f32 %v4502_v13 }
 0x26b   :  { %v1799_v54 = vand.u32 2147483648, %v4512_v60  ;;  %2919 = vrcp.f32 %v4517_v41  ;;  %v2916_v14 = vpop.eup %2915  ;;  %v1716_v26 = vsel %vm1715_vm10, %v2912_v16, %v1712_v0  ;;  %v1760_v56 = vor.u32 1.1754944e-38, %v1759_v39 }
 0x26c   :  { %v1797_v1 = vand.u32 2147483647, %v4512_v60  ;;  %v1820_v58 = vmul.f32 %v1819_v42, %v4089_v59  ;;  %v2631_v11 = vclamps-f32 %v1642_v32, 1.0  ;;  %v1721_v34 = vsel %vm4498_vm4, %v1720_v20, %v1716_v26 }
 0x26d   :  { %v1676_v62 = vsel %vm1675_vm12, %v2914_v53, %v1672_v46  ;;  %v1749_v21 = vmul.f32 %v2916_v14, %v4502_v13  ;;  %vm4539_vm13 = vcmp.eq.f32.partialorder %v1757_v31, 8.507059e+37  ;;  %v1722_v16 = vmul.f32 %v1721_v34, %v4249_v44 }
 0x26e   :  { %v1681_v28 = vsel %vm4507_vm6, %v1680_v43, %v1676_v62  ;;  %vm1754_vm14 = vweird.f32 %v2916_v14  ;;  %vm1793_vm15 = vweird.f32 %v4512_v60  ;;  %v1877_v63 = vand.u32 2147483647, %v4517_v41 }
 0x26f   :  { %v2918_v42 = vpop.eup %2917  ;;  %v2105_v29 = vadd.f32 1.0, %v2631_v11  ;;  %v1682_v53 = vmul.f32 %v1681_v28, %v4143_v40  ;;  %v1750_v20 = vsub.f32 1.0, %v1749_v21  ;;  %v1800_v5 = vor.u32 1.1754944e-38, %v1799_v54  ;;  %vm1755_vm5 = vmor %vm1753_vm11, %vm1754_vm14  ;;  %v4839_v28 = vld [vmem:[#allocation33_spill] sm:$0xff] }
 0x270   :  { %v2633_v3 = vclamps-f32 %v1722_v16, 1.0  ;;  %v1789_v23 = vmul.f32 %v2918_v42, %v4512_v60  ;;  %vm1794_vm0 = vweird.f32 %v2918_v42  ;;  %vm4550_vm1 = vcmp.eq.f32.partialorder %v1797_v1, 8.507059e+37 }
 0x271   :  { %vm1873_vm2 = vweird.f32 %v4517_v41  ;;  %v1879_v50 = vand.u32 2147483648, %v4517_v41  ;;  %v2920_v39 = vpop.eup %2919  ;;  %v2137_v8 = vmul.f32 %v2105_v29, %v4836_v24  ;;  %v2632_v31 = vclamps-f32 %v1682_v53, 1.0  ;;  %vm1795_vm6 = vmor %vm1793_vm15, %vm1794_vm0 }
 0x272   :  { %v1751_v61 = vmul.f32 %v2916_v14, %v1750_v20  ;;  %v1821_v40 = vadd.f32 0.014752088, %v1820_v58  ;;  %v2107_v0 = vadd.f32 1.0, %v2633_v3  ;;  %v1790_v43 = vsub.f32 1.0, %v1789_v23 }
 0x273   :  { %v1869_v32 = vmul.f32 %v2920_v39, %v4517_v41  ;;  %vm1874_vm3 = vweird.f32 %v2920_v39  ;;  %vm4558_vm4 = vcmp.eq.f32.partialorder %v1877_v63, 8.507059e+37  ;;  %v2106_v26 = vadd.f32 1.0, %v2632_v31 }
 0x274   :  { %v1752_v54 = vadd.f32 %v2916_v14, %v1751_v61  ;;  %v1880_v1 = vor.u32 1.1754944e-38, %v1879_v50  ;;  %v1822_v11 = vmul.f32 %v1821_v40, %v4089_v59  ;;  %v2139_v34 = vmul.f32 %v2107_v0, %v4181_v33  ;;  %vm1875_vm7 = vmor %vm1873_vm2, %vm1874_vm3 }
 0x275   :  { %v1791_v58 = vmul.f32 %v2918_v42, %v1790_v43  ;;  %v1870_v62 = vsub.f32 1.0, %v1869_v32  ;;  %v1899_v21 = vadd.f32 0.001143296, %v1898_v57  ;;  %v2138_v63 = vmul.f32 %v2106_v26, %v4839_v28 }
 0x276   :  { %v1756_v16 = vsel %vm1755_vm5, %v2916_v14, %v1752_v54  ;;  %v1823_v29 = vadd.f32 0.112945676, %v1822_v11  ;;  %v1938_v53 = vmul.f32 3.8918573e-05, %v4265_v36  ;;  %v2175_v20 = vpack.c.bf16 %v2139_v34, %v2137_v8 }
 0x277   :  { %v1761_v3 = vsel %vm4539_vm13, %v1760_v56, %v1756_v16  ;;  %v1792_v23 = vadd.f32 %v2918_v42, %v1791_v58  ;;  %v1871_v50 = vmul.f32 %v2920_v39, %v1870_v62  ;;  %v1900_v57 = vmul.f32 %v1899_v21, %v4221_v55 }
 0x278   :  { %v1762_v33 = vmul.f32 %v1761_v3, %v4252_v30  ;;  %v1824_v13 = vmul.f32 %v1823_v29, %v4089_v59  ;;  %v1939_v14 = vadd.f32 0.001143296, %v1938_v53  ;;  %2342 = vmatmul.bf16.gmra.mxu2 %v2175_v20  ;;  %v2018_v8 = vmul.f32 3.8918573e-05, %v4324_v35 }
 0x279   :  { %v1796_v24 = vsel %vm1795_vm6, %v2918_v42, %v1792_v23  ;;  %v1872_v31 = vadd.f32 %v2920_v39, %v1871_v50  ;;  %v1978_v56 = vmul.f32 3.8918573e-05, %v4291_v37  ;;  %v1901_v61 = vadd.f32 0.014752088, %v1900_v57 }
 0x27a   :  { %v2634_v52 = vclamps-f32 %v1762_v33, 1.0  ;;  %v1801_v30 = vsel %vm4550_vm1, %v1800_v5, %v1796_v24  ;;  %v1825_v60 = vadd.f32 0.4994258, %v1824_v13  ;;  %v1940_v42 = vmul.f32 %v1939_v14, %v4265_v36 }
 0x27b   :  { %v1802_v40 = vmul.f32 %v1801_v30, %v4255_v25  ;;  %v1876_v0 = vsel %vm1875_vm7, %v2920_v39, %v1872_v31  ;;  %v2019_v43 = vadd.f32 0.001143296, %v2018_v8  ;;  %v1902_v5 = vmul.f32 %v1901_v61, %v4221_v55 }
 0x27c   :  { %v2108_v32 = vadd.f32 1.0, %v2634_v52  ;;  %v1881_v54 = vsel %vm4558_vm4, %v1880_v1, %v1876_v0  ;;  %v1826_v26 = vmul.f32 %v1825_v60, %v4089_v59  ;;  %v1941_v11 = vadd.f32 0.014752088, %v1940_v42 }
 0x27d   :  { %v2635_v44 = vclamps-f32 %v1802_v40, 1.0  ;;  %v1882_v41 = vmul.f32 %v1881_v54, %v4468_v4  ;;  %v2020_v34 = vmul.f32 %v2019_v43, %v4324_v35  ;;  %v1903_v58 = vadd.f32 0.112945676, %v1902_v5 }
 0x27e   :  { %v2140_v25 = vmul.f32 %v2108_v32, %v4184_v51  ;;  %v4593_v39 = vadd.f32 1.0, %v1826_v26  ;;  %v1979_v62 = vadd.f32 0.001143296, %v1978_v56  ;;  %v1942_v46 = vmul.f32 %v1941_v11, %v4265_v36 }
 0x27f   :  { %v2637_v21 = vclamps-f32 %v1882_v41, 1.0  ;;  %v2109_v16 = vadd.f32 1.0, %v2635_v44  ;;  %v2021_v1 = vadd.f32 0.014752088, %v2020_v34  ;;  %v1894_v59 = vadd.f32 0.18741608, %v4355_v38 }
 0x280   :  { %v2049_v28 = vmul.f32 %v4471_v49, %v4357_v15  ;;  %v2176_v4 = vpack.c.bf16 %v2140_v25, %v2138_v63  ;;  %2921 = vrcp.f32 %v4593_v39  ;;  %v1972_v29 = vadd.f32 0.05243302, %v4401_v7 }
 0x281   :  { %v2013_v51 = vmul.f32 %v4476_v22, %v4324_v35  ;;  %v2111_v53 = vadd.f32 1.0, %v2637_v21  ;;  %v1904_v20 = vmul.f32 %v1903_v58, %v4221_v55  ;;  %v1934_v3 = vadd.f32 0.18741608, %v4459_v45 }
 0x282   :  { %2391 = vmatmul.bf16.gmra.mxu3 %v2176_v4  ;;  %v1943_v23 = vadd.f32 0.112945676, %v1942_v46  ;;  %v2022_v38 = vmul.f32 %v2021_v1, %v4324_v35  ;;  %v1980_v50 = vmul.f32 %v1979_v62, %v4291_v37  ;;  %v2141_v49 = vmul.f32 %v2109_v16, %v4190_v6 }
 0x283   :  { %v2143_v63 = vmul.f32 %v2111_v53, %v4352_v48  ;;  %v1905_v33 = vadd.f32 0.4994258, %v1904_v20  ;;  %v2058_v7 = vmul.f32 3.8918573e-05, %v4357_v15  ;;  %v2050_v13 = vadd.f32 0.0036580483, %v2049_v28 }
 0x284   :  { %v1944_v22 = vmul.f32 %v1943_v23, %v4265_v36  ;;  %v2023_v57 = vadd.f32 0.112945676, %v2022_v38  ;;  %v1981_v14 = vadd.f32 0.014752088, %v1980_v50  ;;  %v2014_v24 = vadd.f32 0.18741608, %v2013_v51 }
 0x285   :  { %v2177_v45 = vpack.c.bf16 %v2143_v63, %v2141_v49  ;;  %v1906_v31 = vmul.f32 %v1905_v33, %v4221_v55  ;;  %v2059_v8 = vadd.f32 0.001143296, %v2058_v7  ;;  %v1895_v52 = vmul.f32 %v1894_v59, %v4221_v55 }
 0x286   :  { %v2922_v56 = vpop.eup %2921  ;;  %v1945_v30 = vadd.f32 0.4994258, %v1944_v22  ;;  %v2024_v6 = vmul.f32 %v2023_v57, %v4324_v35  ;;  %v1982_v48 = vmul.f32 %v1981_v14, %v4291_v37  ;;  %v1973_v60 = vmul.f32 %v1972_v29, %v4291_v37 }
 0x287   :  { %v1829_v61 = vmul.f32 %v2922_v56, %v4593_v39  ;;  %v4617_v40 = vadd.f32 1.0, %v1906_v31  ;;  %v2060_v0 = vmul.f32 %v2059_v8, %v4357_v15  ;;  %v1935_v42 = vmul.f32 %v1934_v3, %v4265_v36 }
 0x288   :  { %v1946_v43 = vmul.f32 %v1945_v30, %v4265_v36  ;;  %v2025_v32 = vadd.f32 0.4994258, %v2024_v6  ;;  %v1983_v54 = vadd.f32 0.112945676, %v1982_v48  ;;  %v2015_v55 = vmul.f32 %v2014_v24, %v4324_v35  ;;  %2347 = vmatmul.bf16.gmra.mxu2 %v2177_v45 }
 0x289   :  { %v2051_v26 = vmul.f32 %v2050_v13, %v4357_v15  ;;  %v1830_v5 = vsub.f32 1.0, %v1829_v61  ;;  %2923 = vrcp.f32 %v4617_v40  ;;  %v1839_v44 = vand.u32 2147483648, %v4593_v39 }
 0x28a   :  { %v4626_v41 = vadd.f32 1.0, %v1946_v43  ;;  %v2026_v11 = vmul.f32 %v2025_v32, %v4324_v35  ;;  %v1984_v34 = vmul.f32 %v1983_v54, %v4291_v37  ;;  %vm1834_vm8 = vweird.f32 %v2922_v56 }
 0x28b   :  { %v1831_v25 = vmul.f32 %v2922_v56, %v1830_v5  ;;  %v1837_v36 = vand.u32 2147483647, %v4593_v39  ;;  %v2061_v58 = vadd.f32 0.014752088, %v2060_v0  ;;  %v1896_v62 = vadd.f32 1.1283791, %v1895_v52  ;;  %v2367_v5 = vpop.f32.mrf.mxu3 }
 0x28c   :  { %v1936_v21 = vadd.f32 1.1283791, %v1935_v42  ;;  %v1974_v16 = vadd.f32 0.18741608, %v1973_v60  ;;  %2925 = vrcp.f32 %v4626_v41  ;;  %vm1833_vm9 = vweird.f32 %v4593_v39 }
 0x28d   :  { %v1832_v46 = vadd.f32 %v2922_v56, %v1831_v25  ;;  %v4633_v1 = vadd.f32 1.0, %v2026_v11  ;;  %v1985_v59 = vadd.f32 0.4994258, %v1984_v34  ;;  %v2016_v28 = vadd.f32 1.1283791, %v2015_v55  ;;  %vm1835_vm10 = vmor %vm1833_vm9, %vm1834_vm8 }
 0x28e   :  { %v2052_v35 = vadd.f32 0.05243302, %v2051_v26  ;;  %v1840_v4 = vor.u32 1.1754944e-38, %v1839_v44  ;;  %v2062_v29 = vmul.f32 %v2061_v58, %v4357_v15  ;;  %v4637_v53 = vmul.f32 0.5, %v4176_v19  ;;  %v2318_v26 = vpop.f32.mrf.mxu2  ;;  %v4679_v44 = vld [vmem:[%s4737_s5] ss:$0 sm:$0xff] }
 0x28f   :  { %v2924_v51 = vpop.eup %2923  ;;  %v1836_v20 = vsel %vm1835_vm10, %v2922_v56, %v1832_v46  ;;  %vm1838_vm11 = vcmp.eq.f32.partialorder %v1837_v36, 8.507059e+37  ;;  %2927 = vrcp.f32 %v4633_v1  ;;  %v1897_v3 = vmul.f32 %v1896_v62, %v4194_v17  ;;  %s3069_s5 = smov [#allocation12]  }
 0x290   :  { %v4642_v39 = vmul.f32 %v1974_v16, %v4291_v37  ;;  %v1841_v23 = vsel %vm1838_vm11, %v1840_v4, %v1836_v20  ;;  %v1909_v38 = vmul.f32 %v2924_v51, %v4617_v40  ;;  %v1917_v50 = vand.u32 2147483647, %v4617_v40  ;;  %s2498_s20 = sshll.u32 %s3069_s5, 4  ;;  %s2499_s20 = int_to_ptr.vmem [resolvable:$true] %s2498_s20 }
 0x291   :  { %v1919_v49 = vand.u32 2147483648, %v4617_v40  ;;  %v1986_v63 = vmul.f32 %v1985_v59, %v4291_v37  ;;  %v2063_v19 = vadd.f32 0.112945676, %v2062_v29  ;;  %v1937_v7 = vmul.f32 %v1936_v21, %v4231_v27 }
 0x292   :  { %v2926_v33 = vpop.eup %2925  ;;  %v4650_v13 = vmul.f32 %v2016_v28, %v4310_v10  ;;  %v2053_v17 = vmul.f32 %v2052_v35, %v4357_v15  ;;  %v1910_v22 = vsub.f32 1.0, %v1909_v38  ;;  %v1842_v57 = vmul.f32 %v1841_v23, %v4336_v9 }
 0x293   :  { %v1949_v14 = vmul.f32 %v2926_v33, %v4626_v41  ;;  %v1957_v24 = vand.u32 2147483647, %v4626_v41  ;;  %v1959_v45 = vand.u32 2147483648, %v4626_v41  ;;  %vm1914_vm12 = vweird.f32 %v2924_v51 }
 0x294   :  { %v1911_v31 = vmul.f32 %v2924_v51, %v1910_v22  ;;  %v4657_v37 = vadd.f32 1.0, %v1986_v63  ;;  %v2064_v27 = vmul.f32 %v2063_v19, %v4357_v15  ;;  %vm1913_vm13 = vweird.f32 %v4617_v40 }
 0x295   :  { %v2928_v8 = vpop.eup %2927  ;;  %vm4661_vm14 = vcmp.eq.f32.partialorder %v1917_v50, 8.507059e+37  ;;  %v1920_v9 = vor.u32 1.1754944e-38, %v1919_v49  ;;  %v1950_v56 = vsub.f32 1.0, %v1949_v14  ;;  %vm1953_vm15 = vweird.f32 %v4626_v41  ;;  %vm1915_vm0 = vmor %vm1913_vm13, %vm1914_vm12 }
 0x296   :  { %v1912_v52 = vadd.f32 %v2924_v51, %v1911_v31  ;;  %v2029_v30 = vmul.f32 %v2928_v8, %v4633_v1  ;;  %2929 = vrcp.f32 %v4657_v37  ;;  %v2636_v6 = vclamps-f32 %v1842_v57, 1.0  ;;  %v2320_v14 = vpop.f32.mrf.mxu2 }
 0x297   :  { %v1951_v48 = vmul.f32 %v2926_v33, %v1950_v56  ;;  %vm1954_vm1 = vweird.f32 %v2926_v33  ;;  %vm4668_vm2 = vcmp.eq.f32.partialorder %v1957_v24, 8.507059e+37  ;;  %v1960_v40 = vor.u32 1.1754944e-38, %v1959_v45 }
 0x298   :  { %v1916_v61 = vsel %vm1915_vm0, %v2924_v51, %v1912_v52  ;;  %v2030_v0 = vsub.f32 1.0, %v2029_v30  ;;  %v2065_v42 = vadd.f32 0.4994258, %v2064_v27  ;;  %v2037_v54 = vand.u32 2147483647, %v4633_v1  ;;  %vm1955_vm3 = vmor %vm1953_vm15, %vm1954_vm1 }
 0x299   :  { %v1921_v43 = vsel %vm4661_vm14, %v1920_v9, %v1916_v61  ;;  %v1952_v32 = vadd.f32 %v2926_v33, %v1951_v48  ;;  %v2039_v55 = vand.u32 2147483648, %v4633_v1  ;;  %vm2034_vm4 = vweird.f32 %v2928_v8 }
 0x29a   :  { %v1922_v11 = vmul.f32 %v1921_v43, %v1897_v3  ;;  %v2031_v34 = vmul.f32 %v2928_v8, %v2030_v0  ;;  %v2066_v25 = vmul.f32 %v2065_v42, %v4357_v15  ;;  %v2110_v36 = vadd.f32 1.0, %v2636_v6 }
 0x29b   :  { %v1956_v58 = vsel %vm1955_vm3, %v2926_v33, %v1952_v32  ;;  %vm2033_vm5 = vweird.f32 %v4633_v1  ;;  %v2368_v62 = vadd.f32 %v2367_v5, %v2318_v26  ;;  %v2040_v41 = vor.u32 1.1754944e-38, %v2039_v55  ;;  %v4844_v33 = vld [vmem:[#allocation26_spill] sm:$0xff] }
 0x29c   :  { %v2930_v21 = vpop.eup %2929  ;;  %v2638_v16 = vclamps-f32 %v1922_v11, 1.0  ;;  %v1961_v46 = vsel %vm4668_vm2, %v1960_v40, %v1956_v58  ;;  %v2032_v59 = vadd.f32 %v2928_v8, %v2031_v34  ;;  %v4687_v28 = vadd.f32 1.0, %v2066_v25  ;;  %vm2035_vm6 = vmor %vm2033_vm5, %vm2034_vm4 }
 0x29d   :  { %v1962_v35 = vmul.f32 %v1961_v46, %v1937_v7  ;;  %v1989_v4 = vmul.f32 %v2930_v21, %v4657_v37  ;;  %v2462_v29 = vadd.f32 %v4679_v44, %v2368_v62  ;;  %vm2038_vm7 = vcmp.eq.f32.partialorder %v2037_v54, 8.507059e+37 }
 0x29e   :  { %v2112_v51 = vadd.f32 1.0, %v2638_v16  ;;  %v2036_v20 = vsel %vm2035_vm6, %v2928_v8, %v2032_v59  ;;  %2931 = vrcp.f32 %v4687_v28  ;;  %v2054_v1 = vadd.f32 0.18741608, %v2053_v17  ;;  %v2369_v17 = vpop.f32.mrf.mxu3  ;;  %v2323_v32 = vpop.f32.mrf.mxu2 }
 0x29f   :  { %v2639_v3 = vclamps-f32 %v1962_v35, 1.0  ;;  %v2041_v23 = vsel %vm2038_vm7, %v2040_v41, %v2036_v20  ;;  %v1990_v38 = vsub.f32 1.0, %v1989_v4  ;;  %2478 = vst [vmem:[#allocation12] sm:$0xff] %v2462_v29  ;;  %v2142_v50 = vmul.f32 %v2110_v36, %v4199_v12  ;;  %v4845_v35 = vld [vmem:[#allocation23_spill] sm:$0xff] }
 0x2a0   :  { %v2144_v49 = vmul.f32 %v2112_v51, %v4637_v53  ;;  %v2042_v63 = vmul.f32 %v2041_v23, %v4650_v13  ;;  %v1999_v19 = vand.u32 2147483648, %v4657_v37  ;;  %v769_v7 = vmul.f32 0.5, %v4844_v33 }
 0x2a1   :  { %v1991_v22 = vmul.f32 %v2930_v21, %v1990_v38  ;;  %vm1994_vm8 = vweird.f32 %v2930_v21  ;;  %v1997_v57 = vand.u32 2147483647, %v4657_v37  ;;  %v2113_v31 = vadd.f32 1.0, %v2639_v3 }
 0x2a2   :  { %v2178_v24 = vpack.c.bf16 %v2144_v49, %v2142_v50  ;;  %v2641_v45 = vclamps-f32 %v2042_v63, 1.0  ;;  %v2370_v27 = vadd.f32 %v2369_v17, %v2320_v14  ;;  %v1976_v12 = vadd.f32 1.1283791, %v4642_v39 }
 0x2a3   :  { %v771_v53 = vmul.f32 0.5, %v4298_v2  ;;  %v1992_v8 = vadd.f32 %v2930_v21, %v1991_v22  ;;  %vm1993_vm9 = vweird.f32 %v4657_v37  ;;  %v2055_v10 = vmul.f32 %v2054_v1, %v4357_v15 }
 0x2a4   :  { %v2932_v13 = vpop.eup %2931  ;;  %2396 = vmatmul.bf16.gmra.mxu3 %v2178_v24  ;;  %v2115_v9 = vadd.f32 1.0, %v2641_v45  ;;  %vm1995_vm10 = vmor %vm1993_vm9, %vm1994_vm8  ;;  %v2000_v56 = vor.u32 1.1754944e-38, %v1999_v19  ;;  %v2463_v52 = vadd.f32 %v4679_v44, %v2370_v27  ;;  %vm1998_vm11 = vcmp.eq.f32.partialorder %v1997_v57, 8.507059e+37 }
 0x2a5   :  { %v1996_v30 = vsel %vm1995_vm10, %v2930_v21, %v1992_v8  ;;  %v2069_v6 = vmul.f32 %v2932_v13, %v4687_v28  ;;  %v2145_v39 = vmul.f32 %v2113_v31, %v769_v7  ;;  %v1977_v37 = vmul.f32 %v1976_v12, %v4260_v18 }
 0x2a6   :  { %v2147_v48 = vmul.f32 %v2115_v9, %v771_v53  ;;  %v2001_v2 = vsel %vm1998_vm11, %v2000_v56, %v1996_v30  ;;  %2479 = vst [vmem:[#allocation12 + $0x8] sm:$0xff] %v2463_v52  ;;  %v2056_v61 = vadd.f32 1.1283791, %v2055_v10  ;;  %v2079_v40 = vand.u32 2147483648, %v4687_v28  ;;  %v2372_v54 = vpop.f32.mrf.mxu3  ;;  %v2325_v16 = vpop.f32.mrf.mxu2 }
 0x2a7   :  { %v2070_v60 = vsub.f32 1.0, %v2069_v6  ;;  %v2002_v0 = vmul.f32 %v2001_v2, %v1977_v37  ;;  %vm2074_vm12 = vweird.f32 %v2932_v13  ;;  %v2077_v43 = vand.u32 2147483647, %v4687_v28 }
 0x2a8   :  { %v2179_v15 = vpack.c.bf16 %v2147_v48, %v2145_v39  ;;  %v2373_v55 = vadd.f32 %v2372_v54, %v2323_v32  ;;  %vm2073_vm13 = vweird.f32 %v4687_v28  ;;  %v2080_v5 = vor.u32 1.1754944e-38, %v2079_v40  ;;  %v4846_v28 = vld [vmem:[#allocation36_spill] sm:$0xff] }
 0x2a9   :  { %v2071_v42 = vmul.f32 %v2932_v13, %v2070_v60  ;;  %vm2075_vm14 = vmor %vm2073_vm13, %vm2074_vm12  ;;  %v2057_v11 = vmul.f32 %v2056_v61, %v4327_v47  ;;  %v2640_v34 = vclamps-f32 %v2002_v0, 1.0  ;;  %vm2078_vm15 = vcmp.eq.f32.partialorder %v2077_v43, 8.507059e+37 }
 0x2aa   :  { %2352 = vmatmul.bf16.gmra.mxu2 %v2179_v15  ;;  %v2464_v18 = vadd.f32 %v4679_v44, %v2373_v55  ;;  %v770_v41 = vmul.f32 0.5, %v4845_v35  ;;  %v772_v4 = vmul.f32 0.5, %v4846_v28 }
 0x2ab   :  { %v2072_v26 = vadd.f32 %v2932_v13, %v2071_v42  ;;  %v2114_v21 = vadd.f32 1.0, %v2640_v34 }
 0x2ac   :  { %2480 = vst [vmem:[#allocation12 + $0x10] sm:$0xff] %v2464_v18 }
 0x2ad   :  { %v2076_v25 = vsel %vm2075_vm14, %v2932_v13, %v2072_v26  ;;  %v2146_v20 = vmul.f32 %v2114_v21, %v770_v41 }
 0x2ae   :  { %v2081_v36 = vsel %vm2078_vm15, %v2080_v5, %v2076_v25  ;;  %v2374_v46 = vpop.f32.mrf.mxu3  ;;  %v2328_v3 = vpop.f32.mrf.mxu2 }
 0x2af   :  { %v2082_v58 = vmul.f32 %v2081_v36, %v2057_v11  ;;  %v2375_v59 = vadd.f32 %v2374_v46, %v2325_v16 }
 0x2b1   :  { %v2642_v62 = vclamps-f32 %v2082_v58, 1.0  ;;  %v2465_v51 = vadd.f32 %v4679_v44, %v2375_v59 }
 0x2b3   :  { %v2116_v29 = vadd.f32 1.0, %v2642_v62  ;;  %2481 = vst [vmem:[#allocation12 + $0x18] sm:$0xff] %v2465_v51 }
 0x2b5   :  { %v2148_v47 = vmul.f32 %v2116_v29, %v772_v4 }
 0x2b6   :  { %v2377_v23 = vpop.f32.mrf.mxu3  ;;  %v2330_v49 = vpop.f32.mrf.mxu2 }
 0x2b7   :  { %v2180_v1 = vpack.c.bf16 %v2148_v47, %v2146_v20  ;;  %v2378_v38 = vadd.f32 %v2377_v23, %v2328_v3 }
 0x2b9   :  { %2401 = vmatmul.bf16.gmra.mxu3 %v2180_v1  ;;  %v2466_v50 = vadd.f32 %v4679_v44, %v2378_v38 }
 0x2bb   :  { %2482 = vst [vmem:[#allocation12 + $0x20] sm:$0xff] %v2466_v50 }
 0x2be   :  { %v2379_v63 = vpop.f32.mrf.mxu3  ;;  %v2333_v7 = vpop.f32.mrf.mxu2 }
 0x2bf   :  { %v2380_v19 = vadd.f32 %v2379_v63, %v2330_v49 }
 0x2c1   :  { %v2467_v33 = vadd.f32 %v4679_v44, %v2380_v19 }
 0x2c3   :  { %2483 = vst [vmem:[#allocation12 + $0x28] sm:$0xff] %v2467_v33 }
 0x2c6   :  { %v2335_v17 = vpop.f32.mrf.mxu2 }
 0x2c9   :  { %v2382_v22 = vpop.f32.mrf.mxu3 }
 0x2ca   :  { %v2383_v57 = vadd.f32 %v2382_v22, %v2333_v7 }
 0x2cc   :  { %v2468_v14 = vadd.f32 %v4679_v44, %v2383_v57 }
 0x2ce   :  { %2484 = vst [vmem:[#allocation12 + $0x30] sm:$0xff] %v2468_v14 }
 0x2d1   :  { %v2384_v24 = vpop.f32.mrf.mxu3 }
 0x2d2   :  { %v2385_v45 = vadd.f32 %v2384_v24, %v2335_v17 }
 0x2d3   :  { %v2338_v27 = vpop.f32.mrf.mxu2 }
 0x2d4   :  { %v2469_v31 = vadd.f32 %v4679_v44, %v2385_v45 }
 0x2d6   :  { %2485 = vst [vmem:[#allocation12 + $0x38] sm:$0xff] %v2469_v31 }
 0x2db   :  { %v2340_v13 = vpop.f32.mrf.mxu2 }
 0x2e6   :  { %v2387_v12 = vpop.f32.mrf.mxu3 }
 0x2e7   :  { %v2388_v53 = vadd.f32 %v2387_v12, %v2338_v27 }
 0x2e9   :  { %v2470_v8 = vadd.f32 %v4679_v44, %v2388_v53 }
 0x2eb   :  { %2486 = vst [vmem:[#allocation12 + $0x40] sm:$0xff] %v2470_v8 }
 0x2ee   :  { %v2389_v10 = vpop.f32.mrf.mxu3 }
 0x2ef   :  { %v2390_v9 = vadd.f32 %v2389_v10, %v2340_v13 }
 0x2f1   :  { %v2471_v56 = vadd.f32 %v4679_v44, %v2390_v9 }
 0x2f3   :  { %2487 = vst [vmem:[#allocation12 + $0x48] sm:$0xff] %v2471_v56 }
 0x2fb   :  { %v2343_v52 = vpop.f32.mrf.mxu2 }
 0x303   :  { %v2345_v48 = vpop.f32.mrf.mxu2 }
 0x305   :  { %v2392_v30 = vpop.f32.mrf.mxu3 }
 0x306   :  { %v2393_v6 = vadd.f32 %v2392_v30, %v2343_v52 }
 0x308   :  { %v2472_v39 = vadd.f32 %v4679_v44, %v2393_v6 }
 0x30a   :  { %2488 = vst [vmem:[#allocation12 + $0x50] sm:$0xff] %v2472_v39 }
 0x30b   :  { %v2348_v61 = vpop.f32.mrf.mxu2 }
 0x30d   :  { %v2394_v2 = vpop.f32.mrf.mxu3 }
 0x30e   :  { %v2395_v37 = vadd.f32 %v2394_v2, %v2345_v48 }
 0x310   :  { %v2473_v60 = vadd.f32 %v4679_v44, %v2395_v37 }
 0x312   :  { %2489 = vst [vmem:[#allocation12 + $0x58] sm:$0xff] %v2473_v60 }
 0x313   :  { %v2350_v42 = vpop.f32.mrf.mxu2 }
 0x327   :  { %v2397_v15 = vpop.f32.mrf.mxu3 }
 0x328   :  { %v2398_v40 = vadd.f32 %v2397_v15, %v2348_v61 }
 0x32a   :  { %v2474_v0 = vadd.f32 %v4679_v44, %v2398_v40 }
 0x32c   :  { %2490 = vst [vmem:[#allocation12 + $0x60] sm:$0xff] %v2474_v0 }
 0x32d   :  { %v2353_v55 = vpop.f32.mrf.mxu2 }
 0x32f   :  { %v2399_v43 = vpop.f32.mrf.mxu3 }
 0x330   :  { %v2400_v32 = vadd.f32 %v2399_v43, %v2350_v42 }
 0x332   :  { %v2475_v54 = vadd.f32 %v4679_v44, %v2400_v32 }
 0x334   :  { %2491 = vst [vmem:[#allocation12 + $0x68] sm:$0xff] %v2475_v54 }
 0x335   :  { %v2355_v11 = vpop.f32.mrf.mxu2 }
 0x33c   :  { %v2402_v26 = vpop.f32.mrf.mxu3 }
 0x33d   :  { %v2403_v5 = vadd.f32 %v2402_v26, %v2353_v55 }
 0x33f   :  { %v2476_v18 = vadd.f32 %v4679_v44, %v2403_v5 }
 0x341   :  { %2492 = vst [vmem:[#allocation12 + $0x70] sm:$0xff] %v2476_v18 }
 0x344   :  { %v2404_v34 = vpop.f32.mrf.mxu3 }
 0x345   :  { %v2405_v25 = vadd.f32 %v2404_v34, %v2355_v11 }
 0x347   :  { %v2477_v36 = vadd.f32 %v4679_v44, %v2405_v25 }
 0x349   :  { %2493 = vst [vmem:[#allocation12 + $0x78] sm:$0xff] %v2477_v36 }
 0x34a   :  { %2506 = dma.vmem_to_hbm [thread:$0]  %s2499_s20, 2048, %s2501_s23, [#allocation6], %s3063_s7, %s3063_s7, %s3064_s8  }
 0x34b   :  { %3059 = dma.done.wait [#allocation6], 2048  }
 0x34c   :  { %3060 = vsyncadd [#allocation6], 4294965248 }
 0x34d   :  { %2511 = vsyncpa [#allocation5], 1 }
 0x34e   :  { %2512 = vsyncpa [#allocation8], 1 }
 0x34f   :  { %2513 = vsyncpa [#allocation11], 1 }
 0x350   :  { %2514 = vsyncpa [#allocation6], 1 }

</bundles_post_ra>
